<compile_context>
chip_gen: v7x
topology: tpu7x:2x2x1
jax: 0.10.0
libtpu: 0.0.40
codegen_flags: <defaults>
</compile_context>

<pallas_src>
import functools

import jax
import jax.numpy as jnp
from jax.experimental import pallas as pl
from jax.experimental.pallas import tpu as pltpu


# ---------------------------------------------------------------------------
# helpers
# ---------------------------------------------------------------------------
def _rup(x, m):
    return ((x + m - 1) // m) * m


def _sigmoid(x):
    # tanh-based sigmoid: single EUP op, no inf intermediates, numerically stable.
    return 0.5 * (jnp.tanh(0.5 * x) + 1.0)


def _linear_t(x, w, b=None):
    """x: (N, in), w: (out, in) [PyTorch layout] -> (N, out), f32 accumulation."""
    y = jax.lax.dot_general(x, w, (((1,), (1,)), ((), ())),
                            preferred_element_type=jnp.float32)
    if b is not None:
        y = y + b
    return y


def _vmem():
    return pl.BlockSpec(memory_space=pltpu.MemorySpace.VMEM)


# ---------------------------------------------------------------------------
# kernel 1 (runs once): h0/c0 init + time-invariant encoder attention projection
# ---------------------------------------------------------------------------
def _init_kernel(enc_ref, w_h_ref, b_h_ref, w_c_ref, b_c_ref,
                 w_enc_ref, b_enc_ref,
                 h_ref, c_ref, att1_ref, *, inv_num_pixels):
    enc = enc_ref[...]                                        # (Bp, Pp, Ep) f32
    Bp, Pp, Ep = enc.shape
    Ap = att1_ref.shape[2]

    # mean over real pixels (padded pixels are zero, divide by true P)
    mean_enc = (jnp.sum(enc, axis=1) * inv_num_pixels).astype(jnp.bfloat16)
    h_ref[...] = _linear_t(mean_enc, w_h_ref[...], b_h_ref[...])
    c_ref[...] = _linear_t(mean_enc, w_c_ref[...], b_c_ref[...])

    # att1 = encoder_att(enc): independent of t -> computed once, kept resident.
    enc2d = enc.astype(jnp.bfloat16).reshape(Bp * Pp, Ep)
    att1 = _linear_t(enc2d, w_enc_ref[...], b_enc_ref[...])
    att1_ref[...] = att1.reshape(Bp, Pp, Ap)


# ---------------------------------------------------------------------------
# kernel 2 (grid over time): attention -> gate -> LSTMCell -> fc, per step t
# ---------------------------------------------------------------------------
def _decode_kernel(bt_ref,                      # scalar prefetch: (T,) int32 in SMEM
                   enc_ref, att1_ref, emb_ref, h0_ref, c0_ref,
                   w_dec_ref, b_dec_ref, w_full_ref,
                   w_fbeta_ref, b_fbeta_ref,
                   w_ih_emb_ref, w_ih_awe_ref, w_hh_ref, b_lstm_ref,
                   w_fc_ref, b_fc_ref,
                   preds_ref, alpha_ref,
                   h_s, c_s,
                   *, num_pixels, Dp):
    t = pl.program_id(0)
    bt = bt_ref[t]                              # active batch size at step t

    @pl.when(t == 0)
    def _():
        h_s[...] = h0_ref[...]
        c_s[...] = c0_ref[...]

    h = h_s[...]                                # (Bp, Dp) f32
    c = c_s[...]
    h_bf = h.astype(jnp.bfloat16)
    enc = enc_ref[...]                          # (Bp, Pp, Ep) bf16
    Bp, Pp, _ = enc.shape

    # ---- attention ----
    att2 = _linear_t(h_bf, w_dec_ref[...], b_dec_ref[...])          # (Bp, Ap)
    att_h = jnp.maximum(att1_ref[...] + att2[:, None, :], 0.0)      # (Bp, Pp, Ap)
    score = jnp.sum(att_h * w_full_ref[...], axis=-1)               # (Bp, Pp)
    # full_att bias folded out: a constant added to all pixel logits cancels in softmax.
    pix = jax.lax.broadcasted_iota(jnp.int32, (Bp, Pp), 1)
    score = jnp.where(pix < num_pixels, score, -jnp.inf)            # mask padded pixels
    score_max = jnp.max(score, axis=-1, keepdims=True)
    e = jnp.exp(score - score_max)
    alpha = e / jnp.sum(e, axis=-1, keepdims=True)                  # (Bp, Pp) f32

    # attention-weighted encoding on the MXU (batched matvec)
    awe = jnp.einsum('bqp,bpe->bqe',
                     alpha.astype(jnp.bfloat16)[:, None, :], enc,
                     preferred_element_type=jnp.float32)[:, 0, :]   # (Bp, Ep)

    # ---- gate ----
    gate = _sigmoid(_linear_t(h_bf, w_fbeta_ref[...], b_fbeta_ref[...]))  # (Bp, Ep)
    awe = gate * awe
    awe_bf = awe.astype(jnp.bfloat16)

    # ---- LSTMCell on concat([embedding_t, awe]) with pre-split / pre-summed weights ----
    emb = emb_ref[0]                                                # (Bp, Mp) bf16
    gates = (_linear_t(emb, w_ih_emb_ref[...])
             + _linear_t(awe_bf, w_ih_awe_ref[...])
             + _linear_t(h_bf, w_hh_ref[...])
             + b_lstm_ref[...])                                     # (Bp, 4*Dp) f32
    i_g = _sigmoid(gates[:, 0:Dp])
    f_g = _sigmoid(gates[:, Dp:2 * Dp])
    g_g = jnp.tanh(gates[:, 2 * Dp:3 * Dp])
    o_g = _sigmoid(gates[:, 3 * Dp:4 * Dp])
    c_new = f_g * c + i_g * g_g
    h_new = o_g * jnp.tanh(c_new)

    # ---- output projection ----
    # TODO(synk): nn.Dropout(p=0.5) is stochastic in train mode; modeled as eval-mode identity.
    preds = _linear_t(h_new.astype(jnp.bfloat16), w_fc_ref[...], b_fc_ref[...])  # (Bp, Vp)

    # ---- shrinking-batch masking (rows >= batch_size_t are not processed in PyTorch) ----
    row = jax.lax.broadcasted_iota(jnp.int32, (Bp, 1), 0)
    active = row < bt
    h_s[...] = jnp.where(active, h_new, h)
    c_s[...] = jnp.where(active, c_new, c)
    preds_ref[0] = jnp.where(active, preds, 0.0)
    alpha_ref[0] = jnp.where(active, alpha, 0.0)


# ---------------------------------------------------------------------------
# full forward (wrapper glue: sort, pad, embedding gather, two pallas_calls)
# ---------------------------------------------------------------------------
def decoder_forward(params, encoder_out, encoded_captions, caption_lengths):
    B = encoder_out.shape[0]
    E = encoder_out.shape[-1]
    P = encoder_out.shape[1] * encoder_out.shape[2]
    L = encoded_captions.shape[1]
    T = L - 1                                   # static time extent

    V, M = params["embedding"].shape
    D = params["w_init_h"].shape[0]
    A = params["w_enc_att"].shape[0]

    Bp = _rup(B, 8)
    Pp = _rup(P, 128)
    Ep = _rup(E, 128)
    Dp = _rup(D, 128)
    Ap = _rup(A, 128)
    Mp = _rup(M, 128)
    Vp = _rup(V, 128)

    # ---- sort by caption length, descending (like torch.sort(descending=True)) ----
    lens = caption_lengths[:, 0]
    sort_ind = jnp.argsort(-lens)
    lens_sorted = lens[sort_ind]
    enc = encoder_out.reshape(B, P, E)[sort_ind]
    caps_sorted = encoded_captions[sort_ind]
    decode_lengths = (lens_sorted - 1).astype(jnp.int32)   # device array (torch returns .tolist())

    # per-step active batch sizes, all on device (scalar prefetch input)
    t_idx = jnp.arange(T, dtype=jnp.int32)
    bt_arr = jnp.sum((decode_lengths[None, :] > t_idx[:, None]).astype(jnp.int32), axis=1)

    # ---- pad & cast parameters / activations ----
    def pad2(x, r, c):
        return jnp.pad(x, ((0, r - x.shape[0]), (0, c - x.shape[1])))

    enc_p = jnp.pad(enc, ((0, Bp - B), (0, Pp - P), (0, Ep - E)))
    enc_bf = enc_p.astype(jnp.bfloat16)

    w_init_h = pad2(params["w_init_h"], Dp, Ep).astype(jnp.bfloat16)
    b_init_h = pad2(params["b_init_h"], 1, Dp)
    w_init_c = pad2(params["w_init_c"], Dp, Ep).astype(jnp.bfloat16)
    b_init_c = pad2(params["b_init_c"], 1, Dp)
    w_enc_att = pad2(params["w_enc_att"], Ap, Ep).astype(jnp.bfloat16)
    b_enc_att = pad2(params["b_enc_att"], 1, Ap)
    w_dec_att = pad2(params["w_dec_att"], Ap, Dp).astype(jnp.bfloat16)
    b_dec_att = pad2(params["b_dec_att"], 1, Ap)
    w_full_att = pad2(params["w_full_att"], 1, Ap).reshape(1, 1, Ap)   # f32 (VPU operand)
    w_f_beta = pad2(params["w_f_beta"], Ep, Dp).astype(jnp.bfloat16)
    b_f_beta = pad2(params["b_f_beta"], 1, Ep)

    def pad_gate_w(w, in_dim, in_p):
        # pad each of the 4 LSTM gate blocks separately so gate slices stay 128-aligned
        w4 = w.reshape(4, D, in_dim)
        w4 = jnp.pad(w4, ((0, 0), (0, Dp - D), (0, in_p - in_dim)))
        return w4.reshape(4 * Dp, in_p).astype(jnp.bfloat16)

    w_ih = params["w_ih"]
    w_ih_emb = pad_gate_w(w_ih[:, :M], M, Mp)
    w_ih_awe = pad_gate_w(w_ih[:, M:], E, Ep)
    w_hh = pad_gate_w(params["w_hh"], D, Dp)
    b_lstm = (params["b_ih"] + params["b_hh"]).reshape(4, D)
    b_lstm = jnp.pad(b_lstm, ((0, 0), (0, Dp - D))).reshape(1, 4 * Dp)

    w_fc = pad2(params["w_fc"], Vp, Dp).astype(jnp.bfloat16)
    b_fc = pad2(params["b_fc"], 1, Vp)

    emb_table = jnp.pad(params["embedding"], ((0, 0), (0, Mp - M)))
    embeddings = emb_table[caps_sorted]                                 # (B, L, Mp) gather (glue)
    emb_steps = jnp.transpose(embeddings[:, :T, :], (1, 0, 2))          # time-major (T, B, Mp)
    emb_steps = jnp.pad(emb_steps, ((0, 0), (0, Bp - B), (0, 0))).astype(jnp.bfloat16)

    # ---- one-time init kernel: h0, c0, att1 ----
    init_k = functools.partial(_init_kernel, inv_num_pixels=1.0 / P)
    h0, c0, att1 = pl.pallas_call(
        init_k,
        out_shape=(jax.ShapeDtypeStruct((Bp, Dp), jnp.float32),
                   jax.ShapeDtypeStruct((Bp, Dp), jnp.float32),
                   jax.ShapeDtypeStruct((Bp, Pp, Ap), jnp.float32)),
        in_specs=[_vmem()] * 7,
        out_specs=(_vmem(), _vmem(), _vmem()),
    )(enc_p, w_init_h, b_init_h, w_init_c, b_init_c, w_enc_att, b_enc_att)

    # ---- single time-folded decode kernel ----
    decode_k = functools.partial(_decode_kernel, num_pixels=P, Dp=Dp)

    def cmap(shape):
        return pl.BlockSpec(shape, lambda t, bt, s=len(shape): (0,) * s)

    grid_spec = pltpu.PrefetchScalarGridSpec(
        num_scalar_prefetch=1,
        grid=(T,),
        in_specs=[
            cmap((Bp, Pp, Ep)),                                   # enc (bf16), resident
            cmap((Bp, Pp, Ap)),                                   # att1, resident
            pl.BlockSpec((1, Bp, Mp), lambda t, bt: (t, 0, 0)),   # embeddings[t]
            cmap((Bp, Dp)), cmap((Bp, Dp)),                       # h0, c0
            cmap((Ap, Dp)), cmap((1, Ap)),                        # w_dec_att, b_dec_att
            cmap((1, 1, Ap)),                                     # w_full_att
            cmap((Ep, Dp)), cmap((1, Ep)),                        # w_f_beta, b_f_beta
            cmap((4 * Dp, Mp)), cmap((4 * Dp, Ep)),               # w_ih_emb, w_ih_awe
            cmap((4 * Dp, Dp)), cmap((1, 4 * Dp)),                # w_hh, b_lstm
            cmap((Vp, Dp)), cmap((1, Vp)),                        # w_fc, b_fc
        ],
        out_specs=[
            pl.BlockSpec((1, Bp, Vp), lambda t, bt: (t, 0, 0)),   # predictions[t]
            pl.BlockSpec((1, Bp, Pp), lambda t, bt: (t, 0, 0)),   # alphas[t]
        ],
        scratch_shapes=[
            pltpu.VMEM((Bp, Dp), jnp.float32),                    # h carry
            pltpu.VMEM((Bp, Dp), jnp.float32),                    # c carry
        ],
    )

    preds_t, alphas_t = pl.pallas_call(
        decode_k,
        grid_spec=grid_spec,
        out_shape=(jax.ShapeDtypeStruct((T, Bp, Vp), jnp.float32),
                   jax.ShapeDtypeStruct((T, Bp, Pp), jnp.float32)),
        compiler_params=pltpu.CompilerParams(
            dimension_semantics=("arbitrary",),       # sequential recurrence over time
            vmem_limit_bytes=48 * 1024 * 1024),
    )(bt_arr, enc_bf, att1, emb_steps, h0, c0,
      w_dec_att, b_dec_att, w_full_att,
      w_f_beta, b_f_beta,
      w_ih_emb, w_ih_awe, w_hh, b_lstm,
      w_fc, b_fc)

    predictions = jnp.transpose(preds_t, (1, 0, 2))[:B, :, :V]
    alphas = jnp.transpose(alphas_t, (1, 0, 2))[:B, :, :P]
    return predictions, caps_sorted, decode_lengths, alphas, sort_ind


# ---------------------------------------------------------------------------
# deterministic synthetic parameters (PyTorch nn.Linear weight layout)
# ---------------------------------------------------------------------------
def init_params(key, attention_dim, embed_dim, decoder_dim, vocab_size, encoder_dim):
    A, M, D, V, E = attention_dim, embed_dim, decoder_dim, vocab_size, encoder_dim
    ks = jax.random.split(key, 18)

    def u(k, shape):
        return jax.random.uniform(k, shape, jnp.float32, -0.1, 0.1)

    return {
        "embedding": u(ks[0], (V, M)),
        "w_enc_att": u(ks[1], (A, E)), "b_enc_att": u(ks[2], (1, A)),
        "w_dec_att": u(ks[3], (A, D)), "b_dec_att": u(ks[4], (1, A)),
        "w_full_att": u(ks[5], (1, A)), "b_full_att": u(ks[6], (1, 1)),
        "w_init_h": u(ks[7], (D, E)), "b_init_h": u(ks[8], (1, D)),
        "w_init_c": u(ks[9], (D, E)), "b_init_c": u(ks[10], (1, D)),
        "w_f_beta": u(ks[11], (E, D)), "b_f_beta": u(ks[12], (1, E)),
        "w_ih": u(ks[13], (4 * D, M + E)), "b_ih": u(ks[14], (1, 4 * D)),
        "w_hh": u(ks[15], (4 * D, D)), "b_hh": u(ks[16], (1, 4 * D)),
        "w_fc": u(ks[17], (V, D)), "b_fc": jnp.zeros((1, V), jnp.float32),
    }


if __name__ == "__main__":
    key = jax.random.PRNGKey(0)
    # small shapes consistent with the module's forward
    B, enc_size, E = 4, 4, 32          # encoder_out: (B, 4, 4, 32) -> 16 pixels
    A, M, D, V = 32, 32, 32, 40        # attention / embed / decoder dims, vocab
    L = 8                              # max caption length

    pkey, xkey, ckey = jax.random.split(key, 3)
    params = init_params(pkey, A, M, D, V, E)

    encoder_out = jax.random.normal(xkey, (B, enc_size, enc_size, E), jnp.float32)
    encoded_captions = jax.random.randint(ckey, (B, L), 0, V, dtype=jnp.int32)
    caption_lengths = jnp.array([[6], [8], [5], [7]], dtype=jnp.int32)

    fwd = jax.jit(decoder_forward)
    preds, caps_sorted, dec_lens, alphas, sort_ind = fwd(
        params, encoder_out, encoded_captions, caption_lengths)
    jax.block_until_ready((preds, alphas, caps_sorted, dec_lens, sort_ind))

    assert preds.shape == (B, L - 1, V)
    assert alphas.shape == (B, L - 1, enc_size * enc_size)
    assert int(jnp.max(dec_lens)) == L - 1     # demo max_dec == L-1, matches reference shape
    print("KERNEL_OK")
</pallas_src>

<mosaic_0001>
module attributes {stable_mosaic.version = 11 : i64} {
  func.func @_init_kernel(%arg0: memref<8x128x128xf32, #tpu.memory_space<vmem>>, %arg1: memref<128x128xbf16, #tpu.memory_space<vmem>>, %arg2: memref<1x128xf32, #tpu.memory_space<vmem>>, %arg3: memref<128x128xbf16, #tpu.memory_space<vmem>>, %arg4: memref<1x128xf32, #tpu.memory_space<vmem>>, %arg5: memref<128x128xbf16, #tpu.memory_space<vmem>>, %arg6: memref<1x128xf32, #tpu.memory_space<vmem>>, %arg7: memref<8x128xf32, #tpu.memory_space<vmem>>, %arg8: memref<8x128xf32, #tpu.memory_space<vmem>>, %arg9: memref<8x128x128xf32, #tpu.memory_space<vmem>>) attributes {dimension_semantics = [], scalar_prefetch = 0 : i64, scratch_operands = 0 : i64, tpu.core_type = #tpu.core_type<tc>} {
    %c0 = arith.constant 0 : index
    %c0_0 = arith.constant 0 : index
    %c0_1 = arith.constant 0 : index
    %0 = vector.load %arg0[%c0, %c0_0, %c0_1] : memref<8x128x128xf32, #tpu.memory_space<vmem>>, vector<8x128x128xf32>
    %cst = arith.constant dense<0.000000e+00> : vector<8x128xf32>
    %1 = vector.multi_reduction <add>, %0, %cst [1] : vector<8x128x128xf32> to vector<8x128xf32>
    %cst_2 = arith.constant 6.250000e-02 : f32
    %2 = vector.broadcast %cst_2 : f32 to vector<8x128xf32>
    %3 = arith.mulf %1, %2 : vector<8x128xf32>
    %4 = arith.truncf %3 : vector<8x128xf32> to vector<8x128xbf16>
    %c0_3 = arith.constant 0 : index
    %c0_4 = arith.constant 0 : index
    %5 = vector.load %arg1[%c0_3, %c0_4] : memref<128x128xbf16, #tpu.memory_space<vmem>>, vector<128x128xbf16>
    %c0_5 = arith.constant 0 : index
    %c0_6 = arith.constant 0 : index
    %6 = vector.load %arg2[%c0_5, %c0_6] : memref<1x128xf32, #tpu.memory_space<vmem>>, vector<1x128xf32>
    %cst_7 = arith.constant dense<0.000000e+00> : vector<8x128xf32>
    %7 = tpu.matmul %4, %5, %cst_7 {dimension_numbers = #tpu.dot_dimension_numbers<[1], [1], [0], [0], [0, 0, 1, 0], [], []>} : vector<8x128xbf16>, vector<128x128xbf16>, vector<8x128xf32> -> vector<8x128xf32>
    %8 = vector.broadcast %6 : vector<1x128xf32> to vector<8x128xf32>
    %9 = arith.addf %7, %8 : vector<8x128xf32>
    %c0_8 = arith.constant 0 : index
    %c0_9 = arith.constant 0 : index
    %10 = vector.load %arg7[%c0_8, %c0_9] : memref<8x128xf32, #tpu.memory_space<vmem>>, vector<8x128xf32>
    tpu.vector_store %arg7[%c0_8, %c0_9], %9 {strides = array<i32>} : memref<8x128xf32, #tpu.memory_space<vmem>>, vector<8x128xf32>,
    %c0_10 = arith.constant 0 : index
    %c0_11 = arith.constant 0 : index
    %11 = vector.load %arg3[%c0_10, %c0_11] : memref<128x128xbf16, #tpu.memory_space<vmem>>, vector<128x128xbf16>
    %c0_12 = arith.constant 0 : index
    %c0_13 = arith.constant 0 : index
    %12 = vector.load %arg4[%c0_12, %c0_13] : memref<1x128xf32, #tpu.memory_space<vmem>>, vector<1x128xf32>
    %cst_14 = arith.constant dense<0.000000e+00> : vector<8x128xf32>
    %13 = tpu.matmul %4, %11, %cst_14 {dimension_numbers = #tpu.dot_dimension_numbers<[1], [1], [0], [0], [0, 0, 1, 0], [], []>} : vector<8x128xbf16>, vector<128x128xbf16>, vector<8x128xf32> -> vector<8x128xf32>
    %14 = vector.broadcast %12 : vector<1x128xf32> to vector<8x128xf32>
    %15 = arith.addf %13, %14 : vector<8x128xf32>
    %c0_15 = arith.constant 0 : index
    %c0_16 = arith.constant 0 : index
    %16 = vector.load %arg8[%c0_15, %c0_16] : memref<8x128xf32, #tpu.memory_space<vmem>>, vector<8x128xf32>
    tpu.vector_store %arg8[%c0_15, %c0_16], %15 {strides = array<i32>} : memref<8x128xf32, #tpu.memory_space<vmem>>, vector<8x128xf32>,
    %17 = arith.truncf %0 : vector<8x128x128xf32> to vector<8x128x128xbf16>
    %18 = vector.shape_cast %17 : vector<8x128x128xbf16> to vector<1024x128xbf16>
    %c0_17 = arith.constant 0 : index
    %c0_18 = arith.constant 0 : index
    %19 = vector.load %arg5[%c0_17, %c0_18] : memref<128x128xbf16, #tpu.memory_space<vmem>>, vector<128x128xbf16>
    %c0_19 = arith.constant 0 : index
    %c0_20 = arith.constant 0 : index
    %20 = vector.load %arg6[%c0_19, %c0_20] : memref<1x128xf32, #tpu.memory_space<vmem>>, vector<1x128xf32>
    %cst_21 = arith.constant dense<0.000000e+00> : vector<1024x128xf32>
    %21 = tpu.matmul %18, %19, %cst_21 {dimension_numbers = #tpu.dot_dimension_numbers<[1], [1], [0], [0], [0, 0, 1, 0], [], []>} : vector<1024x128xbf16>, vector<128x128xbf16>, vector<1024x128xf32> -> vector<1024x128xf32>
    %22 = vector.broadcast %20 : vector<1x128xf32> to vector<1024x128xf32>
    %23 = arith.addf %21, %22 : vector<1024x128xf32>
    %24 = vector.shape_cast %23 : vector<1024x128xf32> to vector<8x128x128xf32>
    %c0_22 = arith.constant 0 : index
    %c0_23 = arith.constant 0 : index
    %c0_24 = arith.constant 0 : index
    %25 = vector.load %arg9[%c0_22, %c0_23, %c0_24] : memref<8x128x128xf32, #tpu.memory_space<vmem>>, vector<8x128x128xf32>
    tpu.vector_store %arg9[%c0_22, %c0_23, %c0_24], %24 {strides = array<i32>} : memref<8x128x128xf32, #tpu.memory_space<vmem>>, vector<8x128x128xf32>,
    return
  }
}

module attributes {stable_mosaic.version = 11 : i64} {
  func.func @_decode_kernel(%arg0: i32, %arg1: memref<7xi32, #tpu.memory_space<smem>>, %arg2: memref<8x128x128xbf16, #tpu.memory_space<vmem>>, %arg3: memref<8x128x128xf32, #tpu.memory_space<vmem>>, %arg4: memref<1x8x128xbf16, #tpu.memory_space<vmem>>, %arg5: memref<8x128xf32, #tpu.memory_space<vmem>>, %arg6: memref<8x128xf32, #tpu.memory_space<vmem>>, %arg7: memref<128x128xbf16, #tpu.memory_space<vmem>>, %arg8: memref<1x128xf32, #tpu.memory_space<vmem>>, %arg9: memref<1x1x128xf32, #tpu.memory_space<vmem>>, %arg10: memref<128x128xbf16, #tpu.memory_space<vmem>>, %arg11: memref<1x128xf32, #tpu.memory_space<vmem>>, %arg12: memref<512x128xbf16, #tpu.memory_space<vmem>>, %arg13: memref<512x128xbf16, #tpu.memory_space<vmem>>, %arg14: memref<512x128xbf16, #tpu.memory_space<vmem>>, %arg15: memref<1x512xf32, #tpu.memory_space<vmem>>, %arg16: memref<128x128xbf16, #tpu.memory_space<vmem>>, %arg17: memref<1x128xf32, #tpu.memory_space<vmem>>, %arg18: memref<1x8x128xf32, #tpu.memory_space<vmem>>, %arg19: memref<1x8x128xf32, #tpu.memory_space<vmem>>, %arg20: memref<8x128xf32, #tpu.memory_space<vmem>>, %arg21: memref<8x128xf32, #tpu.memory_space<vmem>>) attributes {dimension_semantics = [#tpu.dimension_semantics<arbitrary>], iteration_bounds = array<i64: 7>, scalar_prefetch = 1 : i64, scratch_operands = 2 : i64, tpu.core_type = #tpu.core_type<tc>, window_params = [{pipeline_mode = #tpu.pipeline_mode<synchronous>, transform_indices = @transform_0, window_bounds = array<i64: 8, 128, 128>}, {pipeline_mode = #tpu.pipeline_mode<synchronous>, transform_indices = @transform_1, window_bounds = array<i64: 8, 128, 128>}, {transform_indices = @transform_2, window_bounds = array<i64: 1, 8, 128>}, {pipeline_mode = #tpu.pipeline_mode<synchronous>, transform_indices = @transform_3, window_bounds = array<i64: 8, 128>}, {pipeline_mode = #tpu.pipeline_mode<synchronous>, transform_indices = @transform_4, window_bounds = array<i64: 8, 128>}, {pipeline_mode = #tpu.pipeline_mode<synchronous>, transform_indices = @transform_5, window_bounds = array<i64: 128, 128>}, {pipeline_mode = #tpu.pipeline_mode<synchronous>, transform_indices = @transform_6, window_bounds = array<i64: 1, 128>}, {pipeline_mode = #tpu.pipeline_mode<synchronous>, transform_indices = @transform_7, window_bounds = array<i64: 1, 1, 128>}, {pipeline_mode = #tpu.pipeline_mode<synchronous>, transform_indices = @transform_8, window_bounds = array<i64: 128, 128>}, {pipeline_mode = #tpu.pipeline_mode<synchronous>, transform_indices = @transform_9, window_bounds = array<i64: 1, 128>}, {pipeline_mode = #tpu.pipeline_mode<synchronous>, transform_indices = @transform_10, window_bounds = array<i64: 512, 128>}, {pipeline_mode = #tpu.pipeline_mode<synchronous>, transform_indices = @transform_11, window_bounds = array<i64: 512, 128>}, {pipeline_mode = #tpu.pipeline_mode<synchronous>, transform_indices = @transform_12, window_bounds = array<i64: 512, 128>}, {pipeline_mode = #tpu.pipeline_mode<synchronous>, transform_indices = @transform_13, window_bounds = array<i64: 1, 512>}, {pipeline_mode = #tpu.pipeline_mode<synchronous>, transform_indices = @transform_14, window_bounds = array<i64: 128, 128>}, {pipeline_mode = #tpu.pipeline_mode<synchronous>, transform_indices = @transform_15, window_bounds = array<i64: 1, 128>}, {transform_indices = @transform_16, window_bounds = array<i64: 1, 8, 128>}, {transform_indices = @transform_17, window_bounds = array<i64: 1, 8, 128>}]} {
    %0 = arith.index_cast %arg0 : i32 to index
    %1 = memref.load %arg1[%0] : memref<7xi32, #tpu.memory_space<smem>>
    %c0_i32 = arith.constant 0 : i32
    %2 = arith.cmpi eq, %arg0, %c0_i32 : i32
    %3 = arith.extui %2 : i1 to i32
    %c0_i32_0 = arith.constant 0 : i32
    %4 = arith.cmpi ne, %3, %c0_i32_0 : i32
    scf.if %4 {
      %c0_71 = arith.constant 0 : index
      %c0_72 = arith.constant 0 : index
      %131 = vector.load %arg5[%c0_71, %c0_72] : memref<8x128xf32, #tpu.memory_space<vmem>>, vector<8x128xf32>
      %c0_73 = arith.constant 0 : index
      %c0_74 = arith.constant 0 : index
      %132 = vector.load %arg20[%c0_73, %c0_74] : memref<8x128xf32, #tpu.memory_space<vmem>>, vector<8x128xf32>
      tpu.vector_store %arg20[%c0_73, %c0_74], %131 {strides = array<i32>} : memref<8x128xf32, #tpu.memory_space<vmem>>, vector<8x128xf32>,
      %c0_75 = arith.constant 0 : index
      %c0_76 = arith.constant 0 : index
      %133 = vector.load %arg6[%c0_75, %c0_76] : memref<8x128xf32, #tpu.memory_space<vmem>>, vector<8x128xf32>
      %c0_77 = arith.constant 0 : index
      %c0_78 = arith.constant 0 : index
      %134 = vector.load %arg21[%c0_77, %c0_78] : memref<8x128xf32, #tpu.memory_space<vmem>>, vector<8x128xf32>
      tpu.vector_store %arg21[%c0_77, %c0_78], %133 {strides = array<i32>} : memref<8x128xf32, #tpu.memory_space<vmem>>, vector<8x128xf32>,
    } else {
    }
    %c0 = arith.constant 0 : index
    %c0_1 = arith.constant 0 : index
    %5 = vector.load %arg20[%c0, %c0_1] : memref<8x128xf32, #tpu.memory_space<vmem>>, vector<8x128xf32>
    %c0_2 = arith.constant 0 : index
    %c0_3 = arith.constant 0 : index
    %6 = vector.load %arg21[%c0_2, %c0_3] : memref<8x128xf32, #tpu.memory_space<vmem>>, vector<8x128xf32>
    %7 = arith.truncf %5 : vector<8x128xf32> to vector<8x128xbf16>
    %c0_4 = arith.constant 0 : index
    %c0_5 = arith.constant 0 : index
    %c0_6 = arith.constant 0 : index
    %8 = vector.load %arg2[%c0_4, %c0_5, %c0_6] : memref<8x128x128xbf16, #tpu.memory_space<vmem>>, vector<8x128x128xbf16>
    %c0_7 = arith.constant 0 : index
    %c0_8 = arith.constant 0 : index
    %9 = vector.load %arg7[%c0_7, %c0_8] : memref<128x128xbf16, #tpu.memory_space<vmem>>, vector<128x128xbf16>
    %c0_9 = arith.constant 0 : index
    %c0_10 = arith.constant 0 : index
    %10 = vector.load %arg8[%c0_9, %c0_10] : memref<1x128xf32, #tpu.memory_space<vmem>>, vector<1x128xf32>
    %cst = arith.constant dense<0.000000e+00> : vector<8x128xf32>
    %11 = tpu.matmul %7, %9, %cst {dimension_numbers = #tpu.dot_dimension_numbers<[1], [1], [0], [0], [0, 0, 1, 0], [], []>} : vector<8x128xbf16>, vector<128x128xbf16>, vector<8x128xf32> -> vector<8x128xf32>
    %12 = vector.broadcast %10 : vector<1x128xf32> to vector<8x128xf32>
    %13 = arith.addf %11, %12 : vector<8x128xf32>
    %c0_11 = arith.constant 0 : index
    %c0_12 = arith.constant 0 : index
    %c0_13 = arith.constant 0 : index
    %14 = vector.load %arg3[%c0_11, %c0_12, %c0_13] : memref<8x128x128xf32, #tpu.memory_space<vmem>>, vector<8x128x128xf32>
    %15 = vector.shape_cast %13 : vector<8x128xf32> to vector<8x1x128xf32>
    %16 = vector.broadcast %15 : vector<8x1x128xf32> to vector<8x128x128xf32>
    %17 = arith.addf %14, %16 : vector<8x128x128xf32>
    %cst_14 = arith.constant 0.000000e+00 : f32
    %18 = vector.broadcast %cst_14 : f32 to vector<8x128x128xf32>
    %19 = arith.maximumf %17, %18 : vector<8x128x128xf32>
    %c0_15 = arith.constant 0 : index
    %c0_16 = arith.constant 0 : index
    %c0_17 = arith.constant 0 : index
    %20 = vector.load %arg9[%c0_15, %c0_16, %c0_17] : memref<1x1x128xf32, #tpu.memory_space<vmem>>, vector<1x1x128xf32>
    %21 = vector.broadcast %20 : vector<1x1x128xf32> to vector<8x128x128xf32>
    %22 = arith.mulf %19, %21 : vector<8x128x128xf32>
    %cst_18 = arith.constant dense<0.000000e+00> : vector<8x128xf32>
    %23 = vector.multi_reduction <add>, %22, %cst_18 [2] : vector<8x128x128xf32> to vector<8x128xf32>
    %24 = tpu.iota {dimensions = array<i32: 1>} : vector<8x128xi32>
    %c16_i32 = arith.constant 16 : i32
    %25 = vector.broadcast %c16_i32 : i32 to vector<8x128xi32>
    %26 = arith.cmpi slt, %24, %25 : vector<8x128xi32>
    %cst_19 = arith.constant 0xFF800000 : f32
    %27 = vector.broadcast %cst_19 : f32 to vector<8x128xf32>
    %28 = arith.select %26, %23, %27 : vector<8x128xi1>, vector<8x128xf32>
    %cst_20 = arith.constant dense<0xFF800000> : vector<8xf32>
    %29 = vector.multi_reduction <maximumf>, %28, %cst_20 [1] : vector<8x128xf32> to vector<8xf32>
    %30 = vector.shape_cast %29 : vector<8xf32> to vector<8x1xf32>
    %31 = vector.broadcast %30 : vector<8x1xf32> to vector<8x128xf32>
    %32 = arith.subf %28, %31 : vector<8x128xf32>
    %33 = math.exp %32 : vector<8x128xf32>
    %cst_21 = arith.constant dense<0.000000e+00> : vector<8xf32>
    %34 = vector.multi_reduction <add>, %33, %cst_21 [1] : vector<8x128xf32> to vector<8xf32>
    %35 = vector.shape_cast %34 : vector<8xf32> to vector<8x1xf32>
    %36 = vector.broadcast %35 : vector<8x1xf32> to vector<8x128xf32>
    %37 = arith.divf %33, %36 : vector<8x128xf32>
    %38 = arith.truncf %37 : vector<8x128xf32> to vector<8x128xbf16>
    %39 = vector.shape_cast %38 : vector<8x128xbf16> to vector<8x1x128xbf16>
    "tpu.trace_start"() <{level = 10 : i32, message = "bqp,bpe->bqe"}> : () -> ()
    %cst_22 = arith.constant dense<0.000000e+00> : vector<8x1x128xf32>
    %40 = tpu.matmul %39, %8, %cst_22 {dimension_numbers = #tpu.dot_dimension_numbers<[2], [1], [1], [2], [0, 0, 0, 1, 1, 2], [0], [0]>} : vector<8x1x128xbf16>, vector<8x128x128xbf16>, vector<8x1x128xf32> -> vector<8x1x128xf32>
    "tpu.trace_stop"() : () -> ()
    %41 = vector.shape_cast %40 : vector<8x1x128xf32> to vector<8x128xf32>
    %c0_23 = arith.constant 0 : index
    %c0_24 = arith.constant 0 : index
    %42 = vector.load %arg10[%c0_23, %c0_24] : memref<128x128xbf16, #tpu.memory_space<vmem>>, vector<128x128xbf16>
    %c0_25 = arith.constant 0 : index
    %c0_26 = arith.constant 0 : index
    %43 = vector.load %arg11[%c0_25, %c0_26] : memref<1x128xf32, #tpu.memory_space<vmem>>, vector<1x128xf32>
    %cst_27 = arith.constant dense<0.000000e+00> : vector<8x128xf32>
    %44 = tpu.matmul %7, %42, %cst_27 {dimension_numbers = #tpu.dot_dimension_numbers<[1], [1], [0], [0], [0, 0, 1, 0], [], []>} : vector<8x128xbf16>, vector<128x128xbf16>, vector<8x128xf32> -> vector<8x128xf32>
    %45 = vector.broadcast %43 : vector<1x128xf32> to vector<8x128xf32>
    %46 = arith.addf %44, %45 : vector<8x128xf32>
    %cst_28 = arith.constant 5.000000e-01 : f32
    %47 = vector.broadcast %cst_28 : f32 to vector<8x128xf32>
    %48 = arith.mulf %47, %46 : vector<8x128xf32>
    %49 = math.tanh %48 : vector<8x128xf32>
    %cst_29 = arith.constant 1.000000e+00 : f32
    %50 = vector.broadcast %cst_29 : f32 to vector<8x128xf32>
    %51 = arith.addf %49, %50 : vector<8x128xf32>
    %cst_30 = arith.constant 5.000000e-01 : f32
    %52 = vector.broadcast %cst_30 : f32 to vector<8x128xf32>
    %53 = arith.mulf %52, %51 : vector<8x128xf32>
    %54 = arith.mulf %53, %41 : vector<8x128xf32>
    %55 = arith.truncf %54 : vector<8x128xf32> to vector<8x128xbf16>
    %c0_31 = arith.constant 0 : index
    %c0_32 = arith.constant 0 : index
    %c0_33 = arith.constant 0 : index
    %56 = vector.load %arg4[%c0_31, %c0_32, %c0_33] : memref<1x8x128xbf16, #tpu.memory_space<vmem>>, vector<1x8x128xbf16>
    %57 = vector.shape_cast %56 : vector<1x8x128xbf16> to vector<8x128xbf16>
    %c0_34 = arith.constant 0 : index
    %c0_35 = arith.constant 0 : index
    %58 = vector.load %arg12[%c0_34, %c0_35] : memref<512x128xbf16, #tpu.memory_space<vmem>>, vector<512x128xbf16>
    %cst_36 = arith.constant dense<0.000000e+00> : vector<8x512xf32>
    %59 = tpu.matmul %57, %58, %cst_36 {dimension_numbers = #tpu.dot_dimension_numbers<[1], [1], [0], [0], [0, 0, 1, 0], [], []>} : vector<8x128xbf16>, vector<512x128xbf16>, vector<8x512xf32> -> vector<8x512xf32>
    %c0_37 = arith.constant 0 : index
    %c0_38 = arith.constant 0 : index
    %60 = vector.load %arg13[%c0_37, %c0_38] : memref<512x128xbf16, #tpu.memory_space<vmem>>, vector<512x128xbf16>
    %cst_39 = arith.constant dense<0.000000e+00> : vector<8x512xf32>
    %61 = tpu.matmul %55, %60, %cst_39 {dimension_numbers = #tpu.dot_dimension_numbers<[1], [1], [0], [0], [0, 0, 1, 0], [], []>} : vector<8x128xbf16>, vector<512x128xbf16>, vector<8x512xf32> -> vector<8x512xf32>
    %62 = arith.addf %59, %61 : vector<8x512xf32>
    %c0_40 = arith.constant 0 : index
    %c0_41 = arith.constant 0 : index
    %63 = vector.load %arg14[%c0_40, %c0_41] : memref<512x128xbf16, #tpu.memory_space<vmem>>, vector<512x128xbf16>
    %cst_42 = arith.constant dense<0.000000e+00> : vector<8x512xf32>
    %64 = tpu.matmul %7, %63, %cst_42 {dimension_numbers = #tpu.dot_dimension_numbers<[1], [1], [0], [0], [0, 0, 1, 0], [], []>} : vector<8x128xbf16>, vector<512x128xbf16>, vector<8x512xf32> -> vector<8x512xf32>
    %65 = arith.addf %62, %64 : vector<8x512xf32>
    %c0_43 = arith.constant 0 : index
    %c0_44 = arith.constant 0 : index
    %66 = vector.load %arg15[%c0_43, %c0_44] : memref<1x512xf32, #tpu.memory_space<vmem>>, vector<1x512xf32>
    %67 = vector.broadcast %66 : vector<1x512xf32> to vector<8x512xf32>
    %68 = arith.addf %65, %67 : vector<8x512xf32>
    %69 = vector.extract_strided_slice %68 {offsets = [0, 0], sizes = [8, 128], strides = [1, 1]} : vector<8x512xf32> to vector<8x128xf32>
    %cst_45 = arith.constant 5.000000e-01 : f32
    %70 = vector.broadcast %cst_45 : f32 to vector<8x128xf32>
    %71 = arith.mulf %70, %69 : vector<8x128xf32>
    %72 = math.tanh %71 : vector<8x128xf32>
    %cst_46 = arith.constant 1.000000e+00 : f32
    %73 = vector.broadcast %cst_46 : f32 to vector<8x128xf32>
    %74 = arith.addf %72, %73 : vector<8x128xf32>
    %cst_47 = arith.constant 5.000000e-01 : f32
    %75 = vector.broadcast %cst_47 : f32 to vector<8x128xf32>
    %76 = arith.mulf %75, %74 : vector<8x128xf32>
    %77 = vector.extract_strided_slice %68 {offsets = [0, 128], sizes = [8, 128], strides = [1, 1]} : vector<8x512xf32> to vector<8x128xf32>
    %cst_48 = arith.constant 5.000000e-01 : f32
    %78 = vector.broadcast %cst_48 : f32 to vector<8x128xf32>
    %79 = arith.mulf %78, %77 : vector<8x128xf32>
    %80 = math.tanh %79 : vector<8x128xf32>
    %cst_49 = arith.constant 1.000000e+00 : f32
    %81 = vector.broadcast %cst_49 : f32 to vector<8x128xf32>
    %82 = arith.addf %80, %81 : vector<8x128xf32>
    %cst_50 = arith.constant 5.000000e-01 : f32
    %83 = vector.broadcast %cst_50 : f32 to vector<8x128xf32>
    %84 = arith.mulf %83, %82 : vector<8x128xf32>
    %85 = vector.extract_strided_slice %68 {offsets = [0, 256], sizes = [8, 128], strides = [1, 1]} : vector<8x512xf32> to vector<8x128xf32>
    %86 = math.tanh %85 : vector<8x128xf32>
    %87 = vector.extract_strided_slice %68 {offsets = [0, 384], sizes = [8, 128], strides = [1, 1]} : vector<8x512xf32> to vector<8x128xf32>
    %cst_51 = arith.constant 5.000000e-01 : f32
    %88 = vector.broadcast %cst_51 : f32 to vector<8x128xf32>
    %89 = arith.mulf %88, %87 : vector<8x128xf32>
    %90 = math.tanh %89 : vector<8x128xf32>
    %cst_52 = arith.constant 1.000000e+00 : f32
    %91 = vector.broadcast %cst_52 : f32 to vector<8x128xf32>
    %92 = arith.addf %90, %91 : vector<8x128xf32>
    %cst_53 = arith.constant 5.000000e-01 : f32
    %93 = vector.broadcast %cst_53 : f32 to vector<8x128xf32>
    %94 = arith.mulf %93, %92 : vector<8x128xf32>
    %95 = arith.mulf %84, %6 : vector<8x128xf32>
    %96 = arith.mulf %76, %86 : vector<8x128xf32>
    %97 = arith.addf %95, %96 : vector<8x128xf32>
    %98 = math.tanh %97 : vector<8x128xf32>
    %99 = arith.mulf %94, %98 : vector<8x128xf32>
    %100 = arith.truncf %99 : vector<8x128xf32> to vector<8x128xbf16>
    %c0_54 = arith.constant 0 : index
    %c0_55 = arith.constant 0 : index
    %101 = vector.load %arg16[%c0_54, %c0_55] : memref<128x128xbf16, #tpu.memory_space<vmem>>, vector<128x128xbf16>
    %c0_56 = arith.constant 0 : index
    %c0_57 = arith.constant 0 : index
    %102 = vector.load %arg17[%c0_56, %c0_57] : memref<1x128xf32, #tpu.memory_space<vmem>>, vector<1x128xf32>
    %cst_58 = arith.constant dense<0.000000e+00> : vector<8x128xf32>
    %103 = tpu.matmul %100, %101, %cst_58 {dimension_numbers = #tpu.dot_dimension_numbers<[1], [1], [0], [0], [0, 0, 1, 0], [], []>} : vector<8x128xbf16>, vector<128x128xbf16>, vector<8x128xf32> -> vector<8x128xf32>
    %104 = vector.broadcast %102 : vector<1x128xf32> to vector<8x128xf32>
    %105 = arith.addf %103, %104 : vector<8x128xf32>
    %106 = tpu.iota {dimensions = array<i32: 0>} : vector<8x1xi32>
    %107 = vector.broadcast %1 : i32 to vector<8x1xi32>
    %108 = arith.cmpi slt, %106, %107 : vector<8x1xi32>
    %109 = vector.shape_cast %108 : vector<8x1xi1> to vector<8x1xi1>
    %110 = vector.broadcast %109 : vector<8x1xi1> to vector<8x128xi1>
    %111 = arith.select %110, %99, %5 : vector<8x128xi1>, vector<8x128xf32>
    %c0_59 = arith.constant 0 : index
    %c0_60 = arith.constant 0 : index
    %112 = vector.load %arg20[%c0_59, %c0_60] : memref<8x128xf32, #tpu.memory_space<vmem>>, vector<8x128xf32>
    tpu.vector_store %arg20[%c0_59, %c0_60], %111 {strides = array<i32>} : memref<8x128xf32, #tpu.memory_space<vmem>>, vector<8x128xf32>,
    %113 = vector.shape_cast %108 : vector<8x1xi1> to vector<8x1xi1>
    %114 = vector.broadcast %113 : vector<8x1xi1> to vector<8x128xi1>
    %115 = arith.select %114, %97, %6 : vector<8x128xi1>, vector<8x128xf32>
    %c0_61 = arith.constant 0 : index
    %c0_62 = arith.constant 0 : index
    %116 = vector.load %arg21[%c0_61, %c0_62] : memref<8x128xf32, #tpu.memory_space<vmem>>, vector<8x128xf32>
    tpu.vector_store %arg21[%c0_61, %c0_62], %115 {strides = array<i32>} : memref<8x128xf32, #tpu.memory_space<vmem>>, vector<8x128xf32>,
    %cst_63 = arith.constant 0.000000e+00 : f32
    %117 = vector.shape_cast %108 : vector<8x1xi1> to vector<8x1xi1>
    %118 = vector.broadcast %117 : vector<8x1xi1> to vector<8x128xi1>
    %119 = vector.broadcast %cst_63 : f32 to vector<8x128xf32>
    %120 = arith.select %118, %105, %119 : vector<8x128xi1>, vector<8x128xf32>
    %c0_64 = arith.constant 0 : index
    %c0_65 = arith.constant 0 : index
    %c0_66 = arith.constant 0 : index
    %121 = vector.load %arg18[%c0_64, %c0_65, %c0_66] : memref<1x8x128xf32, #tpu.memory_space<vmem>>, vector<1x8x128xf32>
    %122 = vector.shape_cast %121 : vector<1x8x128xf32> to vector<8x128xf32>
    %123 = vector.shape_cast %120 : vector<8x128xf32> to vector<1x8x128xf32>
    tpu.vector_store %arg18[%c0_64, %c0_65, %c0_66], %123 {strides = array<i32>} : memref<1x8x128xf32, #tpu.memory_space<vmem>>, vector<1x8x128xf32>,
    %cst_67 = arith.constant 0.000000e+00 : f32
    %124 = vector.shape_cast %108 : vector<8x1xi1> to vector<8x1xi1>
    %125 = vector.broadcast %124 : vector<8x1xi1> to vector<8x128xi1>
    %126 = vector.broadcast %cst_67 : f32 to vector<8x128xf32>
    %127 = arith.select %125, %37, %126 : vector<8x128xi1>, vector<8x128xf32>
    %c0_68 = arith.constant 0 : index
    %c0_69 = arith.constant 0 : index
    %c0_70 = arith.constant 0 : index
    %128 = vector.load %arg19[%c0_68, %c0_69, %c0_70] : memref<1x8x128xf32, #tpu.memory_space<vmem>>, vector<1x8x128xf32>
    %129 = vector.shape_cast %128 : vector<1x8x128xf32> to vector<8x128xf32>
    %130 = vector.shape_cast %127 : vector<8x128xf32> to vector<1x8x128xf32>
    tpu.vector_store %arg19[%c0_68, %c0_69, %c0_70], %130 {strides = array<i32>} : memref<1x8x128xf32, #tpu.memory_space<vmem>>, vector<1x8x128xf32>,
    return
  }
  func.func @transform_0(%arg0: i32, %arg1: memref<7xi32, #tpu.memory_space<smem>>) -> (i32, i32, i32) {
    %c0_i32 = arith.constant 0 : i32
    %c0_i32_0 = arith.constant 0 : i32
    %c0_i32_1 = arith.constant 0 : i32
    %c0_i32_2 = arith.constant 0 : i32
    return %c0_i32, %c0_i32_0, %c0_i32_1 : i32, i32, i32
  }
  func.func @transform_1(%arg0: i32, %arg1: memref<7xi32, #tpu.memory_space<smem>>) -> (i32, i32, i32) {
    %c0_i32 = arith.constant 0 : i32
    %c0_i32_0 = arith.constant 0 : i32
    %c0_i32_1 = arith.constant 0 : i32
    %c0_i32_2 = arith.constant 0 : i32
    return %c0_i32, %c0_i32_0, %c0_i32_1 : i32, i32, i32
  }
  func.func @transform_2(%arg0: i32, %arg1: memref<7xi32, #tpu.memory_space<smem>>) -> (i32, i32, i32) {
    %c0_i32 = arith.constant 0 : i32
    %c0_i32_0 = arith.constant 0 : i32
    %c0_i32_1 = arith.constant 0 : i32
    return %arg0, %c0_i32, %c0_i32_0 : i32, i32, i32
  }
  func.func @transform_3(%arg0: i32, %arg1: memref<7xi32, #tpu.memory_space<smem>>) -> (i32, i32) {
    %c0_i32 = arith.constant 0 : i32
    %c0_i32_0 = arith.constant 0 : i32
    %c0_i32_1 = arith.constant 0 : i32
    return %c0_i32, %c0_i32_0 : i32, i32
  }
  func.func @transform_4(%arg0: i32, %arg1: memref<7xi32, #tpu.memory_space<smem>>) -> (i32, i32) {
    %c0_i32 = arith.constant 0 : i32
    %c0_i32_0 = arith.constant 0 : i32
    %c0_i32_1 = arith.constant 0 : i32
    return %c0_i32, %c0_i32_0 : i32, i32
  }
  func.func @transform_5(%arg0: i32, %arg1: memref<7xi32, #tpu.memory_space<smem>>) -> (i32, i32) {
    %c0_i32 = arith.constant 0 : i32
    %c0_i32_0 = arith.constant 0 : i32
    %c0_i32_1 = arith.constant 0 : i32
    return %c0_i32, %c0_i32_0 : i32, i32
  }
  func.func @transform_6(%arg0: i32, %arg1: memref<7xi32, #tpu.memory_space<smem>>) -> (i32, i32) {
    %c0_i32 = arith.constant 0 : i32
    %c0_i32_0 = arith.constant 0 : i32
    %c0_i32_1 = arith.constant 0 : i32
    return %c0_i32, %c0_i32_0 : i32, i32
  }
  func.func @transform_7(%arg0: i32, %arg1: memref<7xi32, #tpu.memory_space<smem>>) -> (i32, i32, i32) {
    %c0_i32 = arith.constant 0 : i32
    %c0_i32_0 = arith.constant 0 : i32
    %c0_i32_1 = arith.constant 0 : i32
    %c0_i32_2 = arith.constant 0 : i32
    return %c0_i32, %c0_i32_0, %c0_i32_1 : i32, i32, i32
  }
  func.func @transform_8(%arg0: i32, %arg1: memref<7xi32, #tpu.memory_space<smem>>) -> (i32, i32) {
    %c0_i32 = arith.constant 0 : i32
    %c0_i32_0 = arith.constant 0 : i32
    %c0_i32_1 = arith.constant 0 : i32
    return %c0_i32, %c0_i32_0 : i32, i32
  }
  func.func @transform_9(%arg0: i32, %arg1: memref<7xi32, #tpu.memory_space<smem>>) -> (i32, i32) {
    %c0_i32 = arith.constant 0 : i32
    %c0_i32_0 = arith.constant 0 : i32
    %c0_i32_1 = arith.constant 0 : i32
    return %c0_i32, %c0_i32_0 : i32, i32
  }
  func.func @transform_10(%arg0: i32, %arg1: memref<7xi32, #tpu.memory_space<smem>>) -> (i32, i32) {
    %c0_i32 = arith.constant 0 : i32
    %c0_i32_0 = arith.constant 0 : i32
    %c0_i32_1 = arith.constant 0 : i32
    return %c0_i32, %c0_i32_0 : i32, i32
  }
  func.func @transform_11(%arg0: i32, %arg1: memref<7xi32, #tpu.memory_space<smem>>) -> (i32, i32) {
    %c0_i32 = arith.constant 0 : i32
    %c0_i32_0 = arith.constant 0 : i32
    %c0_i32_1 = arith.constant 0 : i32
    return %c0_i32, %c0_i32_0 : i32, i32
  }
  func.func @transform_12(%arg0: i32, %arg1: memref<7xi32, #tpu.memory_space<smem>>) -> (i32, i32) {
    %c0_i32 = arith.constant 0 : i32
    %c0_i32_0 = arith.constant 0 : i32
    %c0_i32_1 = arith.constant 0 : i32
    return %c0_i32, %c0_i32_0 : i32, i32
  }
  func.func @transform_13(%arg0: i32, %arg1: memref<7xi32, #tpu.memory_space<smem>>) -> (i32, i32) {
    %c0_i32 = arith.constant 0 : i32
    %c0_i32_0 = arith.constant 0 : i32
    %c0_i32_1 = arith.constant 0 : i32
    return %c0_i32, %c0_i32_0 : i32, i32
  }
  func.func @transform_14(%arg0: i32, %arg1: memref<7xi32, #tpu.memory_space<smem>>) -> (i32, i32) {
    %c0_i32 = arith.constant 0 : i32
    %c0_i32_0 = arith.constant 0 : i32
    %c0_i32_1 = arith.constant 0 : i32
    return %c0_i32, %c0_i32_0 : i32, i32
  }
  func.func @transform_15(%arg0: i32, %arg1: memref<7xi32, #tpu.memory_space<smem>>) -> (i32, i32) {
    %c0_i32 = arith.constant 0 : i32
    %c0_i32_0 = arith.constant 0 : i32
    %c0_i32_1 = arith.constant 0 : i32
    return %c0_i32, %c0_i32_0 : i32, i32
  }
  func.func @transform_16(%arg0: i32, %arg1: memref<7xi32, #tpu.memory_space<smem>>) -> (i32, i32, i32) {
    %c0_i32 = arith.constant 0 : i32
    %c0_i32_0 = arith.constant 0 : i32
    %c0_i32_1 = arith.constant 0 : i32
    return %arg0, %c0_i32, %c0_i32_0 : i32, i32, i32
  }
  func.func @transform_17(%arg0: i32, %arg1: memref<7xi32, #tpu.memory_space<smem>>) -> (i32, i32, i32) {
    %c0_i32 = arith.constant 0 : i32
    %c0_i32_0 = arith.constant 0 : i32
    %c0_i32_1 = arith.constant 0 : i32
    return %arg0, %c0_i32, %c0_i32_0 : i32, i32, i32
  }
}

</mosaic_0001>

<bundles_post_ra>
// kernel: decoder_forward.2
= control target key start
LH: loop header
LB: loop body
LE: loop exit
PB: predicated region body
PF: predicated region fallthrough
CT: control target
= control target key end

     0   :  { %v3458_v0 = vmov 0.0   ;;  %vm1762_vm0 = vmmov 0   ;;  %vm381_vm1 = vcmask 1041409   ;;  %vm383_vm2 = vcmask 1042434   ;;  %s3448_s1 = inlined_call_operand.vmem [shape: bf16[128,128], index: 1, kind: input, shape index: {}]   ;;  %s3449_s3 = inlined_call_operand.vmem [shape: bf16[128,128], index: 3, kind: input, shape index: {}]   ;;  %s3450_s0 = inlined_call_operand.vmem [shape: f32[8,128,128], index: 0, kind: input, shape index: {}]   ;;  %s3451_s5 = inlined_call_operand.vmem [shape: bf16[128,128], index: 5, kind: input, shape index: {}]   ;;  %s3452_s2 = inlined_call_operand.vmem [shape: f32[1,128], index: 2, kind: input, shape index: {}]   ;;  %s3453_s4 = inlined_call_operand.vmem [shape: f32[1,128], index: 4, kind: input, shape index: {}]   ;;  %s3454_s7 = inlined_call_operand.vmem [shape: f32[8,128], index: 7, kind: output, shape index: {0}]   ;;  %s3455_s8 = inlined_call_operand.vmem [shape: f32[8,128], index: 8, kind: output, shape index: {1}]   ;;  %s3456_s6 = inlined_call_operand.vmem [shape: f32[1,128], index: 6, kind: input, shape index: {}]   ;;  %s3457_s9 = inlined_call_operand.vmem [shape: f32[8,128,128], index: 9, kind: output, shape index: {2}]  }
   0x1   :  { %1535 = vmatprep.subr.bf16.mxu0 %v3458_v0  ;;  %1555 = vmatprep.subr.bf16.mxu1 %v3458_v0  ;;  %v1737_v1 = vld [vmem:[%s3448_s1] sm:$0xff]   ;;  %v1739_v3 = vld [vmem:[%s3448_s1 + $0x8] sm:$0xff]   ;;  %v1741_v5 = vld [vmem:[%s3448_s1 + $0x10] sm:$0xff]   ;;  %vm385_vm3 = vcmask 1043459   ;;  %vm387_vm4 = vcmask 1044484   ;;  %vm389_vm5 = vcmask 1045509  }
   0x2   :  { %v1738_v2 = vld [vmem:[%s3449_s3] sm:$0xff]   ;;  %1551 = vmatprep.mubr.msk.bf16.mxu0 %vm1762_vm0, %v3458_v0  ;;  %1571 = vmatprep.mubr.msk.bf16.mxu1 %vm1762_vm0, %v3458_v0  ;;  %v1740_v4 = vld [vmem:[%s3449_s3 + $0x8] sm:$0xff]   ;;  %v1742_v6 = vld [vmem:[%s3449_s3 + $0x10] sm:$0xff]   ;;  %vm391_vm6 = vcmask 1046534   ;;  %vm393_vm7 = vcmask 1047559  }
   0x3   :  { %1536 = vmatpush3.bf16.xpose.msra.mxu0 %v1737_v1  ;;  %1556 = vmatpush3.bf16.xpose.msra.mxu1 %v1738_v2  ;;  %v1842_v7 = vld [vmem:[%s3450_s0] sm:$0xff]  ;;  %v1847_v8 = vld [vmem:[%s3450_s0 + $0x8] sm:$0xff]  ;;  %v1852_v9 = vld [vmem:[%s3450_s0 + $0x10] sm:$0xff] }
   0x4   :  { %1537 = vmatprep.subr.bf16.mxu0 %v3458_v0  ;;  %1557 = vmatprep.subr.bf16.mxu1 %v3458_v0  ;;  %3565 = vst [vmem:[#allocation2_spill] sm:$0xff] %v1842_v7  ;;  %3566 = vst [vmem:[#allocation3_spill] sm:$0xff] %v1847_v8  ;;  %v158_v10 = vadd.f32 %v1847_v8, %v1842_v7  ;;  %v1859_v11 = vld [vmem:[%s3450_s0 + $0x18] sm:$0xff]  ;;  %v1867_v13 = vld [vmem:[%s3450_s0 + $0x20] sm:$0xff] }
   0x5   :  { %3567 = vst [vmem:[#allocation4_spill] sm:$0xff] %v1852_v9  ;;  %3568 = vst [vmem:[#allocation5_spill] sm:$0xff] %v1859_v11  ;;  %v1872_v14 = vld [vmem:[%s3450_s0 + $0x80] sm:$0xff]  ;;  %v1877_v15 = vld [vmem:[%s3450_s0 + $0x88] sm:$0xff] }
   0x6   :  { %v159_v12 = vadd.f32 %v158_v10, %v1852_v9  ;;  %3569 = vst [vmem:[#allocation6_spill] sm:$0xff] %v1867_v13  ;;  %v1743_v17 = vld [vmem:[%s3448_s1 + $0x18] sm:$0xff]   ;;  %v1886_v18 = vld [vmem:[%s3450_s0 + $0x28] sm:$0xff]  ;;  %v1891_v19 = vld [vmem:[%s3450_s0 + $0x90] sm:$0xff]  ;;  %v179_v20 = vadd.f32 %v1877_v15, %v1872_v14 }
   0x7   :  { %3570 = vst [vmem:[#allocation7_spill] sm:$0xff] %v1886_v18  ;;  %v1744_v21 = vld [vmem:[%s3449_s3 + $0x18] sm:$0xff]   ;;  %v1907_v24 = vld [vmem:[%s3450_s0 + $0x30] sm:$0xff]  ;;  %v1913_v26 = vld [vmem:[%s3450_s0 + $0xa0] sm:$0xff] }
   0x8   :  { %v160_v16 = vadd.f32 %v159_v12, %v1859_v11  ;;  %v1901_v22 = vld [vmem:[%s3450_s0 + $0x98] sm:$0xff]  ;;  %3571 = vst [vmem:[#allocation8_spill] sm:$0xff] %v1907_v24  ;;  %v180_v25 = vadd.f32 %v179_v20, %v1891_v19  ;;  %v1924_v29 = vld [vmem:[%s3450_s0 + $0x100] sm:$0xff]  ;;  %v1931_v31 = vld [vmem:[%s3450_s0 + $0xa8] sm:$0xff] }
   0x9   :  { %v1919_v28 = vld [vmem:[%s3450_s0 + $0x38] sm:$0xff]  ;;  %3573 = vst [vmem:[#allocation10_spill] sm:$0xff] %v1924_v29  ;;  %v1936_v32 = vld [vmem:[%s3450_s0 + $0x108] sm:$0xff]  ;;  %v1941_v33 = vld [vmem:[%s3450_s0 + $0x110] sm:$0xff] }
   0xa   :  { %v161_v23 = vadd.f32 %v160_v16, %v1867_v13  ;;  %3572 = vst [vmem:[#allocation9_spill] sm:$0xff] %v1919_v28  ;;  %v181_v30 = vadd.f32 %v180_v25, %v1901_v22  ;;  %3574 = vst [vmem:[#allocation11_spill] sm:$0xff] %v1936_v32  ;;  %v1948_v35 = vld [vmem:[%s3450_s0 + $0x40] sm:$0xff]  ;;  %v200_v37 = vadd.f32 %v1936_v32, %v1924_v29  ;;  %v1956_v38 = vld [vmem:[%s3450_s0 + $0xb0] sm:$0xff] }
   0xb   :  { %1538 = vmatpush3.bf16.xpose.msra.mxu0 %v1739_v3  ;;  %1558 = vmatpush3.bf16.xpose.msra.mxu1 %v1740_v4  ;;  %3575 = vst [vmem:[#allocation12_spill] sm:$0xff] %v1941_v33  ;;  %3576 = vst [vmem:[#allocation13_spill] sm:$0xff] %v1948_v35  ;;  %v1961_v39 = vld [vmem:[%s3450_s0 + $0x118] sm:$0xff]  ;;  %v1745_v41 = vld [vmem:[%s3448_s1 + $0x20] sm:$0xff]  }
   0xc   :  { %1539 = vmatprep.subr.bf16.mxu0 %v3458_v0  ;;  %1559 = vmatprep.subr.bf16.mxu1 %v3458_v0  ;;  %v162_v27 = vadd.f32 %v161_v23, %v1886_v18  ;;  %v182_v36 = vadd.f32 %v181_v30, %v1913_v26  ;;  %3577 = vst [vmem:[#allocation14_spill] sm:$0xff] %v1956_v38  ;;  %3578 = vst [vmem:[#allocation15_spill] sm:$0xff] %v1961_v39  ;;  %v1746_v42 = vld [vmem:[%s3449_s3 + $0x20] sm:$0xff]   ;;  %v1973_v43 = vld [vmem:[%s3450_s0 + $0x48] sm:$0xff] }
   0xd   :  { %3579 = vst [vmem:[#allocation16_spill] sm:$0xff] %v1973_v43  ;;  %v201_v45 = vadd.f32 %v200_v37, %v1941_v33  ;;  %v1980_v46 = vld [vmem:[%s3450_s0 + $0x50] sm:$0xff]  ;;  %v1985_v47 = vld [vmem:[%s3450_s0 + $0xb8] sm:$0xff]  ;;  %v1990_v48 = vld [vmem:[%s3450_s0 + $0x120] sm:$0xff] }
   0xe   :  { %v163_v34 = vadd.f32 %v162_v27, %v1907_v24  ;;  %v183_v44 = vadd.f32 %v182_v36, %v1931_v31  ;;  %3580 = vst [vmem:[#allocation17_spill] sm:$0xff] %v1985_v47  ;;  %3581 = vst [vmem:[#allocation18_spill] sm:$0xff] %v1990_v48  ;;  %v1996_v50 = vld [vmem:[%s3450_s0 + $0x180] sm:$0xff]  ;;  %v2001_v51 = vld [vmem:[%s3450_s0 + $0x188] sm:$0xff] }
   0xf   :  { %3582 = vst [vmem:[#allocation19_spill] sm:$0xff] %v1996_v50  ;;  %3583 = vst [vmem:[#allocation20_spill] sm:$0xff] %v2001_v51  ;;  %v2006_v52 = vld [vmem:[%s3450_s0 + $0x190] sm:$0xff]  ;;  %v202_v54 = vadd.f32 %v201_v45, %v1961_v39  ;;  %v2013_v55 = vld [vmem:[%s3450_s0 + $0xc0] sm:$0xff]  ;;  %v221_v58 = vadd.f32 %v2001_v51, %v1996_v50 }
  0x10   :  { %v164_v40 = vadd.f32 %v163_v34, %v1919_v28  ;;  %3584 = vst [vmem:[#allocation21_spill] sm:$0xff] %v2006_v52  ;;  %v184_v53 = vadd.f32 %v183_v44, %v1956_v38  ;;  %v2018_v56 = vld [vmem:[%s3450_s0 + $0x128] sm:$0xff]  ;;  %v2026_v59 = vld [vmem:[%s3450_s0 + $0x58] sm:$0xff]  ;;  %v2039_v63 = vld [vmem:[%s3450_s0 + $0x60] sm:$0xff] }
  0x11   :  { %3585 = vst [vmem:[#allocation22_spill] sm:$0xff] %v2018_v56  ;;  %v2031_v60 = vld [vmem:[%s3450_s0 + $0x198] sm:$0xff]  ;;  %v203_v62 = vadd.f32 %v202_v54, %v1990_v48  ;;  %3587 = vst [vmem:[#allocation24_spill] sm:$0xff] %v2039_v63  ;;  %v2044_v1 = vld [vmem:[%s3450_s0 + $0xc8] sm:$0xff]  ;;  %v222_v4 = vadd.f32 %v221_v58, %v2006_v52 }
  0x12   :  { %v165_v49 = vadd.f32 %v164_v40, %v1948_v35  ;;  %3586 = vst [vmem:[#allocation23_spill] sm:$0xff] %v2031_v60  ;;  %v185_v61 = vadd.f32 %v184_v53, %v1985_v47  ;;  %v2049_v2 = vld [vmem:[%s3450_s0 + $0x130] sm:$0xff]  ;;  %v2070_v12 = vld [vmem:[%s3450_s0 + $0x1a0] sm:$0xff]  ;;  %v2082_v23 = vld [vmem:[%s3450_s0 + $0x138] sm:$0xff] }
  0x13   :  { %1540 = vmatpush3.bf16.xpose.msra.mxu0 %v1741_v5  ;;  %1560 = vmatpush3.bf16.xpose.msra.mxu1 %v1742_v6  ;;  %3588 = vst [vmem:[#allocation25_spill] sm:$0xff] %v2049_v2  ;;  %v1747_v5 = vld [vmem:[%s3448_s1 + $0x28] sm:$0xff]   ;;  %v2065_v10 = vld [vmem:[%s3450_s0 + $0xd0] sm:$0xff]  ;;  %3589 = vst [vmem:[#allocation26_spill] sm:$0xff] %v2070_v12  ;;  %v223_v34 = vadd.f32 %v222_v4, %v2031_v60 }
  0x14   :  { %1541 = vmatprep.subr.bf16.mxu0 %v3458_v0  ;;  %1561 = vmatprep.subr.bf16.mxu1 %v3458_v0  ;;  %v166_v57 = vadd.f32 %v165_v49, %v1973_v43  ;;  %v2060_v6 = vld [vmem:[%s3450_s0 + $0x68] sm:$0xff]  ;;  %v186_v16 = vadd.f32 %v185_v61, %v2013_v55  ;;  %3590 = vst [vmem:[#allocation27_spill] sm:$0xff] %v2082_v23  ;;  %v2087_v25 = vld [vmem:[%s3450_s0 + $0x200] sm:$0xff]  ;;  %v2099_v36 = vld [vmem:[%s3450_s0 + $0x70] sm:$0xff] }
  0x15   :  { %3591 = vst [vmem:[#allocation28_spill] sm:$0xff] %v2087_v25  ;;  %v2092_v27 = vld [vmem:[%s3450_s0 + $0x208] sm:$0xff]  ;;  %v2109_v40 = vld [vmem:[%s3450_s0 + $0x210] sm:$0xff]  ;;  %v2118_v45 = vld [vmem:[%s3450_s0 + $0xd8] sm:$0xff] }
  0x16   :  { %v167_v3 = vadd.f32 %v166_v57, %v1980_v46  ;;  %3592 = vst [vmem:[#allocation29_spill] sm:$0xff] %v2092_v27  ;;  %v2104_v37 = vld [vmem:[%s3450_s0 + $0x1a8] sm:$0xff]  ;;  %3594 = vst [vmem:[#allocation31_spill] sm:$0xff] %v2109_v40  ;;  %v242_v44 = vadd.f32 %v2092_v27, %v2087_v25  ;;  %v2123_v49 = vld [vmem:[%s3450_s0 + $0x140] sm:$0xff]  ;;  %v224_v57 = vadd.f32 %v223_v34, %v2070_v12  ;;  %v3604_v12 = vmov 0.0  }
  0x17   :  { %3593 = vst [vmem:[#allocation30_spill] sm:$0xff] %v2104_v37  ;;  %3595 = vst [vmem:[#allocation32_spill] sm:$0xff] %v2123_v49  ;;  %v2128_v53 = vld [vmem:[%s3450_s0 + $0x218] sm:$0xff]  ;;  %v2140_v61 = vld [vmem:[%s3450_s0 + $0xe0] sm:$0xff] }
  0x18   :  { %v168_v30 = vadd.f32 %v167_v3, %v2026_v59  ;;  %3596 = vst [vmem:[#allocation33_spill] sm:$0xff] %v2128_v53  ;;  %v2135_v58 = vld [vmem:[%s3450_s0 + $0x78] sm:$0xff]  ;;  %v2160_v34 = vld [vmem:[%s3450_s0 + $0x148] sm:$0xff]  ;;  %v2193_v60 = vld [vmem:[%s3450_s0 + $0x150] sm:$0xff] }
  0x19   :  { %3599 = vst [vmem:[#allocation36_spill] sm:$0xff] %v2160_v34  ;;  %v2177_v20 = vld [vmem:[%s3450_s0 + $0x228] sm:$0xff]  ;;  %3605 = vst [vmem:[#allocation41_spill] sm:$0xff] %v2193_v60  ;;  %v2216_v51 = vld [vmem:[%s3450_s0 + $0xf0] sm:$0xff] }
  0x1a   :  { %v169_v54 = vadd.f32 %v168_v30, %v2039_v63  ;;  %v2155_v30 = vld [vmem:[%s3450_s0 + $0xe8] sm:$0xff]  ;;  %3602 = vst [vmem:[#allocation39_spill] sm:$0xff] %v2177_v20  ;;  %3606 = vst [vmem:[#allocation42_spill] sm:$0xff] %v2216_v51  ;;  %v2258_v48 = vld [vmem:[%s3450_s0 + $0x160] sm:$0xff] }
  0x1b   :  { %1542 = vmatpush3.bf16.xpose.msra.mxu0 %v1743_v17  ;;  %1562 = vmatpush3.bf16.xpose.msra.mxu1 %v1744_v21  ;;  %v204_v17 = vadd.f32 %v203_v62, %v2018_v56  ;;  %v1748_v21 = vld [vmem:[%s3449_s3 + $0x28] sm:$0xff]   ;;  %v2145_v62 = vld [vmem:[%s3450_s0 + $0x1b0] sm:$0xff]  ;;  %3598 = vst [vmem:[#allocation35_spill] sm:$0xff] %v2155_v30  ;;  %v2253_v56 = vld [vmem:[%s3450_s0 + $0xf8] sm:$0xff] }
  0x1c   :  { %1543 = vmatprep.subr.bf16.mxu0 %v3458_v0  ;;  %1563 = vmatprep.subr.bf16.mxu1 %v3458_v0  ;;  %3597 = vst [vmem:[#allocation34_spill] sm:$0xff] %v2145_v62  ;;  %v2198_v52 = vld [vmem:[%s3450_s0 + $0x288] sm:$0xff]  ;;  %3610 = vst [vmem:[#allocation46_spill] sm:$0xff] %v2253_v56  ;;  %v2272_v33 = vld [vmem:[%s3450_s0 + $0x1d0] sm:$0xff] }
  0x1d   :  { %3611 = vst [vmem:[#allocation47_spill] sm:$0xff] %v2258_v48  ;;  %v2263_v39 = vld [vmem:[%s3450_s0 + $0x1c8] sm:$0xff]  ;;  %3613 = vst [vmem:[#allocation49_spill] sm:$0xff] %v2272_v33  ;;  %v2277_v32 = vld [vmem:[%s3450_s0 + $0x238] sm:$0xff] }
  0x1e   :  { %3612 = vst [vmem:[#allocation48_spill] sm:$0xff] %v2263_v39  ;;  %3614 = vst [vmem:[#allocation50_spill] sm:$0xff] %v2277_v32  ;;  %v2298_v29 = vld [vmem:[%s3450_s0 + $0x310] sm:$0xff]  ;;  %v2332_v18 = vld [vmem:[%s3450_s0 + $0x1d8] sm:$0xff] }
  0x1f   :  { %3618 = vst [vmem:[#allocation54_spill] sm:$0xff] %v2298_v29  ;;  %v2327_v13 = vld [vmem:[%s3450_s0 + $0x170] sm:$0xff]  ;;  %3622 = vst [vmem:[#allocation58_spill] sm:$0xff] %v2332_v18  ;;  %v1752_v43 = vld [vmem:[%s3449_s3 + $0x38] sm:$0xff]  }
  0x20   :  { %3621 = vst [vmem:[#allocation57_spill] sm:$0xff] %v2327_v13  ;;  %v2410_v9 = vld [vmem:[%s3450_s0 + $0x1e8] sm:$0xff]  ;;  %v2420_v27 = vld [vmem:[%s3450_s0 + $0x390] sm:$0xff]  ;;  %v2433_v25 = vld [vmem:[%s3450_s0 + $0x258] sm:$0xff] }
  0x21   :  { %3631 = vst [vmem:[#allocation67_spill] sm:$0xff] %v2410_v9  ;;  %v2415_v11 = vld [vmem:[%s3450_s0 + $0x328] sm:$0xff]  ;;  %3633 = vst [vmem:[#allocation69_spill] sm:$0xff] %v2420_v27  ;;  %v2480_v8 = vld [vmem:[%s3450_s0 + $0x2d0] sm:$0xff] }
  0x22   :  { %3632 = vst [vmem:[#allocation68_spill] sm:$0xff] %v2415_v11  ;;  %3635 = vst [vmem:[#allocation71_spill] sm:$0xff] %v2433_v25  ;;  %v2493_v7 = vld [vmem:[%s3450_s0 + $0x340] sm:$0xff]  ;;  %v2636_v63 = vld [vmem:[%s3450_s0 + $0x370] sm:$0xff] }
  0x23   :  { %1544 = vmatpush3.bf16.xpose.msra.mxu0 %v1745_v41  ;;  %1564 = vmatpush3.bf16.xpose.msra.mxu1 %v1746_v42  ;;  %v187_v41 = vadd.f32 %v186_v16, %v2044_v1  ;;  %v205_v42 = vadd.f32 %v204_v17, %v2049_v2  ;;  %v243_v16 = vadd.f32 %v242_v44, %v2109_v40  ;;  %v2172_v17 = vld [vmem:[%s3450_s0 + $0x1b8] sm:$0xff] }
  0x24   :  { %1545 = vmatprep.subr.bf16.mxu0 %v3458_v0  ;;  %1565 = vmatprep.subr.bf16.mxu1 %v3458_v0  ;;  %v225_v44 = vadd.f32 %v224_v57, %v2104_v37  ;;  %3601 = vst [vmem:[#allocation38_spill] sm:$0xff] %v2172_v17  ;;  %v2182_v0 = vld [vmem:[%s3450_s0 + $0x280] sm:$0xff]  ;;  %v1749_v37 = vld [vmem:[%s3448_s1 + $0x30] sm:$0xff]   ;;  %v2391_v40 = vld [vmem:[%s3450_s0 + $0x2b8] sm:$0xff] }
  0x25   :  { %v188_v3 = vadd.f32 %v187_v41, %v2065_v10  ;;  %v206_v4 = vadd.f32 %v205_v42, %v2082_v23  ;;  %v2165_v41 = vld [vmem:[%s3450_s0 + $0x220] sm:$0xff]  ;;  %v170_v42 = vadd.f32 %v169_v54, %v2060_v6  ;;  %3603 = vst [vmem:[#allocation40_spill] sm:$0xff] %v2182_v0  ;;  %v263_v50 = vadd.f32 %v2198_v52, %v2182_v0  ;;  %v2234_v23 = vld [vmem:[%s3450_s0 + $0x158] sm:$0xff] }
  0x26   :  { %3600 = vst [vmem:[#allocation37_spill] sm:$0xff] %v2165_v41  ;;  %3608 = vst [vmem:[#allocation44_spill] sm:$0xff] %v2234_v23 }
  0x27   :  { %v189_v54 = vadd.f32 %v188_v3, %v2118_v45  ;;  %v207_v57 = vadd.f32 %v206_v4, %v2123_v49  ;;  %v2203_v3 = vld [vmem:[%s3450_s0 + $0x290] sm:$0xff]  ;;  %v171_v4 = vadd.f32 %v170_v42, %v2099_v36  ;;  %v2221_v42 = vld [vmem:[%s3450_s0 + $0x1c0] sm:$0xff]  ;;  %3652 = vst [vmem:[#allocation88_spill] sm:$0xff] %v2636_v63 }
  0x28   :  { %3607 = vst [vmem:[#allocation43_spill] sm:$0xff] %v2221_v42  ;;  %v1750_v49 = vld [vmem:[%s3449_s3 + $0x30] sm:$0xff]  }
  0x2b   :  { %1546 = vmatpush3.bf16.xpose.msra.mxu0 %v1747_v5  ;;  %v244_v5 = vadd.f32 %v243_v16, %v2128_v53  ;;  %1566 = vmatpush3.bf16.xpose.msra.mxu1 %v1748_v21  ;;  %v226_v21 = vadd.f32 %v225_v44, %v2145_v62  ;;  %v190_v44 = vadd.f32 %v189_v54, %v2140_v61  ;;  %v2239_v54 = vld [vmem:[%s3450_s0 + $0x230] sm:$0xff]  ;;  %v2396_v53 = vld [vmem:[%s3450_s0 + $0x380] sm:$0xff] }
  0x2c   :  { %1547 = vmatprep.subr.bf16.mxu0 %v3604_v12  ;;  %1567 = vmatprep.subr.bf16.mxu1 %v3604_v12  ;;  %v208_v16 = vadd.f32 %v207_v57, %v2160_v34  ;;  %3609 = vst [vmem:[#allocation45_spill] sm:$0xff] %v2239_v54  ;;  %v2244_v57 = vld [vmem:[%s3450_s0 + $0x298] sm:$0xff]  ;;  %3629 = vst [vmem:[#allocation65_spill] sm:$0xff] %v2396_v53 }
  0x2d   :  { %v245_v62 = vadd.f32 %v244_v5, %v2165_v41  ;;  %v172_v5 = vadd.f32 %v171_v4, %v2135_v58  ;;  %v227_v34 = vadd.f32 %v226_v21, %v2172_v17  ;;  %v191_v4 = vadd.f32 %v190_v44, %v2155_v30  ;;  %v2282_v44 = vld [vmem:[%s3450_s0 + $0x2a0] sm:$0xff]  ;;  %v2307_v41 = vld [vmem:[%s3450_s0 + $0x168] sm:$0xff] }
  0x2e   :  { %v209_v21 = vadd.f32 %v208_v16, %v2193_v60  ;;  %v264_v17 = vadd.f32 %v263_v50, %v2203_v3  ;;  %3615 = vst [vmem:[#allocation51_spill] sm:$0xff] %v2282_v44  ;;  %v2288_v50 = vld [vmem:[%s3450_s0 + $0x300] sm:$0xff]  ;;  %v2293_v60 = vld [vmem:[%s3450_s0 + $0x308] sm:$0xff]  ;;  %3619 = vst [vmem:[#allocation55_spill] sm:$0xff] %v2307_v41 }
  0x2f   :  { %v246_v2 = vadd.f32 %v245_v62, %v2177_v20  ;;  %v173_v16 = vrot.slane %v172_v5, 4  ;;  %v228_v62 = vadd.f32 %v227_v34, %v2221_v42  ;;  %3616 = vst [vmem:[#allocation52_spill] sm:$0xff] %v2288_v50  ;;  %3617 = vst [vmem:[#allocation53_spill] sm:$0xff] %v2293_v60  ;;  %v192_v24 = vadd.f32 %v191_v4, %v2216_v51  ;;  %v2312_v20 = vld [vmem:[%s3450_s0 + $0x240] sm:$0xff]  ;;  %v2317_v4 = vld [vmem:[%s3450_s0 + $0x2a8] sm:$0xff] }
  0x30   :  { %v210_v28 = vadd.f32 %v209_v21, %v2234_v23  ;;  %v265_v42 = vadd.f32 %v264_v17, %v2244_v57  ;;  %3620 = vst [vmem:[#allocation56_spill] sm:$0xff] %v2312_v20  ;;  %v284_v17 = vadd.f32 %v2293_v60, %v2288_v50  ;;  %v2557_v51 = vld [vmem:[%s3450_s0 + $0x350] sm:$0xff] }
  0x31   :  { %v247_v34 = vadd.f32 %v246_v2, %v2239_v54  ;;  %v174_v21 = vadd.f32 %v173_v16, %v172_v5  ;;  %v229_v2 = vadd.f32 %v228_v62, %v2263_v39  ;;  %v2337_v5 = vld [vmem:[%s3450_s0 + $0x318] sm:$0xff]  ;;  %v193_v16 = vadd.f32 %v192_v24, %v2253_v56  ;;  %v2352_v54 = vld [vmem:[%s3450_s0 + $0x248] sm:$0xff]  ;;  %v2357_v24 = vld [vmem:[%s3450_s0 + $0x2b0] sm:$0xff] }
  0x32   :  { %3623 = vst [vmem:[#allocation59_spill] sm:$0xff] %v2337_v5  ;;  %v211_v62 = vadd.f32 %v210_v28, %v2258_v48  ;;  %v266_v23 = vadd.f32 %v265_v42, %v2282_v44  ;;  %v2347_v39 = vld [vmem:[%s3450_s0 + $0x178] sm:$0xff]  ;;  %3625 = vst [vmem:[#allocation61_spill] sm:$0xff] %v2352_v54  ;;  %v285_v42 = vadd.f32 %v284_v17, %v2298_v29  ;;  %v2380_v17 = vld [vmem:[%s3450_s0 + $0x320] sm:$0xff] }
  0x33   :  { %1548 = vmatpush3.bf16.xpose.msra.mxu0 %v1749_v37  ;;  %v248_v37 = vadd.f32 %v247_v34, %v2277_v32  ;;  %1568 = vmatpush3.bf16.xpose.msra.mxu1 %v1750_v49  ;;  %3624 = vst [vmem:[#allocation60_spill] sm:$0xff] %v2347_v39  ;;  %v175_v28 = vrot.slane %v174_v21, 2  ;;  %v230_v49 = vadd.f32 %v229_v2, %v2272_v33  ;;  %v1751_v48 = vld [vmem:[%s3448_s1 + $0x38] sm:$0xff]   ;;  %v2370_v32 = vld [vmem:[%s3450_s0 + $0x1e0] sm:$0xff]  ;;  %v2375_v2 = vld [vmem:[%s3450_s0 + $0x250] sm:$0xff] }
  0x34   :  { %1549 = vmatprep.subr.bf16.mxu0 %v3604_v12  ;;  %1569 = vmatprep.subr.bf16.mxu1 %v3604_v12  ;;  %3626 = vst [vmem:[#allocation62_spill] sm:$0xff] %v2370_v32  ;;  %3627 = vst [vmem:[#allocation63_spill] sm:$0xff] %v2375_v2  ;;  %v194_v12 = vrot.slane %v193_v16, 4  ;;  %v212_v34 = vadd.f32 %v211_v62, %v2307_v41  ;;  %v267_v35 = vadd.f32 %v266_v23, %v2317_v4  ;;  %v2401_v62 = vld [vmem:[%s3450_s0 + $0x388] sm:$0xff] }
  0x35   :  { %3628 = vst [vmem:[#allocation64_spill] sm:$0xff] %v2380_v17  ;;  %v249_v33 = vadd.f32 %v248_v37, %v2312_v20  ;;  %3630 = vst [vmem:[#allocation66_spill] sm:$0xff] %v2401_v62  ;;  %v231_v23 = vadd.f32 %v230_v49, %v2332_v18  ;;  %v286_v37 = vadd.f32 %v285_v42, %v2337_v5  ;;  %v2428_v20 = vld [vmem:[%s3450_s0 + $0x1f0] sm:$0xff]  ;;  %v2498_v5 = vld [vmem:[%s3450_s0 + $0x3a0] sm:$0xff] }
  0x36   :  { %v195_v49 = vadd.f32 %v194_v12, %v193_v16  ;;  %v213_v42 = vadd.f32 %v212_v34, %v2327_v13  ;;  %v268_v18 = vadd.f32 %v267_v35, %v2357_v24  ;;  %3634 = vst [vmem:[#allocation70_spill] sm:$0xff] %v2428_v20  ;;  %v2438_v16 = vld [vmem:[%s3450_s0 + $0x2c0] sm:$0xff]  ;;  %v176_v34 = vadd.f32 %v175_v28, %v174_v21  ;;  %v2447_v13 = vld [vmem:[%s3450_s0 + $0x1f8] sm:$0xff]  ;;  %v2457_v21 = vld [vmem:[%s3450_s0 + $0x330] sm:$0xff] }
  0x37   :  { %v250_v41 = vadd.f32 %v249_v33, %v2352_v54  ;;  %3636 = vst [vmem:[#allocation72_spill] sm:$0xff] %v2438_v16  ;;  %v232_v33 = vadd.f32 %v231_v23, %v2370_v32  ;;  %v287_v35 = vadd.f32 %v286_v37, %v2380_v17  ;;  %v305_v12 = vadd.f32 %v2401_v62, %v2396_v53  ;;  %v2452_v54 = vld [vmem:[%s3450_s0 + $0x260] sm:$0xff]  ;;  %v2462_v28 = vld [vmem:[%s3450_s0 + $0x398] sm:$0xff]  ;;  %v2470_v53 = vld [vmem:[%s3450_s0 + $0x268] sm:$0xff] }
  0x38   :  { %3637 = vst [vmem:[#allocation73_spill] sm:$0xff] %v2447_v13  ;;  %3638 = vst [vmem:[#allocation74_spill] sm:$0xff] %v2452_v54  ;;  %v196_v23 = vrot.slane %v195_v49, 2  ;;  %v214_v37 = vadd.f32 %v213_v42, %v2347_v39  ;;  %v269_v62 = vadd.f32 %v268_v18, %v2391_v40  ;;  %v2475_v17 = vld [vmem:[%s3450_s0 + $0x2c8] sm:$0xff] }
  0x39   :  { %3639 = vst [vmem:[#allocation75_spill] sm:$0xff] %v2457_v21  ;;  %3640 = vst [vmem:[#allocation76_spill] sm:$0xff] %v2462_v28  ;;  %v251_v32 = vadd.f32 %v250_v41, %v2375_v2  ;;  %v2485_v41 = vld [vmem:[%s3450_s0 + $0x338] sm:$0xff]  ;;  %v233_v18 = vadd.f32 %v232_v33, %v2410_v9  ;;  %v288_v42 = vadd.f32 %v287_v35, %v2415_v11 }
  0x3a   :  { %3641 = vst [vmem:[#allocation77_spill] sm:$0xff] %v2485_v41  ;;  %v306_v39 = vadd.f32 %v305_v12, %v2420_v27  ;;  %3642 = vst [vmem:[#allocation78_spill] sm:$0xff] %v2498_v5  ;;  %v197_v29 = vadd.f32 %v196_v23, %v195_v49  ;;  %v215_v60 = vrot.slane %v214_v37, 4  ;;  %v270_v33 = vadd.f32 %v269_v62, %v2438_v16  ;;  %v2510_v35 = vld [vmem:[%s3450_s0 + $0x2d8] sm:$0xff]  ;;  %v2528_v62 = vld [vmem:[%s3450_s0 + $0x3a8] sm:$0xff] }
  0x3b   :  { %1550 = vmatpush3.bf16.xpose.msra.mxu0 %v1751_v48  ;;  %v252_v50 = vadd.f32 %v251_v32, %v2433_v25  ;;  %1570 = vmatpush3.bf16.xpose.msra.mxu1 %v1752_v43  ;;  %v2505_v48 = vld [vmem:[%s3450_s0 + $0x270] sm:$0xff]  ;;  %v234_v12 = vadd.f32 %v233_v18, %v2428_v20  ;;  %v289_v49 = vadd.f32 %v288_v42, %v2457_v21  ;;  %v2518_v32 = vld [vmem:[%s3451_s5] sm:$0xff]   ;;  %v2523_v43 = vld [vmem:[%s3450_s0 + $0x348] sm:$0xff]  ;;  %v177_v18 = vrot.slane %v176_v34, 1 }
  0x3c   :  { %3643 = vst [vmem:[#allocation79_spill] sm:$0xff] %v2505_v48  ;;  %v307_v23 = vadd.f32 %v306_v39, %v2462_v28  ;;  %3644 = vst [vmem:[#allocation80_spill] sm:$0xff] %v2518_v32  ;;  %v216_v20 = vadd.f32 %v215_v60, %v214_v37  ;;  %v271_v39 = vadd.f32 %v270_v33, %v2475_v17  ;;  %v2535_v9 = vld [vmem:[%s3450_s0 + $0x278] sm:$0xff]  ;;  %v2540_v28 = vld [vmem:[%s3450_s0 + $0x2e0] sm:$0xff]  ;;  %1575 = vmatprep.subr.bf16.mxu0 %v2518_v32 }
  0x3d   :  { %3645 = vst [vmem:[#allocation81_spill] sm:$0xff] %v2528_v62  ;;  %v253_v42 = vadd.f32 %v252_v50, %v2452_v54  ;;  %3646 = vst [vmem:[#allocation82_spill] sm:$0xff] %v2535_v9  ;;  %v2545_v27 = vld [vmem:[%s3450_s0 + $0x3b0] sm:$0xff]  ;;  %v235_v60 = vadd.f32 %v234_v12, %v2447_v13  ;;  %v290_v50 = vadd.f32 %v289_v49, %v2485_v41  ;;  %v198_v33 = vrot.slane %v197_v29, 1  ;;  %v2564_v13 = vld [vmem:[%s3450_s0 + $0x3b8] sm:$0xff] }
  0x3e   :  { %3647 = vst [vmem:[#allocation83_spill] sm:$0xff] %v2545_v27  ;;  %v308_v37 = vadd.f32 %v307_v23, %v2498_v5  ;;  %v217_v21 = vrot.slane %v216_v20, 2  ;;  %v272_v56 = vadd.f32 %v271_v39, %v2480_v8  ;;  %1719 = vmatprep.subr.bf16.mxu1 %v2518_v32  ;;  %3648 = vst [vmem:[#allocation84_spill] sm:$0xff] %v2564_v13  ;;  %v2571_v32 = vld [vmem:[%s3450_s0 + $0x2e8] sm:$0xff]  ;;  %v2653_v54 = vld [vmem:[%s3450_s0 + $0x378] sm:$0xff] }
  0x3f   :  { %v254_v11 = vadd.f32 %v253_v42, %v2470_v53  ;;  %v236_v12 = vrot.slane %v235_v60, 4  ;;  %v291_v49 = vadd.f32 %v290_v50, %v2493_v7  ;;  %v178_v42 = vadd.f32 %v177_v18, %v176_v34  ;;  %3654 = vst [vmem:[#allocation90_spill] sm:$0xff] %v2653_v54 }
  0x40   :  { %v309_v23 = vadd.f32 %v308_v37, %v2528_v62  ;;  %v218_v5 = vadd.f32 %v217_v21, %v216_v20  ;;  %v273_v41 = vadd.f32 %v272_v56, %v2510_v35  ;;  %v2580_v20 = vld [vmem:[%s3450_s0 + $0x358] sm:$0xff]  ;;  %v199_v56 = vadd.f32 %v198_v33, %v197_v29  ;;  %v2601_v29 = vld [vmem:[%s3450_s0 + $0x360] sm:$0xff] }
  0x41   :  { %v255_v39 = vadd.f32 %v254_v11, %v2505_v48  ;;  %v237_v30 = vadd.f32 %v236_v12, %v235_v60  ;;  %v292_v50 = vadd.f32 %v291_v49, %v2523_v43  ;;  %v2585_v11 = vld [vmem:[%s3450_s0 + $0x3c0] sm:$0xff]  ;;  %v2592_v60 = vld [vmem:[%s3450_s0 + $0x2f0] sm:$0xff]  ;;  %v2669_v48 = vld [vmem:[%s3450_s0 + $0x3e8] sm:$0xff] }
  0x42   :  { %v310_v37 = vadd.f32 %v309_v23, %v2545_v27  ;;  %3649 = vst [vmem:[#allocation85_spill] sm:$0xff] %v2585_v11  ;;  %v219_v34 = vrot.slane %v218_v5, 1  ;;  %v274_v18 = vadd.f32 %v273_v41, %v2540_v28  ;;  %v2606_v41 = vld [vmem:[%s3450_s0 + $0x3c8] sm:$0xff]  ;;  %3656 = vst [vmem:[#allocation92_spill] sm:$0xff] %v2669_v48 }
  0x43   :  { %v256_v21 = vadd.f32 %v255_v39, %v2535_v9  ;;  %v238_v12 = vrot.slane %v237_v30, 2  ;;  %v293_v49 = vadd.f32 %v292_v50, %v2557_v51  ;;  %3650 = vst [vmem:[#allocation86_spill] sm:$0xff] %v2606_v41  ;;  %v2612_v50 = vld [vmem:[%s3450_s0 + $0x2f8] sm:$0xff] }
  0x44   :  { %v311_v23 = vadd.f32 %v310_v37, %v2564_v13  ;;  %v220_v33 = vadd.f32 %v219_v34, %v218_v5  ;;  %v275_v27 = vadd.f32 %v274_v18, %v2571_v32  ;;  %v2621_v5 = vld [vmem:[%s3450_s0 + $0x368] sm:$0xff]  ;;  %v2626_v34 = vld [vmem:[%s3450_s0 + $0x3d0] sm:$0xff] }
  0x45   :  { %v257_v39 = vrot.slane %v256_v21, 4  ;;  %v239_v37 = vadd.f32 %v238_v12, %v237_v30  ;;  %v294_v62 = vadd.f32 %v293_v49, %v2580_v20  ;;  %3651 = vst [vmem:[#allocation87_spill] sm:$0xff] %v2626_v34  ;;  %v326_v12 = vmul.f32 0.0625, %v178_v42 }
  0x46   :  { %v312_v13 = vadd.f32 %v311_v23, %v2585_v11  ;;  %v276_v30 = vadd.f32 %v275_v27, %v2592_v60  ;;  %v327_v49 = vmul.f32 0.0625, %v199_v56  ;;  %v328_v56 = vmul.f32 0.0625, %v220_v33  ;;  %v2658_v33 = vld [vmem:[%s3450_s0 + $0x3e0] sm:$0xff] }
  0x47   :  { %v258_v18 = vadd.f32 %v257_v39, %v256_v21  ;;  %v240_v25 = vrot.slane %v239_v37, 1  ;;  %v295_v23 = vadd.f32 %v294_v62, %v2601_v29  ;;  %v2641_v21 = vld [vmem:[%s3450_s0 + $0x3d8] sm:$0xff]  ;;  %3655 = vst [vmem:[#allocation91_spill] sm:$0xff] %v2658_v33 }
  0x48   :  { %v313_v2 = vadd.f32 %v312_v13, %v2606_v41  ;;  %3653 = vst [vmem:[#allocation89_spill] sm:$0xff] %v2641_v21  ;;  %v277_v42 = vadd.f32 %v276_v30, %v2612_v50  ;;  %v335_v41 = vpack.c.bf16 %v327_v49, %v327_v49 }
  0x49   :  { %v259_v27 = vrot.slane %v258_v18, 2  ;;  %v241_v62 = vadd.f32 %v240_v25, %v239_v37  ;;  %v296_v39 = vadd.f32 %v295_v23, %v2621_v5  ;;  %v334_v25 = vpack.c.bf16 %v326_v12, %v326_v12 }
  0x4a   :  { %v314_v11 = vadd.f32 %v313_v2, %v2626_v34  ;;  %v278_v13 = vrot.slane %v277_v42, 4  ;;  %v2680_v34 = vld [vmem:[%s3450_s0 + $0x3f0] sm:$0xff] }
  0x4b   :  { %v260_v30 = vadd.f32 %v259_v27, %v258_v18  ;;  %v297_v2 = vadd.f32 %v296_v39, %v2636_v63  ;;  %v336_v27 = vpack.c.bf16 %v328_v56, %v328_v56  ;;  %3657 = vst [vmem:[#allocation93_spill] sm:$0xff] %v2680_v34 }
  0x4c   :  { %v315_v23 = vadd.f32 %v314_v11, %v2641_v21  ;;  %v279_v18 = vadd.f32 %v278_v13, %v277_v42  ;;  %v329_v11 = vmul.f32 0.0625, %v241_v62 }
  0x4d   :  { %v261_v9 = vrot.slane %v260_v30, 1  ;;  %v298_v37 = vadd.f32 %v297_v2, %v2653_v54  ;;  %v3691_v54 = vld [vmem:[#allocation45_spill] sm:$0xff] }
  0x4e   :  { %v316_v39 = vadd.f32 %v315_v23, %v2658_v33  ;;  %v280_v0 = vrot.slane %v279_v18, 2  ;;  %v2692_v23 = vld [vmem:[%s3450_s0 + $0x3f8] sm:$0xff]  ;;  %v375_v33 = vunpack.c.l.b16 %v336_v27  ;;  %v337_v44 = vpack.c.bf16 %v329_v11, %v329_v11 }
  0x4f   :  { %v262_v21 = vadd.f32 %v261_v9, %v260_v30  ;;  %v299_v13 = vrot.slane %v298_v37, 4  ;;  %3658 = vst [vmem:[#allocation94_spill] sm:$0xff] %v2692_v23  ;;  %v373_v9 = vunpack.c.l.b16 %v334_v25  ;;  %v374_v30 = vunpack.c.l.b16 %v335_v41 }
  0x50   :  { %v317_v2 = vadd.f32 %v316_v39, %v2669_v48  ;;  %v281_v49 = vadd.f32 %v280_v0, %v279_v18  ;;  %v376_v11 = vunpack.c.l.b16 %v337_v44 }
  0x51   :  { %v300_v12 = vadd.f32 %v299_v13, %v298_v37  ;;  %v330_v48 = vmul.f32 0.0625, %v262_v21  ;;  %v382_v37 = vsel %vm381_vm1, %v374_v30, %v373_v9 }
  0x52   :  { %v318_v56 = vadd.f32 %v317_v2, %v2680_v34  ;;  %v282_v39 = vrot.slane %v281_v49, 1  ;;  %v384_v62 = vsel %vm383_vm2, %v375_v33, %v382_v37 }
  0x53   :  { %v301_v38 = vrot.slane %v300_v12, 2  ;;  %v338_v21 = vpack.c.bf16 %v330_v48, %v330_v48  ;;  %v386_v41 = vsel %vm385_vm3, %v376_v11, %v384_v62  ;;  %v3661_v48 = vld [vmem:[#allocation46_spill] sm:$0xff]  ;;  %v3684_v11 = vld [vmem:[#allocation39_spill] sm:$0xff]  ;;  %v3685_v62 = vld [vmem:[#allocation37_spill] sm:$0xff] }
  0x54   :  { %v319_v47 = vadd.f32 %v318_v56, %v2692_v23  ;;  %v283_v25 = vadd.f32 %v282_v39, %v281_v49  ;;  %v3659_v49 = vld [vmem:[#allocation35_spill] sm:$0xff]  ;;  %v3688_v56 = vld [vmem:[#allocation8_spill] sm:$0xff] }
  0x55   :  { %v302_v18 = vadd.f32 %v301_v38, %v300_v12  ;;  %v377_v16 = vunpack.c.l.b16 %v338_v21  ;;  %v3686_v38 = vpack.c.bf16 %v3684_v11, %v3685_v62  ;;  %v3699_v62 = vpack.c.bf16 %v2026_v59, %v1980_v46  ;;  %v3701_v11 = vld [vmem:[#allocation63_spill] sm:$0xff] }
  0x56   :  { %v320_v27 = vrot.slane %v319_v47, 4  ;;  %v331_v13 = vmul.f32 0.0625, %v283_v25  ;;  %v3711_v59 = vpack.c.bf16 %v1877_v15, %v1872_v14  ;;  %v3719_v15 = vld [vmem:[#allocation17_spill] sm:$0xff] }
  0x57   :  { %v303_v2 = vrot.slane %v302_v18, 1  ;;  %v388_v37 = vsel %vm387_vm4, %v377_v16, %v386_v41  ;;  %v1754_v16 = vld [vmem:[%s3451_s5 + $0x8] sm:$0xff]  }
  0x58   :  { %v321_v42 = vadd.f32 %v320_v27, %v319_v47  ;;  %v339_v34 = vpack.c.bf16 %v331_v13, %v331_v13  ;;  %v3660_v47 = vld [vmem:[#allocation42_spill] sm:$0xff]  ;;  %v3665_v41 = vld [vmem:[#allocation59_spill] sm:$0xff] }
  0x59   :  { %v304_v23 = vadd.f32 %v303_v2, %v302_v18 }
  0x5a   :  { %v322_v0 = vrot.slane %v321_v42, 2  ;;  %v378_v25 = vunpack.c.l.b16 %v339_v34  ;;  %v3664_v34 = vld [vmem:[#allocation54_spill] sm:$0xff] }
  0x5b   :  { %v332_v9 = vmul.f32 0.0625, %v304_v23  ;;  %v3662_v23 = vld [vmem:[#allocation52_spill] sm:$0xff] }
  0x5c   :  { %v323_v12 = vadd.f32 %v322_v0, %v321_v42  ;;  %v390_v21 = vsel %vm389_vm5, %v378_v25, %v388_v37  ;;  %v3663_v0 = vld [vmem:[#allocation53_spill] sm:$0xff]  ;;  %v3668_v37 = vld [vmem:[#allocation28_spill] sm:$0xff] }
  0x5d   :  { %v340_v39 = vpack.c.bf16 %v332_v9, %v332_v9 }
  0x5e   :  { %v324_v30 = vrot.slane %v323_v12, 1 }
  0x5f   :  { %v379_v27 = vunpack.c.l.b16 %v340_v39  ;;  %v3667_v39 = vld [vmem:[#allocation3_spill] sm:$0xff] }
  0x60   :  { %v325_v18 = vadd.f32 %v324_v30, %v323_v12  ;;  %v3666_v30 = vld [vmem:[#allocation2_spill] sm:$0xff] }
  0x61   :  { %v392_v2 = vsel %vm391_vm6, %v379_v27, %v390_v21  ;;  %v598_v25 = vpack.c.bf16 %v3667_v39, %v3666_v30  ;;  %v3670_v27 = vld [vmem:[#allocation80_spill] sm:$0xff]  ;;  %v3674_v30 = vld [vmem:[#allocation77_spill] sm:$0xff]  ;;  %v3682_v21 = vld [vmem:[#allocation6_spill] sm:$0xff] }
  0x62   :  { %v333_v13 = vmul.f32 0.0625, %v325_v18  ;;  %v3669_v18 = vld [vmem:[#allocation29_spill] sm:$0xff] }
  0x64   :  { %v341_v42 = vpack.c.bf16 %v333_v13, %v333_v13  ;;  %v630_v13 = vpack.c.bf16 %v3669_v18, %v3668_v37  ;;  %v1756_v37 = vld [vmem:[%s3451_s5 + $0x18] sm:$0xff]  }
  0x66   :  { %v380_v33 = vunpack.c.l.b16 %v341_v42  ;;  %v1755_v42 = vld [vmem:[%s3451_s5 + $0x10] sm:$0xff]  }
  0x68   :  { %v394_v44 = vsel %vm393_vm7, %v380_v33, %v392_v2  ;;  %v3672_v33 = vld [vmem:[#allocation68_spill] sm:$0xff]  ;;  %v3673_v2 = vld [vmem:[#allocation75_spill] sm:$0xff] }
  0x69   :  { %v395_v9 = vpack.c.b16 %v394_v44, %v394_v44  ;;  %v3671_v44 = vld [vmem:[#allocation64_spill] sm:$0xff] }
  0x6b   :  { %1552 = vmatmul.mubr.bf16.vlgmr.msra.gmra.mrb[0].mxu0 %v395_v9  ;;  %1572 = vmatmul.mubr.bf16.vlgmr.msra.gmra.mrb[0].mxu1 %v395_v9  ;;  %v3679_v9 = vld [vmem:[#allocation31_spill] sm:$0xff] }
  0x6c   :  { %1576 = vmatpush3.bf16.xpose.msra.mxu0 %v3670_v27  ;;  %1727 = vmatpush3.bf16.xpose.msra.mxu1 %v3670_v27  ;;  %v1758_v27 = vld [vmem:[%s3451_s5 + $0x28] sm:$0xff]  }
  0x6d   :  { %1577 = vmatprep.subr.bf16.mxu0 %v1754_v16  ;;  %1720 = vmatprep.subr.bf16.mxu1 %v1754_v16 }
  0x6e   :  { %1591 = vmatprep.mubr.bf16.mxu0 %v598_v25  ;;  %1655 = vmatprep.mubr.bf16.mxu1 %v630_v13  ;;  %v3676_v13 = vld [vmem:[#allocation4_spill] sm:$0xff]  ;;  %v3678_v25 = vld [vmem:[#allocation33_spill] sm:$0xff] }
  0x6f   :  { %v3680_v39 = vpack.c.bf16 %v3678_v25, %v3679_v9  ;;  %v3697_v25 = vld [vmem:[#allocation56_spill] sm:$0xff] }
  0x74   :  { %1578 = vmatpush3.bf16.xpose.msra.mxu0 %v1754_v16  ;;  %1728 = vmatpush3.bf16.xpose.msra.mxu1 %v1754_v16  ;;  %v1757_v16 = vld [vmem:[%s3451_s5 + $0x20] sm:$0xff]  }
  0x75   :  { %1579 = vmatprep.subr.bf16.mxu0 %v1755_v42  ;;  %1721 = vmatprep.subr.bf16.mxu1 %v1755_v42 }
  0x7c   :  { %1580 = vmatpush3.bf16.xpose.msra.mxu0 %v1755_v42  ;;  %1729 = vmatpush3.bf16.xpose.msra.mxu1 %v1755_v42  ;;  %v1759_v42 = vld [vmem:[%s3451_s5 + $0x30] sm:$0xff]  }
  0x7d   :  { %1581 = vmatprep.subr.bf16.mxu0 %v1756_v37  ;;  %1722 = vmatprep.subr.bf16.mxu1 %v1756_v37 }
  0x84   :  { %1582 = vmatpush3.bf16.xpose.msra.mxu0 %v1756_v37  ;;  %1730 = vmatpush3.bf16.xpose.msra.mxu1 %v1756_v37  ;;  %v1760_v37 = vld [vmem:[%s3451_s5 + $0x38] sm:$0xff]  }
  0x85   :  { %1583 = vmatprep.subr.bf16.mxu0 %v1757_v16  ;;  %1723 = vmatprep.subr.bf16.mxu1 %v1757_v16 }
  0x8c   :  { %1584 = vmatpush3.bf16.xpose.msra.mxu0 %v1757_v16  ;;  %1731 = vmatpush3.bf16.xpose.msra.mxu1 %v1757_v16  ;;  %v3675_v16 = vld [vmem:[#allocation5_spill] sm:$0xff] }
  0x8d   :  { %1585 = vmatprep.subr.bf16.mxu0 %v1758_v27  ;;  %1724 = vmatprep.subr.bf16.mxu1 %v1758_v27  ;;  %v3677_v18 = vpack.c.bf16 %v3675_v16, %v3676_v13  ;;  %v3694_v16 = vld [vmem:[#allocation13_spill] sm:$0xff] }
  0x94   :  { %1586 = vmatpush3.bf16.xpose.msra.mxu0 %v1758_v27  ;;  %1732 = vmatpush3.bf16.xpose.msra.mxu1 %v1758_v27  ;;  %v3681_v27 = vld [vmem:[#allocation7_spill] sm:$0xff] }
  0x95   :  { %1587 = vmatprep.subr.bf16.mxu0 %v1759_v42  ;;  %1725 = vmatprep.subr.bf16.mxu1 %v1759_v42  ;;  %v3683_v12 = vpack.c.bf16 %v3681_v27, %v3682_v21 }
  0x9c   :  { %1588 = vmatpush3.bf16.xpose.msra.mxu0 %v1759_v42  ;;  %1733 = vmatpush3.bf16.xpose.msra.mxu1 %v1759_v42  ;;  %v3687_v42 = vld [vmem:[#allocation9_spill] sm:$0xff] }
  0x9d   :  { %1589 = vmatprep.subr.bf16.mxu0 %v1760_v37  ;;  %1726 = vmatprep.subr.bf16.mxu1 %v1760_v37  ;;  %v3689_v63 = vpack.c.bf16 %v3687_v42, %v3688_v56  ;;  %v3707_v42 = vpack.c.bf16 %v2135_v58, %v2099_v36  ;;  %v3715_v36 = vpack.c.bf16 %v2244_v57, %v2203_v3  ;;  %v3724_v3 = vld [vmem:[#allocation72_spill] sm:$0xff] }
  0x9e   :  { %v3716_v58 = vpack.c.bf16 %v1931_v31, %v1913_v26  ;;  %v3725_v26 = vpack.c.bf16 %v2475_v17, %v3724_v3  ;;  %v3726_v31 = vpack.c.bf16 %v2118_v45, %v2065_v10  ;;  %v3727_v57 = vpack.c.bf16 %v2510_v35, %v2480_v8  ;;  %v3735_v45 = vld [vmem:[#allocation12_spill] sm:$0xff]  ;;  %v3737_v35 = vld [vmem:[#allocation18_spill] sm:$0xff] }
  0x9f   :  { %v3732_v17 = vpack.c.bf16 %v3661_v48, %v3660_v47  ;;  %v3733_v10 = vpack.c.bf16 %v2612_v50, %v2592_v60  ;;  %v3734_v8 = vpack.c.bf16 %v3663_v0, %v3662_v23  ;;  %v3739_v47 = vpack.c.bf16 %v3665_v41, %v3664_v34  ;;  %v3741_v50 = vld [vmem:[#allocation25_spill] sm:$0xff]  ;;  %v3742_v48 = vld [vmem:[#allocation27_spill] sm:$0xff]  ;;  %v3743_v0 = vld [vmem:[#allocation32_spill] sm:$0xff] }
  0xa0   :  { %v3740_v60 = vpack.c.bf16 %v3672_v33, %v3671_v44  ;;  %v617_v23 = vpack.c.bf16 %v3742_v48, %v3741_v50  ;;  %v3746_v34 = vpack.c.bf16 %v2523_v43, %v2493_v7  ;;  %v3747_v41 = vld [vmem:[#allocation41_spill] sm:$0xff]  ;;  %v3749_v33 = vld [vmem:[#allocation47_spill] sm:$0xff]  ;;  %v3773_v3 = vld [vmem:[#allocation84_spill] sm:$0xff] }
  0xa1   :  { %v3755_v43 = vld [vmem:[#allocation19_spill] sm:$0xff]  ;;  %v3786_v50 = vld [vmem:[#allocation70_spill] sm:$0xff]  ;;  %v3787_v48 = vld [vmem:[#allocation73_spill] sm:$0xff] }
  0xa4   :  { %1590 = vmatpush3.bf16.xpose.msra.mxu0 %v1760_v37  ;;  %1734 = vmatpush3.bf16.xpose.msra.mxu1 %v1760_v37  ;;  %v3690_v37 = vld [vmem:[#allocation50_spill] sm:$0xff] }
  0xa5   :  { %v3692_v13 = vpack.c.bf16 %v3690_v37, %v3691_v54  ;;  %v3708_v37 = vld [vmem:[#allocation82_spill] sm:$0xff] }
  0xab   :  { %1592 = vmatmul.mubr.bf16.vlgmr.msra.gmra.mrb[4].mxu0 %v3677_v18  ;;  %1656 = vmatmul.mubr.bf16.vlgmr.msra.gmra.mrb[4].mxu1 %v3680_v39  ;;  %v3693_v18 = vld [vmem:[#allocation16_spill] sm:$0xff]  ;;  %v3696_v39 = vld [vmem:[#allocation61_spill] sm:$0xff] }
  0xac   :  { %1595 = vmatprep.mubr.bf16.mxu0 %v3683_v12  ;;  %1659 = vmatprep.mubr.bf16.mxu1 %v3686_v38  ;;  %v3695_v9 = vpack.c.bf16 %v3693_v18, %v3694_v16  ;;  %v3698_v21 = vpack.c.bf16 %v3696_v39, %v3697_v25  ;;  %v3700_v38 = vld [vmem:[#allocation71_spill] sm:$0xff]  ;;  %v3705_v12 = vld [vmem:[#allocation74_spill] sm:$0xff]  ;;  %v3712_v18 = vld [vmem:[#allocation40_spill] sm:$0xff] }
  0xad   :  { %v3702_v56 = vpack.c.bf16 %v3700_v38, %v3701_v11  ;;  %v3706_v27 = vpack.c.bf16 %v2470_v53, %v3705_v12  ;;  %v3714_v53 = vpack.c.bf16 %v1901_v22, %v1891_v19  ;;  %v3717_v16 = vld [vmem:[#allocation51_spill] sm:$0xff]  ;;  %v3722_v19 = vpack.c.bf16 %v2391_v40, %v2357_v24  ;;  %v3744_v39 = vld [vmem:[#allocation36_spill] sm:$0xff] }
  0xae   :  { %v3718_v14 = vpack.c.bf16 %v2317_v4, %v3717_v16  ;;  %v3723_v22 = vpack.c.bf16 %v2044_v1, %v2013_v55  ;;  %v3728_v40 = vpack.c.bf16 %v3659_v49, %v2140_v61  ;;  %v3729_v55 = vpack.c.bf16 %v2571_v32, %v2540_v28  ;;  %v3730_v1 = vld [vmem:[#allocation10_spill] sm:$0xff]  ;;  %v3731_v4 = vld [vmem:[#allocation11_spill] sm:$0xff] }
  0xaf   :  { %v614_v24 = vpack.c.bf16 %v3731_v4, %v3730_v1  ;;  %v3736_v61 = vld [vmem:[#allocation15_spill] sm:$0xff]  ;;  %v3738_v32 = vld [vmem:[#allocation22_spill] sm:$0xff]  ;;  %v618_v25 = vpack.c.bf16 %v3744_v39, %v3743_v0  ;;  %v3788_v0 = vld [vmem:[#allocation93_spill] sm:$0xff] }
  0xb0   :  { %v615_v28 = vpack.c.bf16 %v3736_v61, %v3735_v45  ;;  %v616_v49 = vpack.c.bf16 %v3738_v32, %v3737_v35  ;;  %v3750_v38 = vld [vmem:[#allocation55_spill] sm:$0xff]  ;;  %v3768_v16 = vld [vmem:[#allocation78_spill] sm:$0xff]  ;;  %v3781_v45 = vld [vmem:[#allocation89_spill] sm:$0xff] }
  0xb1   :  { %v620_v11 = vpack.c.bf16 %v3750_v38, %v3749_v33  ;;  %v3777_v1 = vld [vmem:[#allocation86_spill] sm:$0xff]  ;;  %v3783_v35 = vld [vmem:[#allocation67_spill] sm:$0xff] }
  0xb2   :  { %v3789_v39 = vld [vmem:[#allocation94_spill] sm:$0xff] }
  0xb3   :  { %1596 = vmatmul.mubr.bf16.gmra.mrb[8].mxu0 %v3689_v63  ;;  %1660 = vmatmul.mubr.bf16.gmra.mrb[8].mxu1 %v3692_v13  ;;  %v3703_v63 = vld [vmem:[#allocation24_spill] sm:$0xff]  ;;  %v3709_v13 = vld [vmem:[#allocation79_spill] sm:$0xff] }
  0xb4   :  { %1599 = vmatprep.mubr.bf16.mxu0 %v3695_v9  ;;  %1663 = vmatprep.mubr.bf16.mxu1 %v3698_v21  ;;  %v3704_v54 = vpack.c.bf16 %v2060_v6, %v3703_v63  ;;  %v3710_v46 = vpack.c.bf16 %v3708_v37, %v3709_v13  ;;  %v3713_v6 = vpack.c.bf16 %v2198_v52, %v3712_v18  ;;  %v3720_v9 = vld [vmem:[#allocation14_spill] sm:$0xff]  ;;  %v3754_v63 = vld [vmem:[#allocation60_spill] sm:$0xff] }
  0xb5   :  { %v3721_v52 = vpack.c.bf16 %v3719_v15, %v3720_v9  ;;  %v3745_v21 = vpack.c.bf16 %v3674_v30, %v3673_v2  ;;  %v3752_v2 = vpack.c.bf16 %v2621_v5, %v2601_v29  ;;  %v3753_v30 = vld [vmem:[#allocation57_spill] sm:$0xff]  ;;  %v3759_v13 = vld [vmem:[#allocation90_spill] sm:$0xff]  ;;  %v3765_v18 = vld [vmem:[#allocation76_spill] sm:$0xff] }
  0xb6   :  { %v621_v7 = vpack.c.bf16 %v3754_v63, %v3753_v30  ;;  %v3764_v5 = vld [vmem:[#allocation69_spill] sm:$0xff]  ;;  %v3770_v9 = vld [vmem:[#allocation34_spill] sm:$0xff] }
  0xbb   :  { %1600 = vmatmul.mubr.bf16.gmra.mrb[12].mxu0 %v3699_v62  ;;  %1664 = vmatmul.mubr.bf16.gmra.mrb[12].mxu1 %v3702_v56  ;;  %v3748_v62 = vld [vmem:[#allocation44_spill] sm:$0xff]  ;;  %v3751_v56 = vpack.c.bf16 %v2580_v20, %v2557_v51  ;;  %v3762_v51 = vld [vmem:[#allocation21_spill] sm:$0xff]  ;;  %v3763_v20 = vld [vmem:[#allocation23_spill] sm:$0xff] }
  0xbc   :  { %1603 = vmatprep.mubr.bf16.mxu0 %v3704_v54  ;;  %1667 = vmatprep.mubr.bf16.mxu1 %v3706_v27  ;;  %v619_v44 = vpack.c.bf16 %v3748_v62, %v3747_v41  ;;  %v3756_v54 = vld [vmem:[#allocation20_spill] sm:$0xff]  ;;  %v3757_v27 = vld [vmem:[#allocation65_spill] sm:$0xff]  ;;  %v623_v29 = vpack.c.bf16 %v3763_v20, %v3762_v51 }
  0xbd   :  { %v622_v12 = vpack.c.bf16 %v3756_v54, %v3755_v43 }
  0xc3   :  { %1604 = vmatmul.mubr.bf16.gmra.mrb[16].mxu0 %v3707_v42  ;;  %1668 = vmatmul.mubr.bf16.gmra.mrb[16].mxu1 %v3710_v46  ;;  %v3758_v42 = vld [vmem:[#allocation66_spill] sm:$0xff]  ;;  %v3760_v46 = vld [vmem:[#allocation88_spill] sm:$0xff] }
  0xc4   :  { %1607 = vmatprep.mubr.bf16.mxu0 %v3711_v59  ;;  %1671 = vmatprep.mubr.bf16.mxu1 %v3713_v6  ;;  %v654_v37 = vpack.c.bf16 %v3758_v42, %v3757_v27  ;;  %v3761_v59 = vpack.c.bf16 %v3759_v13, %v3760_v46  ;;  %v655_v6 = vpack.c.bf16 %v3765_v18, %v3764_v5 }
  0xcb   :  { %1608 = vmatmul.mubr.bf16.gmra.mrb[20].mxu0 %v3714_v53  ;;  %1672 = vmatmul.mubr.bf16.gmra.mrb[20].mxu1 %v3715_v36  ;;  %v3766_v53 = vld [vmem:[#allocation26_spill] sm:$0xff] }
  0xcc   :  { %1611 = vmatprep.mubr.bf16.mxu0 %v3716_v58  ;;  %1675 = vmatprep.mubr.bf16.mxu1 %v3718_v14  ;;  %v3767_v36 = vld [vmem:[#allocation30_spill] sm:$0xff]  ;;  %v3769_v14 = vld [vmem:[#allocation81_spill] sm:$0xff] }
  0xcd   :  { %v624_v58 = vpack.c.bf16 %v3767_v36, %v3766_v53  ;;  %v656_v15 = vpack.c.bf16 %v3769_v14, %v3768_v16 }
  0xd3   :  { %1612 = vmatmul.mubr.bf16.gmra.mrb[24].mxu0 %v3721_v52  ;;  %1676 = vmatmul.mubr.bf16.gmra.mrb[24].mxu1 %v3722_v19  ;;  %v3771_v52 = vld [vmem:[#allocation38_spill] sm:$0xff] }
  0xd4   :  { %1615 = vmatprep.mubr.bf16.mxu0 %v3723_v22  ;;  %1679 = vmatprep.mubr.bf16.mxu1 %v3725_v26  ;;  %v625_v19 = vpack.c.bf16 %v3771_v52, %v3770_v9  ;;  %v3772_v22 = vld [vmem:[#allocation83_spill] sm:$0xff] }
  0xd5   :  { %v657_v26 = vpack.c.bf16 %v3773_v3, %v3772_v22 }
  0xdb   :  { %1616 = vmatmul.mubr.bf16.gmra.mrb[28].mxu0 %v3726_v31  ;;  %1680 = vmatmul.mubr.bf16.gmra.mrb[28].mxu1 %v3727_v57  ;;  %v3774_v31 = vld [vmem:[#allocation43_spill] sm:$0xff]  ;;  %v3775_v57 = vld [vmem:[#allocation48_spill] sm:$0xff] }
  0xdc   :  { %1619 = vmatprep.mubr.bf16.mxu0 %v3728_v40  ;;  %1683 = vmatprep.mubr.bf16.mxu1 %v3729_v55  ;;  %v626_v40 = vpack.c.bf16 %v3775_v57, %v3774_v31  ;;  %v3776_v55 = vld [vmem:[#allocation85_spill] sm:$0xff] }
  0xdd   :  { %v658_v4 = vpack.c.bf16 %v3777_v1, %v3776_v55 }
  0xe3   :  { %1620 = vmatmul.mubr.bf16.gmra.mrb[32].mxu0 %v3732_v17  ;;  %1684 = vmatmul.mubr.bf16.gmra.mrb[32].mxu1 %v3733_v10  ;;  %v3779_v17 = vld [vmem:[#allocation58_spill] sm:$0xff] }
  0xe4   :  { %1623 = vmatprep.mubr.bf16.mxu0 %v614_v24  ;;  %1687 = vmatprep.mubr.bf16.mxu1 %v3734_v8  ;;  %v3778_v24 = vld [vmem:[#allocation49_spill] sm:$0xff]  ;;  %v3780_v8 = vld [vmem:[#allocation87_spill] sm:$0xff] }
  0xe5   :  { %v627_v10 = vpack.c.bf16 %v3779_v17, %v3778_v24  ;;  %v659_v61 = vpack.c.bf16 %v3781_v45, %v3780_v8 }
  0xeb   :  { %1624 = vmatmul.mubr.bf16.gmra.mrb[36].mxu0 %v615_v28  ;;  %1688 = vmatmul.mubr.bf16.gmra.mrb[36].mxu1 %v3739_v47  ;;  %v3782_v28 = vld [vmem:[#allocation62_spill] sm:$0xff]  ;;  %v3785_v47 = vld [vmem:[#allocation92_spill] sm:$0xff] }
  0xec   :  { %1627 = vmatprep.mubr.bf16.mxu0 %v616_v49  ;;  %1691 = vmatprep.mubr.bf16.mxu1 %v3740_v60  ;;  %v628_v32 = vpack.c.bf16 %v3783_v35, %v3782_v28  ;;  %v3784_v49 = vld [vmem:[#allocation91_spill] sm:$0xff] }
  0xed   :  { %v660_v60 = vpack.c.bf16 %v3785_v47, %v3784_v49 }
  0xf3   :  { %1628 = vmatmul.mubr.bf16.gmra.mrb[40].mxu0 %v617_v23  ;;  %1692 = vmatmul.mubr.bf16.gmra.mrb[40].mxu1 %v3745_v21  ;;  %v629_v23 = vpack.c.bf16 %v3787_v48, %v3786_v50  ;;  %v1418_v21 = vld [vmem:[%s3452_s2] ss:$0 sm:$0xff] }
  0xf4   :  { %1631 = vmatprep.mubr.bf16.mxu0 %v618_v25  ;;  %1695 = vmatprep.mubr.bf16.mxu1 %v3746_v34  ;;  %v661_v25 = vpack.c.bf16 %v3789_v39, %v3788_v0  ;;  %v1427_v34 = vld [vmem:[%s3453_s4] ss:$0 sm:$0xff] }
  0xfb   :  { %1632 = vmatmul.mubr.bf16.gmra.mrb[44].mxu0 %v619_v44  ;;  %1696 = vmatmul.mubr.bf16.gmra.mrb[44].mxu1 %v3751_v56 }
  0xfc   :  { %1635 = vmatprep.mubr.bf16.mxu0 %v620_v11  ;;  %1699 = vmatprep.mubr.bf16.mxu1 %v3752_v2 }
 0x103   :  { %1636 = vmatmul.mubr.bf16.gmra.mrb[48].mxu0 %v621_v7  ;;  %1700 = vmatmul.mubr.bf16.gmra.mrb[48].mxu1 %v3761_v59  ;;  %v2934_v7 = vld [vmem:[%s3456_s6] ss:$0 sm:$0xff] }
 0x104   :  { %1639 = vmatprep.mubr.bf16.mxu0 %v622_v12  ;;  %1703 = vmatprep.mubr.bf16.mxu1 %v654_v37 }
 0x10b   :  { %1640 = vmatmul.mubr.bf16.gmra.mrb[52].mxu0 %v623_v29  ;;  %1704 = vmatmul.mubr.bf16.gmra.mrb[52].mxu1 %v655_v6 }
 0x10c   :  { %1643 = vmatprep.mubr.bf16.mxu0 %v624_v58  ;;  %1707 = vmatprep.mubr.bf16.mxu1 %v656_v15 }
 0x113   :  { %1644 = vmatmul.mubr.bf16.gmra.mrb[56].mxu0 %v625_v19  ;;  %1708 = vmatmul.mubr.bf16.gmra.mrb[56].mxu1 %v657_v26 }
 0x114   :  { %1647 = vmatprep.mubr.bf16.mxu0 %v626_v40  ;;  %1711 = vmatprep.mubr.bf16.mxu1 %v658_v4 }
 0x11b   :  { %1648 = vmatmul.mubr.bf16.gmra.mrb[60].mxu0 %v627_v10  ;;  %1712 = vmatmul.mubr.bf16.gmra.mrb[60].mxu1 %v659_v61 }
 0x11c   :  { %1651 = vmatprep.mubr.bf16.mxu0 %v628_v32  ;;  %1715 = vmatprep.mubr.bf16.mxu1 %v660_v60 }
 0x123   :  { %1652 = vmatmul.mubr.bf16.gmra.mrb[64].mxu0 %v629_v23  ;;  %1716 = vmatmul.mubr.bf16.gmra.mrb[64].mxu1 %v661_v25 }
 0x13e   :  { %v479_v41 = vpop.f32.mrb[0].mxu0  ;;  %v591_v62 = vpop.f32.mrb[0].mxu1 }
 0x13f   :  { %v480_v44 = vadd.f32 %v1418_v21, %v479_v41  ;;  %v592_v33 = vadd.f32 %v1427_v34, %v591_v62  ;;  %v1553_v38 = vpop.f32.mrb[1].mxu0  ;;  %v1573_v11 = vpop.f32.mrb[1].mxu1 }
 0x140   :  { %v482_v56 = vpop.f32.mrb[2].mxu0  ;;  %v594_v2 = vpop.f32.mrb[2].mxu1 }
 0x141   :  { %485 = vst [vmem:[%s3454_s7] sm:$0xff] %v480_v44  ;;  %597 = vst [vmem:[%s3455_s8] sm:$0xff] %v592_v33  ;;  %v1554_v30 = vpop.f32.mrb[3].mxu0  ;;  %v1574_v63 = vpop.f32.mrb[3].mxu1 }
 0x17e   :  { %v1593_v43 = vpop.f32.mrb[4].mxu0  ;;  %v1657_v54 = vpop.f32.mrb[4].mxu1 }
 0x17f   :  { %v776_v12 = vadd.f32 %v1593_v43, %v2934_v7  ;;  %v1032_v27 = vadd.f32 %v1657_v54, %v2934_v7  ;;  %v767_v42 = vpop.f32.mrb[5].mxu0  ;;  %v1023_v37 = vpop.f32.mrb[5].mxu1 }
 0x180   :  { %v768_v13 = vadd.f32 %v2934_v7, %v767_v42  ;;  %v1024_v46 = vadd.f32 %v2934_v7, %v1023_v37  ;;  %v1594_v59 = vpop.f32.mrb[6].mxu0  ;;  %v1658_v51 = vpop.f32.mrb[6].mxu1 }
 0x181   :  { %1280 = vst [vmem:[%s3457_s9 + $0x10] sm:$0xff] %v776_v12  ;;  %1344 = vst [vmem:[%s3457_s9 + $0x210] sm:$0xff] %v1032_v27  ;;  %v779_v20 = vadd.f32 %v1594_v59, %v2934_v7  ;;  %v1035_v29 = vadd.f32 %v1658_v51, %v2934_v7  ;;  %v770_v5 = vpop.f32.mrb[7].mxu0  ;;  %v1026_v18 = vpop.f32.mrb[7].mxu1 }
 0x182   :  { %1278 = vst [vmem:[%s3457_s9] sm:$0xff] %v768_v13  ;;  %1342 = vst [vmem:[%s3457_s9 + $0x200] sm:$0xff] %v1024_v46  ;;  %v771_v6 = vadd.f32 %v2934_v7, %v770_v5  ;;  %v1027_v53 = vadd.f32 %v2934_v7, %v1026_v18 }
 0x183   :  { %1281 = vst [vmem:[%s3457_s9 + $0x18] sm:$0xff] %v779_v20  ;;  %1345 = vst [vmem:[%s3457_s9 + $0x218] sm:$0xff] %v1035_v29 }
 0x184   :  { %1279 = vst [vmem:[%s3457_s9 + $0x8] sm:$0xff] %v771_v6  ;;  %1343 = vst [vmem:[%s3457_s9 + $0x208] sm:$0xff] %v1027_v53 }
 0x186   :  { %v1597_v36 = vpop.f32.mrb[8].mxu0  ;;  %v1661_v58 = vpop.f32.mrb[8].mxu1 }
 0x187   :  { %v792_v16 = vadd.f32 %v1597_v36, %v2934_v7  ;;  %v1048_v14 = vadd.f32 %v1661_v58, %v2934_v7  ;;  %v783_v15 = vpop.f32.mrb[9].mxu0  ;;  %v1039_v9 = vpop.f32.mrb[9].mxu1 }
 0x188   :  { %v784_v52 = vadd.f32 %v2934_v7, %v783_v15  ;;  %v1040_v19 = vadd.f32 %v2934_v7, %v1039_v9  ;;  %v1598_v22 = vpop.f32.mrb[10].mxu0  ;;  %v1662_v3 = vpop.f32.mrb[10].mxu1 }
 0x189   :  { %1284 = vst [vmem:[%s3457_s9 + $0x30] sm:$0xff] %v792_v16  ;;  %1348 = vst [vmem:[%s3457_s9 + $0x230] sm:$0xff] %v1048_v14  ;;  %v795_v26 = vadd.f32 %v1598_v22, %v2934_v7  ;;  %v1051_v31 = vadd.f32 %v1662_v3, %v2934_v7  ;;  %v786_v57 = vpop.f32.mrb[11].mxu0  ;;  %v1042_v40 = vpop.f32.mrb[11].mxu1 }
 0x18a   :  { %1282 = vst [vmem:[%s3457_s9 + $0x20] sm:$0xff] %v784_v52  ;;  %1346 = vst [vmem:[%s3457_s9 + $0x220] sm:$0xff] %v1040_v19  ;;  %v787_v55 = vadd.f32 %v2934_v7, %v786_v57  ;;  %v1043_v1 = vadd.f32 %v2934_v7, %v1042_v40 }
 0x18b   :  { %1285 = vst [vmem:[%s3457_s9 + $0x38] sm:$0xff] %v795_v26  ;;  %1349 = vst [vmem:[%s3457_s9 + $0x238] sm:$0xff] %v1051_v31 }
 0x18c   :  { %1283 = vst [vmem:[%s3457_s9 + $0x28] sm:$0xff] %v787_v55  ;;  %1347 = vst [vmem:[%s3457_s9 + $0x228] sm:$0xff] %v1043_v1 }
 0x18e   :  { %v1601_v4 = vpop.f32.mrb[12].mxu0  ;;  %v1665_v24 = vpop.f32.mrb[12].mxu1 }
 0x18f   :  { %v808_v17 = vadd.f32 %v1601_v4, %v2934_v7  ;;  %v1064_v10 = vadd.f32 %v1665_v24, %v2934_v7  ;;  %v799_v8 = vpop.f32.mrb[13].mxu0  ;;  %v1055_v45 = vpop.f32.mrb[13].mxu1 }
 0x190   :  { %v800_v61 = vadd.f32 %v2934_v7, %v799_v8  ;;  %v1056_v28 = vadd.f32 %v2934_v7, %v1055_v45  ;;  %v1602_v35 = vpop.f32.mrb[14].mxu0  ;;  %v1666_v32 = vpop.f32.mrb[14].mxu1 }
 0x191   :  { %1288 = vst [vmem:[%s3457_s9 + $0x50] sm:$0xff] %v808_v17  ;;  %1352 = vst [vmem:[%s3457_s9 + $0x250] sm:$0xff] %v1064_v10  ;;  %v811_v49 = vadd.f32 %v1602_v35, %v2934_v7  ;;  %v1067_v47 = vadd.f32 %v1666_v32, %v2934_v7  ;;  %v802_v60 = vpop.f32.mrb[15].mxu0  ;;  %v1058_v50 = vpop.f32.mrb[15].mxu1 }
 0x192   :  { %1286 = vst [vmem:[%s3457_s9 + $0x40] sm:$0xff] %v800_v61  ;;  %1350 = vst [vmem:[%s3457_s9 + $0x240] sm:$0xff] %v1056_v28  ;;  %v803_v48 = vadd.f32 %v2934_v7, %v802_v60  ;;  %v1059_v23 = vadd.f32 %v2934_v7, %v1058_v50 }
 0x193   :  { %1289 = vst [vmem:[%s3457_s9 + $0x58] sm:$0xff] %v811_v49  ;;  %1353 = vst [vmem:[%s3457_s9 + $0x258] sm:$0xff] %v1067_v47 }
 0x194   :  { %1287 = vst [vmem:[%s3457_s9 + $0x48] sm:$0xff] %v803_v48  ;;  %1351 = vst [vmem:[%s3457_s9 + $0x248] sm:$0xff] %v1059_v23 }
 0x196   :  { %v1605_v0 = vpop.f32.mrb[16].mxu0  ;;  %v1669_v39 = vpop.f32.mrb[16].mxu1 }
 0x197   :  { %v824_v25 = vadd.f32 %v1605_v0, %v2934_v7  ;;  %v1080_v21 = vadd.f32 %v1669_v39, %v2934_v7  ;;  %v815_v34 = vpop.f32.mrb[17].mxu0  ;;  %v1071_v41 = vpop.f32.mrb[17].mxu1 }
 0x198   :  { %v816_v62 = vadd.f32 %v2934_v7, %v815_v34  ;;  %v1072_v44 = vadd.f32 %v2934_v7, %v1071_v41  ;;  %v1606_v33 = vpop.f32.mrb[18].mxu0  ;;  %v1670_v38 = vpop.f32.mrb[18].mxu1 }
 0x199   :  { %1292 = vst [vmem:[%s3457_s9 + $0x70] sm:$0xff] %v824_v25  ;;  %1356 = vst [vmem:[%s3457_s9 + $0x270] sm:$0xff] %v1080_v21  ;;  %v827_v11 = vadd.f32 %v1606_v33, %v2934_v7  ;;  %v1083_v56 = vadd.f32 %v1670_v38, %v2934_v7  ;;  %v818_v2 = vpop.f32.mrb[19].mxu0  ;;  %v1074_v30 = vpop.f32.mrb[19].mxu1 }
 0x19a   :  { %1290 = vst [vmem:[%s3457_s9 + $0x60] sm:$0xff] %v816_v62  ;;  %1354 = vst [vmem:[%s3457_s9 + $0x260] sm:$0xff] %v1072_v44  ;;  %v819_v63 = vadd.f32 %v2934_v7, %v818_v2  ;;  %v1075_v43 = vadd.f32 %v2934_v7, %v1074_v30 }
 0x19b   :  { %1293 = vst [vmem:[%s3457_s9 + $0x78] sm:$0xff] %v827_v11  ;;  %1357 = vst [vmem:[%s3457_s9 + $0x278] sm:$0xff] %v1083_v56 }
 0x19c   :  { %1291 = vst [vmem:[%s3457_s9 + $0x68] sm:$0xff] %v819_v63  ;;  %1355 = vst [vmem:[%s3457_s9 + $0x268] sm:$0xff] %v1075_v43 }
 0x19e   :  { %v1609_v54 = vpop.f32.mrb[20].mxu0  ;;  %v1673_v12 = vpop.f32.mrb[20].mxu1 }
 0x19f   :  { %v840_v27 = vadd.f32 %v1609_v54, %v2934_v7  ;;  %v1096_v42 = vadd.f32 %v1673_v12, %v2934_v7  ;;  %v831_v37 = vpop.f32.mrb[21].mxu0  ;;  %v1087_v13 = vpop.f32.mrb[21].mxu1 }
 0x1a0   :  { %v832_v46 = vadd.f32 %v2934_v7, %v831_v37  ;;  %v1088_v59 = vadd.f32 %v2934_v7, %v1087_v13  ;;  %v1610_v51 = vpop.f32.mrb[22].mxu0  ;;  %v1674_v20 = vpop.f32.mrb[22].mxu1 }
 0x1a1   :  { %1296 = vst [vmem:[%s3457_s9 + $0x90] sm:$0xff] %v840_v27  ;;  %1360 = vst [vmem:[%s3457_s9 + $0x290] sm:$0xff] %v1096_v42  ;;  %v843_v29 = vadd.f32 %v1610_v51, %v2934_v7  ;;  %v1099_v5 = vadd.f32 %v1674_v20, %v2934_v7  ;;  %v834_v18 = vpop.f32.mrb[23].mxu0  ;;  %v1090_v6 = vpop.f32.mrb[23].mxu1 }
 0x1a2   :  { %1294 = vst [vmem:[%s3457_s9 + $0x80] sm:$0xff] %v832_v46  ;;  %1358 = vst [vmem:[%s3457_s9 + $0x280] sm:$0xff] %v1088_v59  ;;  %v835_v53 = vadd.f32 %v2934_v7, %v834_v18  ;;  %v1091_v36 = vadd.f32 %v2934_v7, %v1090_v6 }
 0x1a3   :  { %1297 = vst [vmem:[%s3457_s9 + $0x98] sm:$0xff] %v843_v29  ;;  %1361 = vst [vmem:[%s3457_s9 + $0x298] sm:$0xff] %v1099_v5 }
 0x1a4   :  { %1295 = vst [vmem:[%s3457_s9 + $0x88] sm:$0xff] %v835_v53  ;;  %1359 = vst [vmem:[%s3457_s9 + $0x288] sm:$0xff] %v1091_v36 }
 0x1a6   :  { %v1613_v58 = vpop.f32.mrb[24].mxu0  ;;  %v1677_v16 = vpop.f32.mrb[24].mxu1 }
 0x1a7   :  { %v856_v14 = vadd.f32 %v1613_v58, %v2934_v7  ;;  %v1112_v15 = vadd.f32 %v1677_v16, %v2934_v7  ;;  %v847_v9 = vpop.f32.mrb[25].mxu0  ;;  %v1103_v52 = vpop.f32.mrb[25].mxu1 }
 0x1a8   :  { %v848_v19 = vadd.f32 %v2934_v7, %v847_v9  ;;  %v1104_v22 = vadd.f32 %v2934_v7, %v1103_v52  ;;  %v1614_v3 = vpop.f32.mrb[26].mxu0  ;;  %v1678_v26 = vpop.f32.mrb[26].mxu1 }
 0x1a9   :  { %1300 = vst [vmem:[%s3457_s9 + $0xb0] sm:$0xff] %v856_v14  ;;  %1364 = vst [vmem:[%s3457_s9 + $0x2b0] sm:$0xff] %v1112_v15  ;;  %v859_v31 = vadd.f32 %v1614_v3, %v2934_v7  ;;  %v1115_v57 = vadd.f32 %v1678_v26, %v2934_v7  ;;  %v850_v40 = vpop.f32.mrb[27].mxu0  ;;  %v1106_v55 = vpop.f32.mrb[27].mxu1 }
 0x1aa   :  { %1298 = vst [vmem:[%s3457_s9 + $0xa0] sm:$0xff] %v848_v19  ;;  %1362 = vst [vmem:[%s3457_s9 + $0x2a0] sm:$0xff] %v1104_v22  ;;  %v851_v1 = vadd.f32 %v2934_v7, %v850_v40  ;;  %v1107_v4 = vadd.f32 %v2934_v7, %v1106_v55 }
 0x1ab   :  { %1301 = vst [vmem:[%s3457_s9 + $0xb8] sm:$0xff] %v859_v31  ;;  %1365 = vst [vmem:[%s3457_s9 + $0x2b8] sm:$0xff] %v1115_v57 }
 0x1ac   :  { %1299 = vst [vmem:[%s3457_s9 + $0xa8] sm:$0xff] %v851_v1  ;;  %1363 = vst [vmem:[%s3457_s9 + $0x2a8] sm:$0xff] %v1107_v4 }
 0x1ae   :  { %v1617_v24 = vpop.f32.mrb[28].mxu0  ;;  %v1681_v17 = vpop.f32.mrb[28].mxu1 }
 0x1af   :  { %v872_v10 = vadd.f32 %v1617_v24, %v2934_v7  ;;  %v1128_v8 = vadd.f32 %v1681_v17, %v2934_v7  ;;  %v863_v45 = vpop.f32.mrb[29].mxu0  ;;  %v1119_v61 = vpop.f32.mrb[29].mxu1 }
 0x1b0   :  { %v864_v28 = vadd.f32 %v2934_v7, %v863_v45  ;;  %v1120_v35 = vadd.f32 %v2934_v7, %v1119_v61  ;;  %v1618_v32 = vpop.f32.mrb[30].mxu0  ;;  %v1682_v49 = vpop.f32.mrb[30].mxu1 }
 0x1b1   :  { %1304 = vst [vmem:[%s3457_s9 + $0xd0] sm:$0xff] %v872_v10  ;;  %1368 = vst [vmem:[%s3457_s9 + $0x2d0] sm:$0xff] %v1128_v8  ;;  %v875_v47 = vadd.f32 %v1618_v32, %v2934_v7  ;;  %v1131_v60 = vadd.f32 %v1682_v49, %v2934_v7  ;;  %v866_v50 = vpop.f32.mrb[31].mxu0  ;;  %v1122_v48 = vpop.f32.mrb[31].mxu1 }
 0x1b2   :  { %1302 = vst [vmem:[%s3457_s9 + $0xc0] sm:$0xff] %v864_v28  ;;  %1366 = vst [vmem:[%s3457_s9 + $0x2c0] sm:$0xff] %v1120_v35  ;;  %v867_v23 = vadd.f32 %v2934_v7, %v866_v50  ;;  %v1123_v0 = vadd.f32 %v2934_v7, %v1122_v48 }
 0x1b3   :  { %1305 = vst [vmem:[%s3457_s9 + $0xd8] sm:$0xff] %v875_v47  ;;  %1369 = vst [vmem:[%s3457_s9 + $0x2d8] sm:$0xff] %v1131_v60 }
 0x1b4   :  { %1303 = vst [vmem:[%s3457_s9 + $0xc8] sm:$0xff] %v867_v23  ;;  %1367 = vst [vmem:[%s3457_s9 + $0x2c8] sm:$0xff] %v1123_v0 }
 0x1b6   :  { %v1621_v39 = vpop.f32.mrb[32].mxu0  ;;  %v1685_v25 = vpop.f32.mrb[32].mxu1 }
 0x1b7   :  { %v888_v21 = vadd.f32 %v1621_v39, %v2934_v7  ;;  %v1144_v34 = vadd.f32 %v1685_v25, %v2934_v7  ;;  %v879_v41 = vpop.f32.mrb[33].mxu0  ;;  %v1135_v62 = vpop.f32.mrb[33].mxu1 }
 0x1b8   :  { %v880_v44 = vadd.f32 %v2934_v7, %v879_v41  ;;  %v1136_v33 = vadd.f32 %v2934_v7, %v1135_v62  ;;  %v1622_v38 = vpop.f32.mrb[34].mxu0  ;;  %v1686_v11 = vpop.f32.mrb[34].mxu1 }
 0x1b9   :  { %1308 = vst [vmem:[%s3457_s9 + $0xf0] sm:$0xff] %v888_v21  ;;  %1372 = vst [vmem:[%s3457_s9 + $0x2f0] sm:$0xff] %v1144_v34  ;;  %v891_v56 = vadd.f32 %v1622_v38, %v2934_v7  ;;  %v1147_v2 = vadd.f32 %v1686_v11, %v2934_v7  ;;  %v882_v30 = vpop.f32.mrb[35].mxu0  ;;  %v1138_v63 = vpop.f32.mrb[35].mxu1 }
 0x1ba   :  { %1306 = vst [vmem:[%s3457_s9 + $0xe0] sm:$0xff] %v880_v44  ;;  %1370 = vst [vmem:[%s3457_s9 + $0x2e0] sm:$0xff] %v1136_v33  ;;  %v883_v43 = vadd.f32 %v2934_v7, %v882_v30  ;;  %v1139_v54 = vadd.f32 %v2934_v7, %v1138_v63 }
 0x1bb   :  { %1309 = vst [vmem:[%s3457_s9 + $0xf8] sm:$0xff] %v891_v56  ;;  %1373 = vst [vmem:[%s3457_s9 + $0x2f8] sm:$0xff] %v1147_v2 }
 0x1bc   :  { %1307 = vst [vmem:[%s3457_s9 + $0xe8] sm:$0xff] %v883_v43  ;;  %1371 = vst [vmem:[%s3457_s9 + $0x2e8] sm:$0xff] %v1139_v54 }
 0x1be   :  { %v1625_v12 = vpop.f32.mrb[36].mxu0  ;;  %v1689_v27 = vpop.f32.mrb[36].mxu1 }
 0x1bf   :  { %v904_v42 = vadd.f32 %v1625_v12, %v2934_v7  ;;  %v1160_v37 = vadd.f32 %v1689_v27, %v2934_v7  ;;  %v895_v13 = vpop.f32.mrb[37].mxu0  ;;  %v1151_v46 = vpop.f32.mrb[37].mxu1 }
 0x1c0   :  { %v896_v59 = vadd.f32 %v2934_v7, %v895_v13  ;;  %v1152_v51 = vadd.f32 %v2934_v7, %v1151_v46  ;;  %v1626_v20 = vpop.f32.mrb[38].mxu0  ;;  %v1690_v29 = vpop.f32.mrb[38].mxu1 }
 0x1c1   :  { %1312 = vst [vmem:[%s3457_s9 + $0x110] sm:$0xff] %v904_v42  ;;  %1376 = vst [vmem:[%s3457_s9 + $0x310] sm:$0xff] %v1160_v37  ;;  %v907_v5 = vadd.f32 %v1626_v20, %v2934_v7  ;;  %v1163_v18 = vadd.f32 %v1690_v29, %v2934_v7  ;;  %v898_v6 = vpop.f32.mrb[39].mxu0  ;;  %v1154_v53 = vpop.f32.mrb[39].mxu1 }
 0x1c2   :  { %1310 = vst [vmem:[%s3457_s9 + $0x100] sm:$0xff] %v896_v59  ;;  %1374 = vst [vmem:[%s3457_s9 + $0x300] sm:$0xff] %v1152_v51  ;;  %v899_v36 = vadd.f32 %v2934_v7, %v898_v6  ;;  %v1155_v58 = vadd.f32 %v2934_v7, %v1154_v53 }
 0x1c3   :  { %1313 = vst [vmem:[%s3457_s9 + $0x118] sm:$0xff] %v907_v5  ;;  %1377 = vst [vmem:[%s3457_s9 + $0x318] sm:$0xff] %v1163_v18 }
 0x1c4   :  { %1311 = vst [vmem:[%s3457_s9 + $0x108] sm:$0xff] %v899_v36  ;;  %1375 = vst [vmem:[%s3457_s9 + $0x308] sm:$0xff] %v1155_v58 }
 0x1c6   :  { %v1629_v16 = vpop.f32.mrb[40].mxu0  ;;  %v1693_v14 = vpop.f32.mrb[40].mxu1 }
 0x1c7   :  { %v920_v15 = vadd.f32 %v1629_v16, %v2934_v7  ;;  %v1176_v9 = vadd.f32 %v1693_v14, %v2934_v7  ;;  %v911_v52 = vpop.f32.mrb[41].mxu0  ;;  %v1167_v19 = vpop.f32.mrb[41].mxu1 }
 0x1c8   :  { %v912_v22 = vadd.f32 %v2934_v7, %v911_v52  ;;  %v1168_v3 = vadd.f32 %v2934_v7, %v1167_v19  ;;  %v1630_v26 = vpop.f32.mrb[42].mxu0  ;;  %v1694_v31 = vpop.f32.mrb[42].mxu1 }
 0x1c9   :  { %1316 = vst [vmem:[%s3457_s9 + $0x130] sm:$0xff] %v920_v15  ;;  %1380 = vst [vmem:[%s3457_s9 + $0x330] sm:$0xff] %v1176_v9  ;;  %v923_v57 = vadd.f32 %v1630_v26, %v2934_v7  ;;  %v1179_v40 = vadd.f32 %v1694_v31, %v2934_v7  ;;  %v914_v55 = vpop.f32.mrb[43].mxu0  ;;  %v1170_v1 = vpop.f32.mrb[43].mxu1 }
 0x1ca   :  { %1314 = vst [vmem:[%s3457_s9 + $0x120] sm:$0xff] %v912_v22  ;;  %1378 = vst [vmem:[%s3457_s9 + $0x320] sm:$0xff] %v1168_v3  ;;  %v915_v4 = vadd.f32 %v2934_v7, %v914_v55  ;;  %v1171_v24 = vadd.f32 %v2934_v7, %v1170_v1 }
 0x1cb   :  { %1317 = vst [vmem:[%s3457_s9 + $0x138] sm:$0xff] %v923_v57  ;;  %1381 = vst [vmem:[%s3457_s9 + $0x338] sm:$0xff] %v1179_v40 }
 0x1cc   :  { %1315 = vst [vmem:[%s3457_s9 + $0x128] sm:$0xff] %v915_v4  ;;  %1379 = vst [vmem:[%s3457_s9 + $0x328] sm:$0xff] %v1171_v24 }
 0x1ce   :  { %v1633_v17 = vpop.f32.mrb[44].mxu0  ;;  %v1697_v10 = vpop.f32.mrb[44].mxu1 }
 0x1cf   :  { %v936_v8 = vadd.f32 %v1633_v17, %v2934_v7  ;;  %v1192_v45 = vadd.f32 %v1697_v10, %v2934_v7  ;;  %v927_v61 = vpop.f32.mrb[45].mxu0  ;;  %v1183_v28 = vpop.f32.mrb[45].mxu1 }
 0x1d0   :  { %v928_v35 = vadd.f32 %v2934_v7, %v927_v61  ;;  %v1184_v32 = vadd.f32 %v2934_v7, %v1183_v28  ;;  %v1634_v49 = vpop.f32.mrb[46].mxu0  ;;  %v1698_v47 = vpop.f32.mrb[46].mxu1 }
 0x1d1   :  { %1320 = vst [vmem:[%s3457_s9 + $0x150] sm:$0xff] %v936_v8  ;;  %1384 = vst [vmem:[%s3457_s9 + $0x350] sm:$0xff] %v1192_v45  ;;  %v939_v60 = vadd.f32 %v1634_v49, %v2934_v7  ;;  %v1195_v50 = vadd.f32 %v1698_v47, %v2934_v7  ;;  %v930_v48 = vpop.f32.mrb[47].mxu0  ;;  %v1186_v23 = vpop.f32.mrb[47].mxu1 }
 0x1d2   :  { %1318 = vst [vmem:[%s3457_s9 + $0x140] sm:$0xff] %v928_v35  ;;  %1382 = vst [vmem:[%s3457_s9 + $0x340] sm:$0xff] %v1184_v32  ;;  %v931_v0 = vadd.f32 %v2934_v7, %v930_v48  ;;  %v1187_v39 = vadd.f32 %v2934_v7, %v1186_v23 }
 0x1d3   :  { %1321 = vst [vmem:[%s3457_s9 + $0x158] sm:$0xff] %v939_v60  ;;  %1385 = vst [vmem:[%s3457_s9 + $0x358] sm:$0xff] %v1195_v50 }
 0x1d4   :  { %1319 = vst [vmem:[%s3457_s9 + $0x148] sm:$0xff] %v931_v0  ;;  %1383 = vst [vmem:[%s3457_s9 + $0x348] sm:$0xff] %v1187_v39 }
 0x1d6   :  { %v1637_v25 = vpop.f32.mrb[48].mxu0  ;;  %v1701_v21 = vpop.f32.mrb[48].mxu1 }
 0x1d7   :  { %v952_v34 = vadd.f32 %v1637_v25, %v2934_v7  ;;  %v1208_v41 = vadd.f32 %v1701_v21, %v2934_v7  ;;  %v943_v62 = vpop.f32.mrb[49].mxu0  ;;  %v1199_v44 = vpop.f32.mrb[49].mxu1 }
 0x1d8   :  { %v944_v33 = vadd.f32 %v2934_v7, %v943_v62  ;;  %v1200_v38 = vadd.f32 %v2934_v7, %v1199_v44  ;;  %v1638_v11 = vpop.f32.mrb[50].mxu0  ;;  %v1702_v56 = vpop.f32.mrb[50].mxu1 }
 0x1d9   :  { %1324 = vst [vmem:[%s3457_s9 + $0x170] sm:$0xff] %v952_v34  ;;  %1388 = vst [vmem:[%s3457_s9 + $0x370] sm:$0xff] %v1208_v41  ;;  %v955_v2 = vadd.f32 %v1638_v11, %v2934_v7  ;;  %v1211_v30 = vadd.f32 %v1702_v56, %v2934_v7  ;;  %v946_v63 = vpop.f32.mrb[51].mxu0  ;;  %v1202_v43 = vpop.f32.mrb[51].mxu1 }
 0x1da   :  { %1322 = vst [vmem:[%s3457_s9 + $0x160] sm:$0xff] %v944_v33  ;;  %1386 = vst [vmem:[%s3457_s9 + $0x360] sm:$0xff] %v1200_v38  ;;  %v947_v54 = vadd.f32 %v2934_v7, %v946_v63  ;;  %v1203_v12 = vadd.f32 %v2934_v7, %v1202_v43 }
 0x1db   :  { %1325 = vst [vmem:[%s3457_s9 + $0x178] sm:$0xff] %v955_v2  ;;  %1389 = vst [vmem:[%s3457_s9 + $0x378] sm:$0xff] %v1211_v30 }
 0x1dc   :  { %1323 = vst [vmem:[%s3457_s9 + $0x168] sm:$0xff] %v947_v54  ;;  %1387 = vst [vmem:[%s3457_s9 + $0x368] sm:$0xff] %v1203_v12 }
 0x1de   :  { %v1641_v27 = vpop.f32.mrb[52].mxu0  ;;  %v1705_v42 = vpop.f32.mrb[52].mxu1 }
 0x1df   :  { %v968_v37 = vadd.f32 %v1641_v27, %v2934_v7  ;;  %v1224_v13 = vadd.f32 %v1705_v42, %v2934_v7  ;;  %v959_v46 = vpop.f32.mrb[53].mxu0  ;;  %v1215_v59 = vpop.f32.mrb[53].mxu1 }
 0x1e0   :  { %v960_v51 = vadd.f32 %v2934_v7, %v959_v46  ;;  %v1216_v20 = vadd.f32 %v2934_v7, %v1215_v59  ;;  %v1642_v29 = vpop.f32.mrb[54].mxu0  ;;  %v1706_v5 = vpop.f32.mrb[54].mxu1 }
 0x1e1   :  { %1328 = vst [vmem:[%s3457_s9 + $0x190] sm:$0xff] %v968_v37  ;;  %1392 = vst [vmem:[%s3457_s9 + $0x390] sm:$0xff] %v1224_v13  ;;  %v971_v18 = vadd.f32 %v1642_v29, %v2934_v7  ;;  %v1227_v6 = vadd.f32 %v1706_v5, %v2934_v7  ;;  %v962_v53 = vpop.f32.mrb[55].mxu0  ;;  %v1218_v36 = vpop.f32.mrb[55].mxu1 }
 0x1e2   :  { %1326 = vst [vmem:[%s3457_s9 + $0x180] sm:$0xff] %v960_v51  ;;  %1390 = vst [vmem:[%s3457_s9 + $0x380] sm:$0xff] %v1216_v20  ;;  %v963_v58 = vadd.f32 %v2934_v7, %v962_v53  ;;  %v1219_v16 = vadd.f32 %v2934_v7, %v1218_v36 }
 0x1e3   :  { %1329 = vst [vmem:[%s3457_s9 + $0x198] sm:$0xff] %v971_v18  ;;  %1393 = vst [vmem:[%s3457_s9 + $0x398] sm:$0xff] %v1227_v6 }
 0x1e4   :  { %1327 = vst [vmem:[%s3457_s9 + $0x188] sm:$0xff] %v963_v58  ;;  %1391 = vst [vmem:[%s3457_s9 + $0x388] sm:$0xff] %v1219_v16 }
 0x1e6   :  { %v1645_v14 = vpop.f32.mrb[56].mxu0  ;;  %v1709_v15 = vpop.f32.mrb[56].mxu1 }
 0x1e7   :  { %v984_v9 = vadd.f32 %v1645_v14, %v2934_v7  ;;  %v1240_v52 = vadd.f32 %v1709_v15, %v2934_v7  ;;  %v975_v19 = vpop.f32.mrb[57].mxu0  ;;  %v1231_v22 = vpop.f32.mrb[57].mxu1 }
 0x1e8   :  { %v976_v3 = vadd.f32 %v2934_v7, %v975_v19  ;;  %v1232_v26 = vadd.f32 %v2934_v7, %v1231_v22  ;;  %v1646_v31 = vpop.f32.mrb[58].mxu0  ;;  %v1710_v57 = vpop.f32.mrb[58].mxu1 }
 0x1e9   :  { %1332 = vst [vmem:[%s3457_s9 + $0x1b0] sm:$0xff] %v984_v9  ;;  %1396 = vst [vmem:[%s3457_s9 + $0x3b0] sm:$0xff] %v1240_v52  ;;  %v987_v40 = vadd.f32 %v1646_v31, %v2934_v7  ;;  %v1243_v55 = vadd.f32 %v1710_v57, %v2934_v7  ;;  %v978_v1 = vpop.f32.mrb[59].mxu0  ;;  %v1234_v4 = vpop.f32.mrb[59].mxu1 }
 0x1ea   :  { %1330 = vst [vmem:[%s3457_s9 + $0x1a0] sm:$0xff] %v976_v3  ;;  %1394 = vst [vmem:[%s3457_s9 + $0x3a0] sm:$0xff] %v1232_v26  ;;  %v979_v24 = vadd.f32 %v2934_v7, %v978_v1  ;;  %v1235_v17 = vadd.f32 %v2934_v7, %v1234_v4 }
 0x1eb   :  { %1333 = vst [vmem:[%s3457_s9 + $0x1b8] sm:$0xff] %v987_v40  ;;  %1397 = vst [vmem:[%s3457_s9 + $0x3b8] sm:$0xff] %v1243_v55 }
 0x1ec   :  { %1331 = vst [vmem:[%s3457_s9 + $0x1a8] sm:$0xff] %v979_v24  ;;  %1395 = vst [vmem:[%s3457_s9 + $0x3a8] sm:$0xff] %v1235_v17 }
 0x1ee   :  { %v1649_v10 = vpop.f32.mrb[60].mxu0  ;;  %v1713_v8 = vpop.f32.mrb[60].mxu1 }
 0x1ef   :  { %v1000_v45 = vadd.f32 %v1649_v10, %v2934_v7  ;;  %v1256_v61 = vadd.f32 %v1713_v8, %v2934_v7  ;;  %v991_v28 = vpop.f32.mrb[61].mxu0  ;;  %v1247_v35 = vpop.f32.mrb[61].mxu1 }
 0x1f0   :  { %v992_v32 = vadd.f32 %v2934_v7, %v991_v28  ;;  %v1248_v49 = vadd.f32 %v2934_v7, %v1247_v35  ;;  %v1650_v47 = vpop.f32.mrb[62].mxu0  ;;  %v1714_v60 = vpop.f32.mrb[62].mxu1 }
 0x1f1   :  { %1336 = vst [vmem:[%s3457_s9 + $0x1d0] sm:$0xff] %v1000_v45  ;;  %1400 = vst [vmem:[%s3457_s9 + $0x3d0] sm:$0xff] %v1256_v61  ;;  %v1003_v50 = vadd.f32 %v1650_v47, %v2934_v7  ;;  %v1259_v48 = vadd.f32 %v1714_v60, %v2934_v7  ;;  %v994_v23 = vpop.f32.mrb[63].mxu0  ;;  %v1250_v0 = vpop.f32.mrb[63].mxu1 }
 0x1f2   :  { %1334 = vst [vmem:[%s3457_s9 + $0x1c0] sm:$0xff] %v992_v32  ;;  %1398 = vst [vmem:[%s3457_s9 + $0x3c0] sm:$0xff] %v1248_v49  ;;  %v995_v39 = vadd.f32 %v2934_v7, %v994_v23  ;;  %v1251_v25 = vadd.f32 %v2934_v7, %v1250_v0 }
 0x1f3   :  { %1337 = vst [vmem:[%s3457_s9 + $0x1d8] sm:$0xff] %v1003_v50  ;;  %1401 = vst [vmem:[%s3457_s9 + $0x3d8] sm:$0xff] %v1259_v48 }
 0x1f4   :  { %1335 = vst [vmem:[%s3457_s9 + $0x1c8] sm:$0xff] %v995_v39  ;;  %1399 = vst [vmem:[%s3457_s9 + $0x3c8] sm:$0xff] %v1251_v25 }
 0x1f6   :  { %v1653_v21 = vpop.f32.mrb[64].mxu0  ;;  %v1717_v34 = vpop.f32.mrb[64].mxu1 }
 0x1f7   :  { %v1016_v41 = vadd.f32 %v1653_v21, %v2934_v7  ;;  %v1272_v62 = vadd.f32 %v1717_v34, %v2934_v7  ;;  %v1007_v44 = vpop.f32.mrb[65].mxu0  ;;  %v1263_v33 = vpop.f32.mrb[65].mxu1 }
 0x1f8   :  { %v1008_v38 = vadd.f32 %v2934_v7, %v1007_v44  ;;  %v1264_v11 = vadd.f32 %v2934_v7, %v1263_v33  ;;  %v1654_v56 = vpop.f32.mrb[66].mxu0  ;;  %v1718_v2 = vpop.f32.mrb[66].mxu1 }
 0x1f9   :  { %1340 = vst [vmem:[%s3457_s9 + $0x1f0] sm:$0xff] %v1016_v41  ;;  %1404 = vst [vmem:[%s3457_s9 + $0x3f0] sm:$0xff] %v1272_v62  ;;  %v1019_v30 = vadd.f32 %v1654_v56, %v2934_v7  ;;  %v1275_v63 = vadd.f32 %v1718_v2, %v2934_v7  ;;  %v1010_v43 = vpop.f32.mrb[67].mxu0  ;;  %v1266_v54 = vpop.f32.mrb[67].mxu1 }
 0x1fa   :  { %1338 = vst [vmem:[%s3457_s9 + $0x1e0] sm:$0xff] %v1008_v38  ;;  %1402 = vst [vmem:[%s3457_s9 + $0x3e0] sm:$0xff] %v1264_v11  ;;  %v1011_v12 = vadd.f32 %v2934_v7, %v1010_v43  ;;  %v1267_v27 = vadd.f32 %v2934_v7, %v1266_v54 }
 0x1fb   :  { %1341 = vst [vmem:[%s3457_s9 + $0x1f8] sm:$0xff] %v1019_v30  ;;  %1405 = vst [vmem:[%s3457_s9 + $0x3f8] sm:$0xff] %v1275_v63 }
 0x1fc   :  { %1339 = vst [vmem:[%s3457_s9 + $0x1e8] sm:$0xff] %v1011_v12  ;;  %1403 = vst [vmem:[%s3457_s9 + $0x3e8] sm:$0xff] %v1267_v27 }

// kernel: decoder_forward.3
= control target key start
LH: loop header
LB: loop body
LE: loop exit
PB: predicated region body
PF: predicated region fallthrough
CT: control target
= control target key end

     0   :  { %s7622_s0 = inlined_call_operand.vmem [shape: s32[7], index: 0, kind: input, shape index: {}]   ;;  %s7623_s1 = inlined_call_operand.vmem [shape: bf16[8,128,128], index: 1, kind: input, shape index: {}]   ;;  %s7624_s2 = inlined_call_operand.vmem [shape: f32[8,128,128], index: 2, kind: input, shape index: {}]   ;;  %s7625_s3 = inlined_call_operand.vmem [shape: bf16[7,8,128], index: 3, kind: input, shape index: {}]   ;;  %s7626_s4 = inlined_call_operand.vmem [shape: f32[8,128], index: 4, kind: input, shape index: {}]   ;;  %s7627_s5 = inlined_call_operand.vmem [shape: f32[8,128], index: 5, kind: input, shape index: {}]   ;;  %s7628_s6 = inlined_call_operand.vmem [shape: bf16[128,128], index: 6, kind: input, shape index: {}]   ;;  %s7629_s7 = inlined_call_operand.vmem [shape: f32[1,128], index: 7, kind: input, shape index: {}]   ;;  %s7630_s8 = inlined_call_operand.vmem [shape: f32[1,1,128], index: 8, kind: input, shape index: {}]   ;;  %s7631_s9 = inlined_call_operand.vmem [shape: bf16[128,128], index: 9, kind: input, shape index: {}]   ;;  %s7632_s10 = inlined_call_operand.vmem [shape: f32[1,128], index: 10, kind: input, shape index: {}]   ;;  %s7633_s11 = inlined_call_operand.vmem [shape: bf16[512,128], index: 11, kind: input, shape index: {}]   ;;  %s7634_s12 = inlined_call_operand.vmem [shape: bf16[512,128], index: 12, kind: input, shape index: {}]   ;;  %s7635_s13 = inlined_call_operand.vmem [shape: bf16[512,128], index: 13, kind: input, shape index: {}]   ;;  %s7636_s14 = inlined_call_operand.vmem [shape: f32[1,512], index: 14, kind: input, shape index: {}]   ;;  %s7637_s15 = inlined_call_operand.vmem [shape: bf16[128,128], index: 15, kind: input, shape index: {}]   ;;  %s7638_s16 = inlined_call_operand.vmem [shape: f32[1,128], index: 16, kind: input, shape index: {}]   ;;  %s7639_s17 = inlined_call_operand.vmem [shape: f32[7,8,128], index: 17, kind: output, shape index: {0}]   ;;  %s7640_s18 = inlined_call_operand.vmem [shape: f32[7,8,128], index: 18, kind: output, shape index: {1}]  }
   0x1   :  { %7652 = sst [smem:[#allocation8_spill]] %s7622_s0 }
   0x2   :  { %7653 = sst [smem:[#allocation9_spill]] %s7623_s1  ;;  %s7656_s29 = sld [smem:[#allocation8_spill]] }
   0x3   :  { %7654 = sst [smem:[#allocation10_spill]] %s7624_s2 }
   0x4   :  { %7655 = sst [smem:[#allocation11_spill]] %s7632_s10 }
   0x8   :  { %s24_s10 = sshll.u32 %s7656_s29, 4  ;;  %s25_s10 = int_to_ptr.vmem [resolvable:$true] %s24_s10 }
   0x9   :  { %s5540_s30 = scalar_lea.vmem %s25_s10, 16  ;;  %p5545_p1 = scmp.lt.s32.totalorder %s25_s10, %s25_s10 }
   0xa   :  { %p5541_p0 = scmp.ne.s32.totalorder %s25_s10, %s5540_s30  ;;  %p5546_p2 = scmp.lt.s32.totalorder %s5540_s30, %s5540_s30 }
   0xc   :  { %p5547_p3 = por %p5546_p2, %p5545_p1 }
   0xe   :  { %p5548_p4 = pnand %p5547_p3, %p5541_p0 }
  0x10   :  { %5551 = shalt.err (!%p5548_p4)  }
  0x11   :  { %s5562_s0 = smov [#allocation5]  }
  0x12   :  { %27 = dma.vmem_to_smem %s25_s10, 16, %s5562_s0, [#allocation4] }
  0x13   :  { %5556 = dma.done.wait [#allocation4], 16 }
  0x14   :  { %5557 = vsyncadd [#allocation4], 4294967280 }
  0x15   :  { %29 = sfence }
  0x16   :  { %s5664_s19 = smov 0  }
  0x17 LB: > { %7657 = sst [smem:[#allocation7_spill]] %s5560_s19  ;;  %s4696_s1 = sadd.s32 4294967295, %s5560_s19   ;;  %s5560_s19 = sphi %s5664_s19, %s35_s19  }
  0x18   : > { %p4700_p5 = scmp.ge.s32.totalorder %s5560_s19, 1  ;;  %p496_p6 = scmp.lt.s32.totalorder %s5560_s19, 8 }
  0x1a   : > { %p497_p7 = pnand %p4700_p5, %p496_p6 }
  0x1b   : > { %p550_p8 = scmp.lt.s32.totalorder (!%p497_p7), %s4696_s1, 6  ;;  %s5672_s10 = sld [smem:[#allocation5 + %s4696_s1]] (!%p497_p7) }
  0x1c   : > { %500 = sbr.rel (%p497_p7) target bundleno = 2024 (0x7e8), region = 84  ;;  %p4704_p9 = scmp.ne.s32.totalorder (!%p497_p7), %s4696_s1, 0 }
  0x23   : > { %s551_s20 = scalar_select %p550_p8, %s4696_s1, 6 }
  0x24   : > { %567 = sbr.rel (%p4704_p9) target bundleno = 43 (0x2b), region = 88  ;;  %v568_v0 = vld [vmem:[%s7626_s4] sm:$0xff] (!%p4704_p9) }
  0x25   : > { %s4701_s21 = sshll.u32 %s551_s20, 2  ;;  %s4702_s22 = sshll.u32 %s551_s20, 3  ;;  %v570_v1 = vld [vmem:[%s7627_s5] sm:$0xff] (!%p4704_p9)  ;;  %569 = vst [vmem:[#allocation2] sm:$0xff] (!%p4704_p9), %v568_v0 }
  0x26   : > { %s5677_s24 = scalar_lea.vmem %s7625_s3, %s4701_s21  ;;  %s5682_s27 = scalar_lea.vmem %s7639_s17, %s4702_s22  ;;  %571 = vst [vmem:[#allocation3] sm:$0xff] (!%p4704_p9), %v570_v1 }
  0x27   : > { %s5687_s30 = scalar_lea.vmem %s7640_s18, %s4702_s22 }
  0x2b PF: > { %v5338_v2 = vld [vmem:[%s7628_s6] sm:$0xff]   ;;  %v5563_v3 = vmov 0.0   ;;  %vm7644_vm0 = vmmov 0   ;;  %v5339_v4 = vld [vmem:[%s7628_s6 + $0x8] sm:$0xff]   ;;  %v5340_v5 = vld [vmem:[%s7628_s6 + $0x10] sm:$0xff]   ;;  %v947_v15 = vlaneseq  ;;  %s7658_s29 = sld [smem:[#allocation10_spill]] }
  0x2c   : > { %5106 = vmatprep.subr.bf16.mxu0 %v5563_v3  ;;  %5126 = vmatprep.subr.bf16.mxu1 %v5563_v3  ;;  %v5341_v6 = vld [vmem:[%s7628_s6 + $0x18] sm:$0xff]   ;;  %v5342_v7 = vld [vmem:[%s7628_s6 + $0x20] sm:$0xff]   ;;  %v5343_v8 = vld [vmem:[%s7628_s6 + $0x28] sm:$0xff]   ;;  %v5565_v13 = vmov 1966171168   ;;  %vm1819_vm1 = vcmask 130112  }
  0x2d   : > { %5107 = vmatpush3.bf16.xpose.msra.mxu0 %v5338_v2  ;;  %5122 = vmatprep.mubr.msk.bf16.mxu0 %vm7644_vm0, %v5563_v3  ;;  %v5344_v9 = vld [vmem:[%s7628_s6 + $0x30] sm:$0xff]   ;;  %v5345_v10 = vld [vmem:[%s7628_s6 + $0x38] sm:$0xff]   ;;  %v572_v11 = vld [vmem:[#allocation2] sm:$0xff]  ;;  %v945_v14 = vunpack.c.l.s4 %v5565_v13  ;;  %v5739_v17 = vshrl.u32 %v947_v15, 7  ;;  %vm7648_vm2 = vcmask 195712   ;;  %vm1833_vm3 = vcmask 261312  }
  0x2e   : > { %5108 = vmatprep.subr.bf16.mxu0 %v5563_v3  ;;  %5142 = vmatprep.mubr.msk.bf16.mxu1 %vm7644_vm0, %v5563_v3  ;;  %v5733_v12 = vpack.c.bf16 %v572_v11, %v572_v11  ;;  %v4705_v18 = vld [vmem:[%s7629_s7] ss:$0 sm:$0xff]  ;;  %vm1840_vm4 = vcmask 326912   ;;  %vm1847_vm5 = vcmask 392512   ;;  %vm1854_vm6 = vcmask 458112   ;;  %s7660_s22 = sld [smem:[#allocation9_spill]] }
  0x2f   : > { %v946_v16 = vunpack.c.0.s8 %v945_v14  ;;  %v5754_v26 = vsub.s32 0, %v5739_v17  ;;  %v5784_v37 = vld [vmem:[%s7630_s8] ss:$0 sm:$0xff]  ;;  %vm1861_vm7 = vcmask 523712   ;;  %vm1868_vm8 = vcmask 589312   ;;  %s7669_s26 = sld [smem:[#allocation11_spill]] }
  0x30   : > { %vm1875_vm9 = vcmask 654912   ;;  %vm1882_vm10 = vcmask 720512   ;;  %vm1889_vm11 = vcmask 786112   ;;  %vm1896_vm12 = vcmask 851712  }
  0x31   : > { %v5745_v19 = vsub.s32 %v946_v16, %v5739_v17  ;;  %v818_v28 = vld [vmem:[%s7658_s29 + $0x20] sm:$0xff]  ;;  %v819_v31 = vld [vmem:[%s7658_s29 + $0x28] sm:$0xff]  ;;  %v816_v36 = vld [vmem:[%s7658_s29 + $0x10] sm:$0xff]  ;;  %vm1903_vm13 = vcmask 917312   ;;  %vm1910_vm14 = vcmask 982912   ;;  %vm1917_vm15 = vcmask 1048512  }
  0x32   : > { %v814_v29 = vld [vmem:[%s7658_s29] sm:$0xff]  ;;  %v815_v32 = vld [vmem:[%s7658_s29 + $0x8] sm:$0xff]  ;;  %v817_v49 = vld [vmem:[%s7658_s29 + $0x18] sm:$0xff] }
  0x33   : > { %v822_v35 = vld [vmem:[%s7658_s29 + $0x40] sm:$0xff]  ;;  %v823_v48 = vld [vmem:[%s7658_s29 + $0x48] sm:$0xff]  ;;  %v824_v56 = vld [vmem:[%s7658_s29 + $0x50] sm:$0xff] }
  0x34   : > { %v820_v57 = vld [vmem:[%s7658_s29 + $0x30] sm:$0xff]  ;;  %v825_v1 = vld [vmem:[%s7658_s29 + $0x58] sm:$0xff]  ;;  %v826_v14 = vld [vmem:[%s7658_s29 + $0x60] sm:$0xff] }
  0x35   : > { %5109 = vmatpush3.bf16.xpose.msra.mxu0 %v5339_v4  ;;  %v821_v2 = vld [vmem:[%s7658_s29 + $0x38] sm:$0xff]  ;;  %v846_v16 = vld [vmem:[%s7658_s29 + $0x100] sm:$0xff] }
  0x36   : > { %5110 = vmatprep.subr.bf16.mxu0 %v5563_v3 }
  0x3d   : > { %5111 = vmatpush3.bf16.xpose.msra.mxu0 %v5340_v5 }
  0x3e   : > { %5112 = vmatprep.subr.bf16.mxu0 %v5563_v3 }
  0x45   : > { %5113 = vmatpush3.bf16.xpose.msra.mxu0 %v5341_v6 }
  0x46   : > { %5114 = vmatprep.subr.bf16.mxu0 %v5563_v3 }
  0x4d   : > { %5115 = vmatpush3.bf16.xpose.msra.mxu0 %v5342_v7 }
  0x4e   : > { %5116 = vmatprep.subr.bf16.mxu0 %v5563_v3 }
  0x55   : > { %5117 = vmatpush3.bf16.xpose.msra.mxu0 %v5343_v8 }
  0x56   : > { %5118 = vmatprep.subr.bf16.mxu0 %v5563_v3 }
  0x5d   : > { %5119 = vmatpush3.bf16.xpose.msra.mxu0 %v5344_v9 }
  0x5e   : > { %5120 = vmatprep.subr.bf16.mxu0 %v5563_v3 }
  0x65   : > { %5121 = vmatpush3.bf16.xpose.msra.mxu0 %v5345_v10 }
  0x66   : > { %5166 = vmatprep.subr.bf16.mxu0 %v5563_v3 }
  0x6c   : > { %5123 = vmatmul.mubr.bf16.vlgmr.msra.gmra.mrb[0].mxu0 %v5733_v12 }
  0x6d   : > { %5182 = vmatprep.mubr.msk.bf16.mxu0 %vm7644_vm0, %v5563_v3  ;;  %vm7646_vm0 = vcmask 1041409  }
 0x13f   : > { %v808_v20 = vpop.f32.mrb[0].mxu0 }
 0x140   : > { %v5747_v21 = vadd.f32 %v4705_v18, %v808_v20  ;;  %v5124_v22 = vpop.f32.mrb[1].mxu0 }
 0x141   : > { %v811_v23 = vpop.f32.mrb[2].mxu0 }
 0x142   : > { %v5751_v24 = vrot.slane %v5747_v21, %v5745_v19  ;;  %v5125_v25 = vpop.f32.mrb[3].mxu0  ;;  %v943_v4 = vcombine.high %v5747_v21, %v5747_v21 }
 0x144   : > { %v966_v27 = vrot.slane %v5751_v24, %v5745_v19  ;;  %v958_v5 = vcombine.high %v5751_v24, %v5751_v24  ;;  %v5836_v18 = vrot.slane %v943_v4, %v5745_v19 }
 0x146   : > { %v5765_v30 = vrot.slane %v966_v27, %v5754_v26  ;;  %v988_v58 = vcombine.high %v966_v27, %v966_v27  ;;  %v5839_v20 = vrot.slane %v958_v5, %v5745_v19 }
 0x148   : > { %v1036_v33 = vadd.f32 %v5765_v30, %v818_v28  ;;  %v1032_v34 = vadd.f32 %v5765_v30, %v814_v29  ;;  %v1037_v40 = vadd.f32 %v5765_v30, %v819_v31  ;;  %v1033_v41 = vadd.f32 %v5765_v30, %v815_v32  ;;  %v827_v28 = vld [vmem:[%s7658_s29 + $0x68] sm:$0xff]  ;;  %v848_v29 = vld [vmem:[%s7658_s29 + $0x110] sm:$0xff] }
 0x149   : > { %v1040_v42 = vadd.f32 %v5765_v30, %v822_v35  ;;  %v1034_v43 = vadd.f32 %v5765_v30, %v816_v36  ;;  %v1041_v51 = vadd.f32 %v5765_v30, %v823_v48  ;;  %v1035_v55 = vadd.f32 %v5765_v30, %v817_v49  ;;  %v829_v49 = vld [vmem:[%s7658_s29 + $0x78] sm:$0xff] }
 0x14a   : > { %v1164_v38 = vmax.f32 %v1036_v33, 0.0  ;;  %v1160_v39 = vmax.f32 %v1032_v34, 0.0  ;;  %v1165_v46 = vmax.f32 %v1037_v40, 0.0  ;;  %v1161_v47 = vmax.f32 %v1033_v41, 0.0  ;;  %v828_v40 = vld [vmem:[%s7658_s29 + $0x70] sm:$0xff]  ;;  %v834_v41 = vld [vmem:[%s7658_s29 + $0xa0] sm:$0xff] }
 0x14b   : > { %v1168_v50 = vmax.f32 %v1040_v42, 0.0  ;;  %v1162_v54 = vmax.f32 %v1034_v43, 0.0  ;;  %v1169_v59 = vmax.f32 %v1041_v51, 0.0  ;;  %v1042_v60 = vadd.f32 %v5765_v30, %v824_v56 }
 0x14c   : > { %v1299_v44 = vmul.f32 %v5784_v37, %v1164_v38  ;;  %v1295_v45 = vmul.f32 %v5784_v37, %v1160_v39  ;;  %v1300_v52 = vmul.f32 %v5784_v37, %v1165_v46  ;;  %v1296_v53 = vmul.f32 %v5784_v37, %v1161_v47 }
 0x14d   : > { %v1303_v61 = vmul.f32 %v5784_v37, %v1168_v50  ;;  %v1297_v62 = vmul.f32 %v5784_v37, %v1162_v54  ;;  %v1163_v63 = vmax.f32 %v1035_v55, 0.0  ;;  %v1038_v0 = vadd.f32 %v5765_v30, %v820_v57  ;;  %v879_v50 = vld [vmem:[%s7658_s29 + $0x208] sm:$0xff]  ;;  %v830_v57 = vld [vmem:[%s7658_s29 + $0x80] sm:$0xff] }
 0x14e   : > { %1431 = vadd.xlane.f32.xlu1 %v1299_v44  ;;  %1423 = vadd.xlane.f32.xlu0 %v1295_v45  ;;  %v5823_v6 = vrot.slane %v988_v58, %v5754_v26  ;;  %v1304_v7 = vmul.f32 %v5784_v37, %v1169_v59  ;;  %v1170_v8 = vmax.f32 %v1042_v60, 0.0  ;;  %v1043_v11 = vadd.f32 %v5765_v30, %v825_v1  ;;  %v835_v58 = vld [vmem:[%s7658_s29 + $0xa8] sm:$0xff] }
 0x14f   : > { %v1298_v9 = vmul.f32 %v5784_v37, %v1163_v63  ;;  %v1166_v10 = vmax.f32 %v1038_v0, 0.0  ;;  %v1039_v13 = vadd.f32 %v5765_v30, %v821_v2  ;;  %v1044_v21 = vadd.f32 %v5765_v30, %v826_v14  ;;  %v831_v0 = vld [vmem:[%s7658_s29 + $0x88] sm:$0xff] }
 0x150   : > { %v1064_v22 = vadd.f32 %v5823_v6, %v846_v16  ;;  %v1305_v23 = vmul.f32 %v5784_v37, %v1170_v8  ;;  %v1171_v25 = vmax.f32 %v1043_v11, 0.0  ;;  %v5853_v31 = vrot.slane %v5836_v18, %v5745_v19  ;;  %v851_v1 = vld [vmem:[%s7658_s29 + $0x128] sm:$0xff]  ;;  %v881_v11 = vld [vmem:[%s7658_s29 + $0x218] sm:$0xff] }
 0x151   : > { %v1301_v24 = vmul.f32 %v5784_v37, %v1166_v10  ;;  %v1167_v27 = vmax.f32 %v1039_v13, 0.0  ;;  %v5857_v32 = vrot.slane %v5839_v20, %v5754_v26  ;;  %v1172_v33 = vmax.f32 %v1044_v21, 0.0  ;;  %v832_v10 = vld [vmem:[%s7658_s29 + $0x90] sm:$0xff] }
 0x152   : > { %1433 = vadd.xlane.f32.xlu1 %v1300_v52  ;;  %1425 = vadd.xlane.f32.xlu0 %v1296_v53  ;;  %v1045_v34 = vadd.f32 %v5765_v30, %v827_v28  ;;  %v1306_v35 = vmul.f32 %v5784_v37, %v1171_v25  ;;  %v1192_v38 = vmax.f32 %v1064_v22, 0.0  ;;  %v1066_v39 = vadd.f32 %v5823_v6, %v848_v29  ;;  %v852_v25 = vld [vmem:[%s7658_s29 + $0x130] sm:$0xff] }
 0x153   : > { %v1302_v36 = vmul.f32 %v5784_v37, %v1167_v27  ;;  %v5871_v42 = vrot.slane %v5853_v31, %v5754_v26  ;;  %v1046_v44 = vadd.f32 %v5765_v30, %v828_v40  ;;  %v1307_v45 = vmul.f32 %v5784_v37, %v1172_v33 }
 0x154   : > { %v1173_v43 = vmax.f32 %v1045_v34, 0.0  ;;  %v1327_v46 = vmul.f32 %v5784_v37, %v1192_v38  ;;  %v1194_v47 = vmax.f32 %v1066_v39, 0.0  ;;  %v1052_v48 = vadd.f32 %v5857_v32, %v834_v41  ;;  %v882_v38 = vld [vmem:[%s7658_s29 + $0x220] sm:$0xff] }
 0x155   : > { %v1174_v52 = vmax.f32 %v1046_v44, 0.0  ;;  %v1047_v55 = vadd.f32 %v5765_v30, %v829_v49  ;;  %v1097_v56 = vadd.f32 %v5871_v42, %v879_v50  ;;  %v1048_v59 = vadd.f32 %v5857_v32, %v830_v57 }
 0x156   : > { %1439 = vadd.xlane.f32.xlu1 %v1303_v61  ;;  %1427 = vadd.xlane.f32.xlu0 %v1297_v62  ;;  %v1308_v51 = vmul.f32 %v5784_v37, %v1173_v43  ;;  %v1329_v53 = vmul.f32 %v5784_v37, %v1194_v47  ;;  %v1180_v54 = vmax.f32 %v1052_v48, 0.0  ;;  %v1053_v60 = vadd.f32 %v5857_v32, %v835_v58  ;;  %v838_v47 = vld [vmem:[%s7658_s29 + $0xc0] sm:$0xff] }
 0x157   : > { %v1309_v61 = vmul.f32 %v5784_v37, %v1174_v52  ;;  %v1175_v62 = vmax.f32 %v1047_v55, 0.0  ;;  %v1225_v63 = vmax.f32 %v1097_v56, 0.0  ;;  %v1176_v2 = vmax.f32 %v1048_v59, 0.0  ;;  %v878_v55 = vld [vmem:[%s7658_s29 + $0x200] sm:$0xff] }
 0x158   : > { %v1315_v30 = vmul.f32 %v5784_v37, %v1180_v54  ;;  %v1049_v4 = vadd.f32 %v5857_v32, %v831_v0  ;;  %v1181_v8 = vmax.f32 %v1053_v60, 0.0  ;;  %v1050_v22 = vadd.f32 %v5857_v32, %v832_v10  ;;  %v839_v54 = vld [vmem:[%s7658_s29 + $0xc8] sm:$0xff] }
 0x159   : > { %v1310_v5 = vmul.f32 %v5784_v37, %v1175_v62  ;;  %v1311_v13 = vmul.f32 %v5784_v37, %v1176_v2  ;;  %v1100_v40 = vadd.f32 %v5871_v42, %v882_v38  ;;  %v1057_v60 = vadd.f32 %v5857_v32, %v839_v54  ;;  %v850_v62 = vld [vmem:[%s7658_s29 + $0x120] sm:$0xff] }
 0x15a   : > { %1441 = vadd.xlane.f32.xlu1 %v1304_v7  ;;  %1429 = vadd.xlane.f32.xlu0 %v1298_v9  ;;  %v1360_v7 = vmul.f32 %v5784_v37, %v1225_v63  ;;  %v1069_v9 = vadd.f32 %v5823_v6, %v851_v1  ;;  %v1177_v14 = vmax.f32 %v1049_v4, 0.0  ;;  %v1316_v16 = vmul.f32 %v5784_v37, %v1181_v8  ;;  %v880_v8 = vld [vmem:[%s7658_s29 + $0x210] sm:$0xff] }
 0x15b   : > { %v1178_v33 = vmax.f32 %v1050_v22, 0.0  ;;  %v1228_v52 = vmax.f32 %v1100_v40, 0.0  ;;  %v1185_v2 = vmax.f32 %v1057_v60, 0.0  ;;  %v1098_v10 = vadd.f32 %v5871_v42, %v880_v8  ;;  %v836_v22 = vld [vmem:[%s7658_s29 + $0xb0] sm:$0xff]  ;;  %v854_v60 = vld [vmem:[%s7658_s29 + $0x140] sm:$0xff] }
 0x15c   : > { %v1197_v21 = vmax.f32 %v1069_v9, 0.0  ;;  %v1312_v27 = vmul.f32 %v5784_v37, %v1177_v14 }
 0x15d   : > { %v1313_v41 = vmul.f32 %v5784_v37, %v1178_v33  ;;  %v1363_v58 = vmul.f32 %v5784_v37, %v1228_v52  ;;  %v843_v33 = vld [vmem:[%s7658_s29 + $0xe8] sm:$0xff] }
 0x15e   : > { %1443 = vadd.xlane.f32.xlu1 %v1305_v23  ;;  %1435 = vadd.xlane.f32.xlu0 %v1301_v24  ;;  %v1099_v23 = vadd.f32 %v5871_v42, %v881_v11  ;;  %v847_v24 = vld [vmem:[%s7658_s29 + $0x108] sm:$0xff]  ;;  %v1332_v29 = vmul.f32 %v5784_v37, %v1197_v21  ;;  %v1320_v11 = vmul.f32 %v5784_v37, %v1185_v2  ;;  %v842_v21 = vld [vmem:[%s7658_s29 + $0xe0] sm:$0xff]  ;;  %v893_v2 = vld [vmem:[%s7658_s29 + $0x278] sm:$0xff] }
 0x15f   : > { %v1065_v28 = vadd.f32 %v5823_v6, %v847_v24  ;;  %v1060_v24 = vadd.f32 %v5857_v32, %v842_v21  ;;  %v1061_v40 = vadd.f32 %v5857_v32, %v843_v33  ;;  %v883_v52 = vld [vmem:[%s7658_s29 + $0x228] sm:$0xff] }
 0x160   : > { %v1227_v34 = vmax.f32 %v1099_v23, 0.0  ;;  %v1101_v54 = vadd.f32 %v5871_v42, %v883_v52 }
 0x161   : > { %v1193_v44 = vmax.f32 %v1065_v28, 0.0  ;;  %v1226_v28 = vmax.f32 %v1098_v10, 0.0  ;;  %v1111_v10 = vadd.f32 %v5871_v42, %v893_v2  ;;  %v912_v2 = vld [vmem:[%s7658_s29 + $0x310] sm:$0xff] }
 0x162   : > { %1445 = vadd.xlane.f32.xlu1 %v1306_v35  ;;  %1437 = vadd.xlane.f32.xlu0 %v1302_v36  ;;  %v1070_v35 = vadd.f32 %v5823_v6, %v852_v25  ;;  %v833_v36 = vld [vmem:[%s7658_s29 + $0x98] sm:$0xff]  ;;  %v1362_v43 = vmul.f32 %v5784_v37, %v1227_v34 }
 0x163   : > { %v1051_v39 = vadd.f32 %v5857_v32, %v833_v36  ;;  %v1328_v50 = vmul.f32 %v5784_v37, %v1193_v44  ;;  %v837_v34 = vld [vmem:[%s7658_s29 + $0xb8] sm:$0xff]  ;;  %v1188_v36 = vmax.f32 %v1060_v24, 0.0  ;;  %v1361_v38 = vmul.f32 %v5784_v37, %v1226_v28  ;;  %v864_v28 = vld [vmem:[%s7658_s29 + $0x190] sm:$0xff] }
 0x164   : > { %v853_v44 = vld [vmem:[%s7658_s29 + $0x138] sm:$0xff] }
 0x165   : > { %v1179_v48 = vmax.f32 %v1051_v39, 0.0 }
 0x166   : > { %1447 = vadd.xlane.f32.xlu1 %v1307_v45  ;;  %1487 = vadd.xlane.f32.xlu0 %v1327_v46  ;;  %v1198_v45 = vmax.f32 %v1070_v35, 0.0  ;;  %v849_v46 = vld [vmem:[%s7658_s29 + $0x118] sm:$0xff] }
 0x167   : > { %v1067_v49 = vadd.f32 %v5823_v6, %v849_v46  ;;  %v1314_v56 = vmul.f32 %v5784_v37, %v1179_v48  ;;  %v1189_v48 = vmax.f32 %v1061_v40, 0.0  ;;  %v865_v40 = vld [vmem:[%s7658_s29 + $0x198] sm:$0xff] }
 0x169   : > { %v1195_v57 = vmax.f32 %v1067_v49, 0.0 }
 0x16a   : > { %1449 = vadd.xlane.f32.xlu1 %v1308_v51  ;;  %1491 = vadd.xlane.f32.xlu0 %v1329_v53  ;;  %v1333_v51 = vmul.f32 %v5784_v37, %v1198_v45  ;;  %v1056_v53 = vadd.f32 %v5857_v32, %v838_v47  ;;  %v1323_v45 = vmul.f32 %v5784_v37, %v1188_v36 }
 0x16b   : > { %v1330_v63 = vmul.f32 %v5784_v37, %v1195_v57 }
 0x16c   : > { %v1184_v59 = vmax.f32 %v1056_v53, 0.0 }
 0x16e   : > { %1451 = vadd.xlane.f32.xlu1 %v1309_v61  ;;  %1463 = vadd.xlane.f32.xlu0 %v1315_v30  ;;  %v1096_v61 = vadd.f32 %v5871_v42, %v878_v55  ;;  %v840_v30 = vld [vmem:[%s7658_s29 + $0xd0] sm:$0xff]  ;;  %v1319_v1 = vmul.f32 %v5784_v37, %v1184_v59  ;;  %v1324_v55 = vmul.f32 %v5784_v37, %v1189_v48 }
 0x16f   : > { %v1058_v0 = vadd.f32 %v5857_v32, %v840_v30  ;;  %v892_v59 = vld [vmem:[%s7658_s29 + $0x270] sm:$0xff]  ;;  %v1072_v30 = vadd.f32 %v5823_v6, %v854_v60  ;;  %v910_v60 = vld [vmem:[%s7658_s29 + $0x300] sm:$0xff] }
 0x170   : > { %v1224_v4 = vmax.f32 %v1096_v61, 0.0  ;;  %v1110_v61 = vadd.f32 %v5871_v42, %v892_v59  ;;  %v857_v59 = vld [vmem:[%s7658_s29 + $0x158] sm:$0xff] }
 0x171   : > { %v1186_v14 = vmax.f32 %v1058_v0, 0.0 }
 0x172   : > { %1453 = vadd.xlane.f32.xlu1 %v1310_v5  ;;  %1553 = vadd.xlane.f32.xlu0 %v1360_v7  ;;  %v1068_v5 = vadd.f32 %v5823_v6, %v850_v62  ;;  %v841_v7 = vld [vmem:[%s7658_s29 + $0xd8] sm:$0xff] }
 0x173   : > { %v1059_v9 = vadd.f32 %v5857_v32, %v841_v7  ;;  %v1321_v25 = vmul.f32 %v5784_v37, %v1186_v14  ;;  %v1200_v7 = vmax.f32 %v1072_v30, 0.0  ;;  %v855_v14 = vld [vmem:[%s7658_s29 + $0x148] sm:$0xff] }
 0x175   : > { %v1187_v23 = vmax.f32 %v1059_v9, 0.0 }
 0x176   : > { %1455 = vadd.xlane.f32.xlu1 %v1311_v13  ;;  %1465 = vadd.xlane.f32.xlu0 %v1316_v16  ;;  %v1359_v13 = vmul.f32 %v5784_v37, %v1224_v4  ;;  %v1196_v16 = vmax.f32 %v1068_v5, 0.0  ;;  %v884_v4 = vld [vmem:[%s7658_s29 + $0x230] sm:$0xff]  ;;  %v1238_v5 = vmax.f32 %v1110_v61, 0.0 }
 0x177   : > { %v1322_v35 = vmul.f32 %v5784_v37, %v1187_v23  ;;  %v1239_v23 = vmax.f32 %v1111_v10, 0.0 }
 0x178   : > { %v1373_v21 = vmul.f32 %v5784_v37, %v1238_v5 }
 0x17a   : > { %1457 = vadd.xlane.f32.xlu1 %v1312_v27  ;;  %1497 = vadd.xlane.f32.xlu0 %v1332_v29  ;;  %v1331_v27 = vmul.f32 %v5784_v37, %v1196_v16  ;;  %v1054_v29 = vadd.f32 %v5857_v32, %v836_v22  ;;  %v959_v16 = vcombine.high %v5836_v18, %v5836_v18 }
 0x17b   : > { %v1335_v22 = vmul.f32 %v5784_v37, %v1200_v7 }
 0x17c   : > { %v1182_v39 = vmax.f32 %v1054_v29, 0.0  ;;  %v885_v29 = vld [vmem:[%s7658_s29 + $0x238] sm:$0xff]  ;;  %v6061_v18 = vrot.slane %v959_v16, %v5745_v19 }
 0x17e   : > { %1459 = vadd.xlane.f32.xlu1 %v1313_v41  ;;  %1557 = vadd.xlane.f32.xlu0 %v1362_v43  ;;  %v1055_v41 = vadd.f32 %v5857_v32, %v837_v34  ;;  %v844_v43 = vld [vmem:[%s7658_s29 + $0xf0] sm:$0xff]  ;;  %v1317_v47 = vmul.f32 %v5784_v37, %v1182_v39  ;;  %v1103_v34 = vadd.f32 %v5871_v42, %v885_v29 }
 0x17f   : > { %v1062_v46 = vadd.f32 %v5857_v32, %v844_v43  ;;  %v989_v43 = vcombine.high %v5853_v31, %v5853_v31  ;;  %v894_v31 = vld [vmem:[%s7658_s29 + $0x280] sm:$0xff] }
 0x180   : > { %v1183_v49 = vmax.f32 %v1055_v41, 0.0  ;;  %v856_v41 = vld [vmem:[%s7658_s29 + $0x150] sm:$0xff] }
 0x181   : > { %v1190_v57 = vmax.f32 %v1062_v46, 0.0  ;;  %v1074_v46 = vadd.f32 %v5823_v6, %v856_v41  ;;  %v6090_v52 = vrot.slane %v989_v43, %v5754_v26 }
 0x182   : > { %1489 = vadd.xlane.f32.xlu1 %v1328_v50  ;;  %1499 = vadd.xlane.f32.xlu0 %v1333_v51  ;;  %v1071_v50 = vadd.f32 %v5823_v6, %v853_v44  ;;  %v845_v51 = vld [vmem:[%s7658_s29 + $0xf8] sm:$0xff]  ;;  %v6077_v44 = vrot.slane %v6061_v18, %v5754_v26 }
 0x183   : > { %v1063_v53 = vadd.f32 %v5857_v32, %v845_v51  ;;  %v990_v32 = vcombine.high %v5839_v20, %v5839_v20  ;;  %v1325_v62 = vmul.f32 %v5784_v37, %v1190_v57  ;;  %v886_v51 = vld [vmem:[%s7658_s29 + $0x240] sm:$0xff]  ;;  %v1130_v5 = vadd.f32 %v6090_v52, %v912_v2  ;;  %v861_v2 = vld [vmem:[%s7658_s29 + $0x178] sm:$0xff] }
 0x184   : > { %v1104_v57 = vadd.f32 %v5871_v42, %v886_v51 }
 0x185   : > { %v1191_v0 = vmax.f32 %v1063_v53, 0.0  ;;  %v6036_v20 = vrot.slane %v990_v32, %v5754_v26 }
 0x186   : > { %1461 = vadd.xlane.f32.xlu1 %v1314_v56  ;;  %1559 = vadd.xlane.f32.xlu0 %v1363_v58  ;;  %v1318_v56 = vmul.f32 %v5784_v37, %v1183_v49  ;;  %v1199_v58 = vmax.f32 %v1071_v50, 0.0  ;;  %v1231_v50 = vmax.f32 %v1103_v34, 0.0  ;;  %v1232_v30 = vmax.f32 %v1104_v57, 0.0  ;;  %v870_v57 = vld [vmem:[%s7658_s29 + $0x1c0] sm:$0xff] }
 0x187   : > { %v1326_v8 = vmul.f32 %v5784_v37, %v1191_v0  ;;  %v1082_v33 = vadd.f32 %v6036_v20, %v864_v28  ;;  %v1128_v0 = vadd.f32 %v6090_v52, %v910_v60 }
 0x188   : > { %v1367_v7 = vmul.f32 %v5784_v37, %v1232_v30 }
 0x189   : > { %v1210_v49 = vmax.f32 %v1082_v33, 0.0  ;;  %v1256_v10 = vmax.f32 %v1128_v0, 0.0 }
 0x18a   : > { %1493 = vadd.xlane.f32.xlu1 %v1330_v63  ;;  %1471 = vadd.xlane.f32.xlu0 %v1319_v1  ;;  %v1334_v63 = vmul.f32 %v5784_v37, %v1199_v58  ;;  %v1229_v1 = vmax.f32 %v1101_v54, 0.0  ;;  %v1202_v54 = vmax.f32 %v1074_v46, 0.0  ;;  %v1112_v58 = vadd.f32 %v6077_v44, %v894_v31 }
 0x18c   : > { %v1364_v9 = vmul.f32 %v5784_v37, %v1229_v1  ;;  %v1337_v61 = vmul.f32 %v5784_v37, %v1202_v54  ;;  %v887_v1 = vld [vmem:[%s7658_s29 + $0x248] sm:$0xff] }
 0x18e   : > { %1473 = vadd.xlane.f32.xlu0 %v1320_v11  ;;  %1551 = vadd.xlane.f32.xlu1 %v1359_v13  ;;  %v1102_v11 = vadd.f32 %v5871_v42, %v884_v4  ;;  %v863_v13 = vld [vmem:[%s7658_s29 + $0x188] sm:$0xff]  ;;  %v1105_v4 = vadd.f32 %v5871_v42, %v887_v1 }
 0x190   : > { %v1230_v24 = vmax.f32 %v1102_v11, 0.0  ;;  %v858_v11 = vld [vmem:[%s7658_s29 + $0x160] sm:$0xff] }
 0x192   : > { %1475 = vadd.xlane.f32.xlu0 %v1321_v25  ;;  %1495 = vadd.xlane.f32.xlu1 %v1331_v27  ;;  %v1081_v25 = vadd.f32 %v6036_v20, %v863_v13  ;;  %v1073_v27 = vadd.f32 %v5823_v6, %v855_v14  ;;  %v1365_v36 = vmul.f32 %v5784_v37, %v1230_v24  ;;  %v868_v13 = vld [vmem:[%s7658_s29 + $0x1b0] sm:$0xff]  ;;  %v1258_v24 = vmax.f32 %v1130_v5, 0.0 }
 0x193   : > { %v1076_v14 = vadd.f32 %v5823_v6, %v858_v11  ;;  %v1086_v16 = vadd.f32 %v6036_v20, %v868_v13  ;;  %v1079_v11 = vadd.f32 %v5823_v6, %v861_v2 }
 0x194   : > { %v1201_v39 = vmax.f32 %v1073_v27, 0.0  ;;  %v898_v27 = vld [vmem:[%s7658_s29 + $0x2a0] sm:$0xff]  ;;  %v1393_v34 = vmul.f32 %v5784_v37, %v1258_v24  ;;  %v891_v24 = vld [vmem:[%s7658_s29 + $0x268] sm:$0xff] }
 0x195   : > { %v1204_v28 = vmax.f32 %v1076_v14, 0.0  ;;  %v1214_v29 = vmax.f32 %v1086_v16, 0.0 }
 0x196   : > { %1477 = vadd.xlane.f32.xlu0 %v1322_v35  ;;  %1555 = vadd.xlane.f32.xlu1 %v1361_v38  ;;  %v1374_v35 = vmul.f32 %v5784_v37, %v1239_v23  ;;  %v1209_v38 = vmax.f32 %v1081_v25, 0.0  ;;  %v1336_v48 = vmul.f32 %v5784_v37, %v1201_v39  ;;  %v1233_v23 = vmax.f32 %v1105_v4, 0.0  ;;  %v888_v25 = vld [vmem:[%s7658_s29 + $0x250] sm:$0xff]  ;;  %v869_v39 = vld [vmem:[%s7658_s29 + $0x1b8] sm:$0xff] }
 0x197   : > { %v1349_v41 = vmul.f32 %v5784_v37, %v1214_v29 }
 0x198   : > { %v1368_v33 = vmul.f32 %v5784_v37, %v1233_v23 }
 0x19a   : > { %1479 = vadd.xlane.f32.xlu0 %v1323_v45  ;;  %1467 = vadd.xlane.f32.xlu1 %v1317_v47  ;;  %v1083_v45 = vadd.f32 %v6036_v20, %v865_v40  ;;  %v1344_v47 = vmul.f32 %v5784_v37, %v1209_v38  ;;  %v859_v38 = vld [vmem:[%s7658_s29 + $0x168] sm:$0xff]  ;;  %v1339_v40 = vmul.f32 %v5784_v37, %v1204_v28 }
 0x19b   : > { %v1077_v46 = vadd.f32 %v5823_v6, %v859_v38 }
 0x19c   : > { %v1211_v53 = vmax.f32 %v1083_v45, 0.0 }
 0x19d   : > { %v1205_v54 = vmax.f32 %v1077_v46, 0.0 }
 0x19e   : > { %1481 = vadd.xlane.f32.xlu0 %v1324_v55  ;;  %1469 = vadd.xlane.f32.xlu1 %v1318_v56  ;;  %v1345_v55 = vmul.f32 %v5784_v37, %v1210_v49  ;;  %v1366_v56 = vmul.f32 %v5784_v37, %v1231_v50  ;;  %v1346_v32 = vmul.f32 %v5784_v37, %v1211_v53  ;;  %v899_v49 = vld [vmem:[%s7658_s29 + $0x2a8] sm:$0xff] }
 0x19f   : > { %v1117_v51 = vadd.f32 %v6077_v44, %v899_v49  ;;  %v1340_v60 = vmul.f32 %v5784_v37, %v1205_v54 }
 0x1a1   : > { %v1245_v30 = vmax.f32 %v1117_v51, 0.0 }
 0x1a2   : > { %1483 = vadd.xlane.f32.xlu0 %v1325_v62  ;;  %1501 = vadd.xlane.f32.xlu1 %v1334_v63  ;;  %v1240_v62 = vmax.f32 %v1112_v58, 0.0  ;;  %v1075_v63 = vadd.f32 %v5823_v6, %v857_v59  ;;  %v1088_v59 = vadd.f32 %v6036_v20, %v870_v57 }
 0x1a3   : > { %v1380_v5 = vmul.f32 %v5784_v37, %v1245_v30 }
 0x1a4   : > { %v1216_v1 = vmax.f32 %v1088_v59, 0.0  ;;  %v902_v59 = vld [vmem:[%s7658_s29 + $0x2c0] sm:$0xff] }
 0x1a6   : > { %1485 = vadd.xlane.f32.xlu0 %v1326_v8  ;;  %1561 = vadd.xlane.f32.xlu1 %v1364_v9  ;;  %v1375_v8 = vmul.f32 %v5784_v37, %v1240_v62  ;;  %v1203_v9 = vmax.f32 %v1075_v63, 0.0  ;;  %v890_v62 = vld [vmem:[%s7658_s29 + $0x260] sm:$0xff]  ;;  %v900_v63 = vld [vmem:[%s7658_s29 + $0x2b0] sm:$0xff] }
 0x1aa   : > { %1579 = vadd.xlane.f32.xlu0 %v1373_v21  ;;  %1503 = vadd.xlane.f32.xlu1 %v1335_v22  ;;  %v1338_v21 = vmul.f32 %v5784_v37, %v1203_v9  ;;  %v1391_v22 = vmul.f32 %v5784_v37, %v1256_v10  ;;  %v871_v9 = vld [vmem:[%s7658_s29 + $0x1c8] sm:$0xff]  ;;  %v6183_v10 = vand.u32 127, %v947_v15  ;;  %v901_v15 = vld [vmem:[%s7658_s29 + $0x2b8] sm:$0xff] }
 0x1ab   : > { %v1089_v14 = vadd.f32 %v6036_v20, %v871_v9 }
 0x1ac   : > { %v1814_v13 = vadd.s32 4294967288, %v6183_v10  ;;  %v6201_v28 = vsub.s32 %v6183_v10, %v5739_v17  ;;  %v1863_v46 = vadd.s32 4294967232, %v6183_v10 }
 0x1ae   : > { %1581 = vadd.xlane.f32.xlu0 %v1374_v35  ;;  %1563 = vadd.xlane.f32.xlu1 %v1365_v36  ;;  %v1106_v35 = vadd.f32 %v5871_v42, %v888_v25  ;;  %v1116_v36 = vadd.f32 %v6077_v44, %v898_v27  ;;  %v1821_v25 = vadd.s32 4294967280, %v6183_v10  ;;  %v6207_v38 = vsub.s32 %v1814_v13, %v5739_v17 }
 0x1b0   : > { %v1234_v43 = vmax.f32 %v1106_v35, 0.0  ;;  %v1244_v45 = vmax.f32 %v1116_v36, 0.0 }
 0x1b2   : > { %1521 = vadd.xlane.f32.xlu0 %v1344_v47  ;;  %1505 = vadd.xlane.f32.xlu1 %v1336_v48  ;;  %v1087_v47 = vadd.f32 %v6036_v20, %v869_v39  ;;  %v889_v48 = vld [vmem:[%s7658_s29 + $0x258] sm:$0xff]  ;;  %v1369_v31 = vmul.f32 %v5784_v37, %v1234_v43  ;;  %v1379_v53 = vmul.f32 %v5784_v37, %v1244_v45  ;;  %v1842_v43 = vadd.s32 4294967256, %v6183_v10 }
 0x1b3   : > { %v1107_v50 = vadd.f32 %v5871_v42, %v889_v48  ;;  %v1119_v39 = vadd.f32 %v6077_v44, %v901_v15  ;;  %v895_v48 = vld [vmem:[%s7658_s29 + $0x288] sm:$0xff] }
 0x1b4   : > { %v1113_v30 = vadd.f32 %v6077_v44, %v895_v48  ;;  %v1884_v48 = vadd.s32 4294967208, %v6183_v10 }
 0x1b5   : > { %v1247_v57 = vmax.f32 %v1119_v39, 0.0 }
 0x1b6   : > { %1523 = vadd.xlane.f32.xlu0 %v1345_v55  ;;  %1565 = vadd.xlane.f32.xlu1 %v1366_v56  ;;  %v1215_v55 = vmax.f32 %v1087_v47, 0.0  ;;  %v860_v56 = vld [vmem:[%s7658_s29 + $0x170] sm:$0xff]  ;;  %v6221_v47 = vsub.s32 %v1821_v25, %v5739_v17 }
 0x1b7   : > { %v1078_v58 = vadd.f32 %v5823_v6, %v860_v56  ;;  %v1207_v6 = vmax.f32 %v1079_v11, 0.0  ;;  %v1382_v11 = vmul.f32 %v5784_v37, %v1247_v57  ;;  %v896_v25 = vld [vmem:[%s7658_s29 + $0x290] sm:$0xff]  ;;  %v1891_v57 = vadd.s32 4294967200, %v6183_v10 }
 0x1b9   : > { %v1206_v0 = vmax.f32 %v1078_v58, 0.0  ;;  %v1342_v45 = vmul.f32 %v5784_v37, %v1207_v6  ;;  %v1856_v6 = vadd.s32 4294967240, %v6183_v10 }
 0x1ba   : > { %1525 = vadd.xlane.f32.xlu0 %v1346_v32  ;;  %1507 = vadd.xlane.f32.xlu1 %v1337_v61  ;;  %v1350_v32 = vmul.f32 %v5784_v37, %v1215_v55  ;;  %v1235_v61 = vmax.f32 %v1107_v50, 0.0 }
 0x1bb   : > { %v1341_v16 = vmul.f32 %v5784_v37, %v1206_v0  ;;  %v1877_v0 = vadd.s32 4294967216, %v6183_v10 }
 0x1bc   : > { %v1370_v4 = vmul.f32 %v5784_v37, %v1235_v61  ;;  %v1870_v61 = vadd.s32 4294967224, %v6183_v10 }
 0x1bd   : > { %v6271_v15 = vsub.s32 %v1877_v0, %v5739_v17  ;;  %v874_v0 = vld [vmem:[%s7658_s29 + $0x1e0] sm:$0xff] }
 0x1be   : > { %1567 = vadd.xlane.f32.xlu1 %v1367_v7  ;;  %1583 = vadd.xlane.f32.xlu0 %v1375_v8  ;;  %v1108_v7 = vadd.f32 %v5871_v42, %v890_v62  ;;  %v1118_v8 = vadd.f32 %v6077_v44, %v900_v63  ;;  %v6247_v63 = vsub.s32 %v1863_v46, %v5739_v17 }
 0x1c0   : > { %v1246_v23 = vmax.f32 %v1118_v8, 0.0  ;;  %v1120_v8 = vadd.f32 %v6077_v44, %v902_v59 }
 0x1c2   : > { %1509 = vadd.xlane.f32.xlu1 %v1338_v21  ;;  %1615 = vadd.xlane.f32.xlu0 %v1391_v22  ;;  %v1351_v21 = vmul.f32 %v5784_v37, %v1216_v1  ;;  %v1236_v22 = vmax.f32 %v1108_v7, 0.0  ;;  %v1381_v36 = vmul.f32 %v5784_v37, %v1246_v23  ;;  %v1849_v7 = vadd.s32 4294967248, %v6183_v10  ;;  %v873_v23 = vld [vmem:[%s7658_s29 + $0x1d8] sm:$0xff] }
 0x1c4   : > { %v1371_v35 = vmul.f32 %v5784_v37, %v1236_v22  ;;  %v866_v22 = vld [vmem:[%s7658_s29 + $0x1a0] sm:$0xff] }
 0x1c6   : > { %1569 = vadd.xlane.f32.xlu1 %v1368_v33  ;;  %1619 = vadd.xlane.f32.xlu0 %v1393_v34  ;;  %v1217_v33 = vmax.f32 %v1089_v14, 0.0  ;;  %v1109_v34 = vadd.f32 %v5871_v42, %v891_v24  ;;  %v872_v42 = vld [vmem:[%s7658_s29 + $0x1d0] sm:$0xff] }
 0x1c7   : > { %v1090_v58 = vadd.f32 %v6036_v20, %v872_v42  ;;  %v903_v42 = vld [vmem:[%s7658_s29 + $0x2c8] sm:$0xff] }
 0x1c8   : > { %v1352_v51 = vmul.f32 %v5784_v37, %v1217_v33 }
 0x1c9   : > { %v1218_v14 = vmax.f32 %v1090_v58, 0.0  ;;  %v1121_v58 = vadd.f32 %v6077_v44, %v903_v42 }
 0x1ca   : > { %1511 = vadd.xlane.f32.xlu1 %v1339_v40  ;;  %1531 = vadd.xlane.f32.xlu0 %v1349_v41  ;;  %v862_v40 = vld [vmem:[%s7658_s29 + $0x180] sm:$0xff]  ;;  %v1835_v41 = vadd.s32 4294967264, %v6183_v10 }
 0x1cb   : > { %v1080_v54 = vadd.f32 %v6036_v20, %v862_v40  ;;  %v1353_v40 = vmul.f32 %v5784_v37, %v1218_v14  ;;  %v1249_v14 = vmax.f32 %v1121_v58, 0.0  ;;  %v875_v58 = vld [vmem:[%s7658_s29 + $0x1e8] sm:$0xff] }
 0x1ce   : > { %1571 = vadd.xlane.f32.xlu1 %v1369_v31  ;;  %1591 = vadd.xlane.f32.xlu0 %v1379_v53  ;;  %v1237_v31 = vmax.f32 %v1109_v34, 0.0  ;;  %v1828_v53 = vadd.s32 4294967272, %v6183_v10 }
 0x1d0   : > { %v6258_v13 = vsub.s32 %v1828_v53, %v5739_v17  ;;  %v6299_v53 = vsub.s32 %v1856_v6, %v5739_v17 }
 0x1d2   : > { %1513 = vadd.xlane.f32.xlu1 %v1340_v60  ;;  %1533 = vadd.xlane.f32.xlu0 %v1350_v32  ;;  %v6238_v60 = vsub.s32 %v1835_v41, %v5739_v17  ;;  %v6241_v32 = vsub.s32 %v1842_v43, %v5739_v17  ;;  %v1084_v41 = vadd.f32 %v6036_v20, %v866_v22  ;;  %v867_v22 = vld [vmem:[%s7658_s29 + $0x1a8] sm:$0xff] }
 0x1d3   : > { %v1091_v43 = vadd.f32 %v6036_v20, %v873_v23 }
 0x1d6   : > { %1573 = vadd.xlane.f32.xlu1 %v1370_v4  ;;  %1593 = vadd.xlane.f32.xlu0 %v1380_v5  ;;  %v1372_v4 = vmul.f32 %v5784_v37, %v1237_v31  ;;  %v1208_v5 = vmax.f32 %v1080_v54, 0.0 }
 0x1d8   : > { %v1343_v34 = vmul.f32 %v5784_v37, %v1208_v5  ;;  %v1898_v5 = vadd.s32 4294967192, %v6183_v10 }
 0x1da   : > { %1515 = vadd.xlane.f32.xlu1 %v1341_v16  ;;  %1535 = vadd.xlane.f32.xlu0 %v1351_v21  ;;  %v6261_v16 = vsub.s32 %v1870_v61, %v5739_v17  ;;  %v1241_v21 = vmax.f32 %v1113_v30, 0.0  ;;  %v1212_v30 = vmax.f32 %v1084_v41, 0.0 }
 0x1db   : > { %v6197_v27 = vpop.xlane.xlu1 %1431  ;;  %v1424_v29 = vpop.xlane.xlu0 %1423 }
 0x1dc   : > { %v1813_v55 = vrot.slane %v1424_v29, %v6201_v28  ;;  %v1376_v46 = vmul.f32 %v5784_v37, %v1241_v21  ;;  %v1092_v21 = vadd.f32 %v6036_v20, %v874_v0 }
 0x1de   : > { %1575 = vadd.xlane.f32.xlu1 %v1371_v35  ;;  %1595 = vadd.xlane.f32.xlu0 %v1381_v36  ;;  %v6281_v35 = vsub.s32 %v1849_v7, %v5739_v17  ;;  %v1248_v36 = vmax.f32 %v1120_v8, 0.0 }
 0x1df   : > { %v6226_v49 = vpop.xlane.xlu1 %1433  ;;  %v1426_v50 = vpop.xlane.xlu0 %1425 }
 0x1e0   : > { %v1818_v56 = vrot.slane %v1426_v50, %v6207_v38  ;;  %v1114_v50 = vadd.f32 %v6077_v44, %v896_v25  ;;  %v6327_v25 = vsub.s32 %v1891_v57, %v5739_v17  ;;  %v897_v57 = vld [vmem:[%s7658_s29 + $0x298] sm:$0xff] }
 0x1e2   : > { %v1820_v62 = vsel %vm1819_vm1, %v1818_v56, %v1813_v55  ;;  %1517 = vadd.xlane.f32.xlu1 %v1342_v45  ;;  %1537 = vadd.xlane.f32.xlu0 %v1352_v51  ;;  %v1839_v45 = vrot.slane %v6197_v27, %v6238_v60  ;;  %v1846_v51 = vrot.slane %v6226_v49, %v6241_v32  ;;  %v911_v49 = vld [vmem:[%s7658_s29 + $0x308] sm:$0xff] }
 0x1e3   : > { %v6250_v1 = vpop.xlane.xlu1 %1439  ;;  %v1428_v2 = vpop.xlane.xlu0 %1427  ;;  %v1383_v56 = vmul.f32 %v5784_v37, %v1248_v36  ;;  %v1129_v8 = vadd.f32 %v6090_v52, %v911_v49  ;;  %v6333_v36 = vsub.s32 %v1898_v5, %v5739_v17 }
 0x1e4   : > { %v1825_v9 = vrot.slane %v1428_v2, %v6221_v47  ;;  %v6314_v2 = vsub.s32 %v1884_v48, %v5739_v17 }
 0x1e5   : > { %v1257_v42 = vmax.f32 %v1129_v8, 0.0 }
 0x1e6   : > { %v1827_v24 = vsel %vm7648_vm2, %v1825_v9, %v1820_v62  ;;  %1577 = vadd.xlane.f32.xlu1 %v1372_v4  ;;  %1597 = vadd.xlane.f32.xlu0 %v1382_v11  ;;  %v1219_v62 = vmax.f32 %v1091_v43, 0.0  ;;  %v1242_v4 = vmax.f32 %v1114_v50, 0.0  ;;  %v6350_v50 = vld [vmem:[%s7630_s8] ss:$0 sm:$0xff] }
 0x1e7   : > { %v6277_v29 = vpop.xlane.xlu1 %1441  ;;  %v1430_v33 = vpop.xlane.xlu0 %1429 }
 0x1e8   : > { %v1832_v39 = vrot.slane %v1430_v33, %v6258_v13  ;;  %v1354_v6 = vmul.f32 %v5784_v37, %v1219_v62  ;;  %v1867_v33 = vrot.slane %v6250_v1, %v6247_v63  ;;  %v1874_v41 = vrot.slane %v6277_v29, %v6261_v16 }
 0x1e9   : > { %v1085_v1 = vadd.f32 %v6036_v20, %v867_v22  ;;  %v1384_v29 = vmul.f32 %v6350_v50, %v1249_v14  ;;  %v1093_v14 = vadd.f32 %v6036_v20, %v875_v58  ;;  %v905_v22 = vld [vmem:[%s7658_s29 + $0x2d8] sm:$0xff] }
 0x1ea   : > { %v1834_v31 = vsel %vm1833_vm3, %v1832_v39, %v1827_v24  ;;  %1519 = vadd.xlane.f32.xlu1 %v1343_v34  ;;  %1539 = vadd.xlane.f32.xlu0 %v1353_v40  ;;  %v1347_v24 = vmul.f32 %v5784_v37, %v1212_v30  ;;  %v1377_v34 = vmul.f32 %v5784_v37, %v1242_v4  ;;  %v1905_v39 = vadd.s32 4294967184, %v6183_v10  ;;  %v904_v40 = vld [vmem:[%s7658_s29 + $0x2d0] sm:$0xff] }
 0x1eb   : > { %v1841_v54 = vsel %vm1840_vm4, %v1839_v45, %v1834_v31  ;;  %v1444_v27 = vpop.xlane.xlu1 %1443  ;;  %v1436_v55 = vpop.xlane.xlu0 %1435  ;;  %v1213_v5 = vmax.f32 %v1085_v1, 0.0  ;;  %v1221_v1 = vmax.f32 %v1093_v14, 0.0 }
 0x1ec   : > { %v1848_v59 = vsel %vm1847_vm5, %v1846_v51, %v1841_v54  ;;  %v1853_v61 = vrot.slane %v1436_v55, %v6281_v35  ;;  %v1881_v37 = vrot.slane %v1444_v27, %v6271_v15  ;;  %v1220_v51 = vmax.f32 %v1092_v21, 0.0  ;;  %v913_v21 = vld [vmem:[%s7658_s29 + $0x318] sm:$0xff] }
 0x1ed   : > { %v1122_v27 = vadd.f32 %v6077_v44, %v904_v40  ;;  %v1123_v40 = vadd.f32 %v6077_v44, %v905_v22  ;;  %v922_v22 = vld [vmem:[%s7658_s29 + $0x360] sm:$0xff] }
 0x1ee   : > { %v1855_v7 = vsel %vm1854_vm6, %v1853_v61, %v1848_v59  ;;  %1585 = vadd.xlane.f32.xlu1 %v1376_v46  ;;  %1599 = vadd.xlane.f32.xlu0 %v1383_v56  ;;  %v1392_v59 = vmul.f32 %v6350_v50, %v1257_v42  ;;  %v6367_v61 = vsub.s32 %v1905_v39, %v5739_v17 }
 0x1ef   : > { %v1446_v9 = vpop.xlane.xlu1 %1445  ;;  %v1438_v11 = vpop.xlane.xlu0 %1437  ;;  %v1355_v4 = vmul.f32 %v6350_v50, %v1220_v51  ;;  %v1131_v39 = vadd.f32 %v6090_v52, %v913_v21  ;;  %v916_v21 = vld [vmem:[%s7658_s29 + $0x330] sm:$0xff] }
 0x1f0   : > { %v1860_v23 = vrot.slane %v1438_v11, %v6299_v53  ;;  %v1888_v31 = vrot.slane %v1446_v9, %v6314_v2  ;;  %v1250_v9 = vmax.f32 %v1122_v27, 0.0  ;;  %v1115_v11 = vadd.f32 %v6077_v44, %v897_v57 }
 0x1f1   : > { %v1356_v57 = vmul.f32 %v6350_v50, %v1221_v1 }
 0x1f2   : > { %v1862_v43 = vsel %vm1861_vm7, %v1860_v23, %v1855_v7  ;;  %1527 = vadd.xlane.f32.xlu1 %v1347_v24  ;;  %1541 = vadd.xlane.f32.xlu0 %v1354_v6  ;;  %v1912_v7 = vadd.s32 4294967176, %v6183_v10  ;;  %v1243_v42 = vmax.f32 %v1115_v11, 0.0 }
 0x1f3   : > { %v1869_v45 = vsel %vm1868_vm8, %v1867_v33, %v1862_v43  ;;  %v1448_v46 = vpop.xlane.xlu1 %1447  ;;  %v6345_v48 = vpop.xlane.xlu0 %1487  ;;  %v1348_v33 = vmul.f32 %v6350_v50, %v1213_v5  ;;  %v1385_v43 = vmul.f32 %v6350_v50, %v1250_v9 }
 0x1f4   : > { %v1876_v54 = vsel %vm1875_vm9, %v1874_v41, %v1869_v45  ;;  %v1895_v55 = vrot.slane %v1448_v46, %v6327_v25  ;;  %v876_v45 = vld [vmem:[%s7658_s29 + $0x1f0] sm:$0xff] }
 0x1f5   : > { %v1883_v56 = vsel %vm1882_vm10, %v1881_v37, %v1876_v54  ;;  %v914_v37 = vld [vmem:[%s7658_s29 + $0x320] sm:$0xff]  ;;  %v1251_v54 = vmax.f32 %v1123_v40, 0.0  ;;  %v1094_v58 = vadd.f32 %v6036_v20, %v876_v45  ;;  %v917_v45 = vld [vmem:[%s7658_s29 + $0x338] sm:$0xff] }
 0x1f6   : > { %v1890_v49 = vsel %vm1889_vm11, %v1888_v31, %v1883_v56  ;;  %1587 = vadd.xlane.f32.xlu1 %v1377_v34  ;;  %1601 = vadd.xlane.f32.xlu0 %v1384_v29  ;;  %v6388_v34 = vsub.s32 %v1912_v7, %v5739_v17  ;;  %v1259_v31 = vmax.f32 %v1131_v39, 0.0  ;;  %v1378_v56 = vmul.f32 %v6350_v50, %v1243_v42 }
 0x1f7   : > { %v1897_v30 = vsel %vm1896_vm12, %v1895_v55, %v1890_v49  ;;  %v1450_v62 = vpop.xlane.xlu1 %1449  ;;  %v6370_v0 = vpop.xlane.xlu0 %1491  ;;  %v1132_v55 = vadd.f32 %v6090_v52, %v914_v37  ;;  %v915_v49 = vld [vmem:[%s7658_s29 + $0x328] sm:$0xff]  ;;  %v1386_v11 = vmul.f32 %v6350_v50, %v1251_v54  ;;  %v1222_v14 = vmax.f32 %v1094_v58, 0.0 }
 0x1f8   : > { %v1902_v8 = vrot.slane %v1450_v62, %v6333_v36  ;;  %v1133_v7 = vadd.f32 %v6090_v52, %v915_v49  ;;  %v1394_v9 = vmul.f32 %v6350_v50, %v1259_v31  ;;  %v1140_v37 = vadd.f32 %v6090_v52, %v922_v22 }
 0x1f9   : > { %v1260_v5 = vmax.f32 %v1132_v55, 0.0  ;;  %v1357_v1 = vmul.f32 %v6350_v50, %v1222_v14 }
 0x1fa   : > { %v1904_v23 = vsel %vm1903_vm13, %v1902_v8, %v1897_v30  ;;  %1617 = vadd.xlane.f32.xlu1 %v1392_v59  ;;  %1543 = vadd.xlane.f32.xlu0 %v1355_v4  ;;  %v906_v59 = vld [vmem:[%s7658_s29 + $0x2e0] sm:$0xff]  ;;  %v1261_v39 = vmax.f32 %v1133_v7, 0.0 }
 0x1fb   : > { %v1452_v24 = vpop.xlane.xlu1 %1451  ;;  %v6384_v6 = vpop.xlane.xlu0 %1463  ;;  %v1124_v8 = vadd.f32 %v6077_v44, %v906_v59 }
 0x1fc   : > { %v1909_v41 = vrot.slane %v1452_v24, %v6367_v61 }
 0x1fd   : > { %v1252_v40 = vmax.f32 %v1124_v8, 0.0 }
 0x1fe   : > { %v1911_v46 = vsel %vm1910_vm14, %v1909_v41, %v1904_v23  ;;  %1529 = vadd.xlane.f32.xlu1 %v1348_v33  ;;  %1603 = vadd.xlane.f32.xlu0 %v1385_v43  ;;  %v1395_v33 = vmul.f32 %v6350_v50, %v1260_v5  ;;  %v1134_v41 = vadd.f32 %v6090_v52, %v916_v21  ;;  %v909_v5 = vld [vmem:[%s7658_s29 + $0x2f8] sm:$0xff] }
 0x1ff   : > { %v1454_v29 = vpop.xlane.xlu1 %1453  ;;  %v6401_v51 = vpop.xlane.xlu0 %1553  ;;  %v1387_v49 = vmul.f32 %v6350_v50, %v1252_v40 }
 0x200   : > { %v1916_v27 = vrot.slane %v1454_v29, %v6388_v34  ;;  %v991_v29 = vcombine.high %v6061_v18, %v6061_v18  ;;  %v1262_v59 = vmax.f32 %v1134_v41, 0.0  ;;  %v918_v18 = vld [vmem:[%s7658_s29 + $0x340] sm:$0xff] }
 0x201   : > { %v1136_v22 = vadd.f32 %v6090_v52, %v918_v18 }
 0x202   : > { %v6415_v30 = vsel %vm1917_vm15, %v1916_v27, %v1911_v46  ;;  %1589 = vadd.xlane.f32.xlu1 %v1378_v56  ;;  %1545 = vadd.xlane.f32.xlu0 %v1356_v57  ;;  %v923_v46 = vld [vmem:[%s7658_s29 + $0x368] sm:$0xff]  ;;  %v1396_v27 = vmul.f32 %v6350_v50, %v1261_v39  ;;  %v1135_v56 = vadd.f32 %v6090_v52, %v917_v45 }
 0x203   : > { %v1456_v62 = vpop.xlane.xlu1 %1455  ;;  %v6417_v4 = vpop.xlane.xlu0 %1465  ;;  %v1141_v57 = vadd.f32 %v6090_v52, %v923_v46  ;;  %v6460_v7 = vrot.slane %v991_v29, %v5754_v26  ;;  %v1397_v40 = vmul.f32 %v6350_v50, %v1262_v59  ;;  %v1264_v29 = vmax.f32 %v1136_v22, 0.0  ;;  %v928_v59 = vld [vmem:[%s7658_s29 + $0x390] sm:$0xff] }
 0x204   : > { %v1922_v43 = vrot.slane %v1456_v62, %v6201_v28  ;;  %v1268_v62 = vmax.f32 %v1140_v37, 0.0  ;;  %v1263_v14 = vmax.f32 %v1135_v56, 0.0 }
 0x205   : > { %v1269_v21 = vmax.f32 %v1141_v57, 0.0 }
 0x206   : > { %1621 = vadd.xlane.f32.xlu1 %v1394_v9  ;;  %1605 = vadd.xlane.f32.xlu0 %v1386_v11  ;;  %v1403_v41 = vmul.f32 %v6350_v50, %v1268_v62  ;;  %v1398_v56 = vmul.f32 %v6350_v50, %v1263_v14  ;;  %v1946_v62 = vrot.slane %v6417_v4, %v6241_v32  ;;  %v921_v4 = vld [vmem:[%s7658_s29 + $0x358] sm:$0xff] }
 0x207   : > { %v1458_v23 = vpop.xlane.xlu1 %1457  ;;  %v6429_v24 = vpop.xlane.xlu0 %1497 }
 0x208   : > { %v1926_v42 = vrot.slane %v1458_v23, %v6207_v38  ;;  %v1127_v23 = vadd.f32 %v6077_v44, %v909_v5 }
 0x20a   : > { %v1927_v31 = vsel %vm1819_vm1, %v1926_v42, %v1922_v43  ;;  %1623 = vadd.xlane.f32.xlu1 %v1395_v33  ;;  %1547 = vadd.xlane.f32.xlu0 %v1357_v1  ;;  %v2001_v33 = vrot.slane %v6345_v48, %v6201_v28  ;;  %v919_v43 = vld [vmem:[%s7658_s29 + $0x348] sm:$0xff]  ;;  %v2010_v1 = vrot.slane %v6370_v0, %v6221_v47  ;;  %v1255_v57 = vmax.f32 %v1127_v23, 0.0 }
 0x20b   : > { %v1460_v54 = vpop.xlane.xlu1 %1459  ;;  %v6446_v55 = vpop.xlane.xlu0 %1557  ;;  %v927_v42 = vld [vmem:[%s7658_s29 + $0x388] sm:$0xff]  ;;  %v1404_v0 = vmul.f32 %v6350_v50, %v1269_v21 }
 0x20c   : > { %v1931_v58 = vrot.slane %v1460_v54, %v6221_v47  ;;  %v1145_v54 = vadd.f32 %v6460_v7, %v927_v42  ;;  %v1390_v23 = vmul.f32 %v6350_v50, %v1255_v57  ;;  %v930_v57 = vld [vmem:[%s7658_s29 + $0x3a0] sm:$0xff] }
 0x20e   : > { %v1932_v8 = vsel %vm7648_vm2, %v1931_v58, %v1927_v31  ;;  %1625 = vadd.xlane.f32.xlu1 %v1396_v27  ;;  %1607 = vadd.xlane.f32.xlu0 %v1387_v49  ;;  %v1137_v31 = vadd.f32 %v6090_v52, %v919_v43  ;;  %v1941_v58 = vrot.slane %v6384_v6, %v6238_v60  ;;  %v920_v49 = vld [vmem:[%s7658_s29 + $0x350] sm:$0xff]  ;;  %v1273_v22 = vmax.f32 %v1145_v54, 0.0 }
 0x20f   : > { %v1490_v9 = vpop.xlane.xlu1 %1489  ;;  %v6463_v11 = vpop.xlane.xlu0 %1499  ;;  %v1399_v6 = vmul.f32 %v6350_v50, %v1264_v29  ;;  %v2163_v29 = vrot.slane %v6401_v51, %v6207_v38 }
 0x210   : > { %v2005_v39 = vrot.slane %v1490_v9, %v6207_v38  ;;  %v1265_v21 = vmax.f32 %v1137_v31, 0.0 }
 0x212   : > { %v2006_v37 = vsel %vm1819_vm1, %v2005_v39, %v2001_v33  ;;  %1627 = vadd.xlane.f32.xlu1 %v1397_v40  ;;  %1639 = vadd.xlane.f32.xlu0 %v1403_v41  ;;  %v1138_v33 = vadd.f32 %v6090_v52, %v920_v49  ;;  %v1146_v39 = vadd.f32 %v6460_v7, %v928_v59 }
 0x213   : > { %v1462_v48 = vpop.xlane.xlu1 %1461  ;;  %v6481_v45 = vpop.xlane.xlu0 %1559  ;;  %v2011_v46 = vsel %vm7648_vm2, %v2010_v1, %v2006_v37  ;;  %v1400_v42 = vmul.f32 %v6350_v50, %v1265_v21  ;;  %v1408_v1 = vmul.f32 %v6350_v50, %v1273_v22  ;;  %v1139_v37 = vadd.f32 %v6090_v52, %v921_v4 }
 0x214   : > { %v1936_v27 = vrot.slane %v1462_v48, %v6258_v13  ;;  %v1266_v54 = vmax.f32 %v1138_v33, 0.0  ;;  %v1148_v22 = vadd.f32 %v6460_v7, %v930_v57  ;;  %v2025_v33 = vrot.slane %v6429_v24, %v6241_v32 }
 0x215   : > { %v1267_v59 = vmax.f32 %v1139_v37, 0.0 }
 0x216   : > { %v1937_v18 = vsel %vm1833_vm3, %v1936_v27, %v1932_v8  ;;  %1629 = vadd.xlane.f32.xlu1 %v1398_v56  ;;  %1641 = vadd.xlane.f32.xlu0 %v1404_v0  ;;  %v929_v8 = vld [vmem:[%s7658_s29 + $0x398] sm:$0xff]  ;;  %v1274_v27 = vmax.f32 %v1146_v39, 0.0  ;;  %v2030_v39 = vrot.slane %v6463_v11, %v6281_v35 }
 0x217   : > { %v1942_v5 = vsel %vm1840_vm4, %v1941_v58, %v1937_v18  ;;  %v1494_v9 = vpop.xlane.xlu1 %1493  ;;  %v6501_v14 = vpop.xlane.xlu0 %1471  ;;  %v1147_v48 = vadd.f32 %v6460_v7, %v929_v8  ;;  %v877_v56 = vld [vmem:[%s7658_s29 + $0x1f8] sm:$0xff]  ;;  %v1402_v37 = vmul.f32 %v6350_v50, %v1267_v59  ;;  %v924_v59 = vld [vmem:[%s7658_s29 + $0x370] sm:$0xff] }
 0x218   : > { %v6514_v40 = vsel %vm1847_vm5, %v1946_v62, %v1942_v5  ;;  %v2015_v0 = vrot.slane %v1494_v9, %v6258_v13  ;;  %v1095_v18 = vadd.f32 %v6036_v20, %v877_v56  ;;  %v907_v5 = vld [vmem:[%s7658_s29 + $0x2e8] sm:$0xff]  ;;  %v1409_v21 = vmul.f32 %v6350_v50, %v1274_v27  ;;  %v932_v56 = vld [vmem:[%s7658_s29 + $0x3b0] sm:$0xff] }
 0x219   : > { %v1275_v62 = vmax.f32 %v1147_v48, 0.0  ;;  %v1125_v8 = vadd.f32 %v6077_v44, %v907_v5  ;;  %v2173_v27 = vrot.slane %v6446_v55, %v6258_v13 }
 0x21a   : > { %1631 = vadd.xlane.f32.xlu1 %v1399_v6  ;;  %1613 = vadd.xlane.f32.xlu0 %v1390_v23  ;;  %v1401_v6 = vmul.f32 %v6350_v50, %v1266_v54  ;;  %v931_v23 = vld [vmem:[%s7658_s29 + $0x3a8] sm:$0xff]  ;;  %v2016_v20 = vsel %vm1833_vm3, %v2015_v0, %v2011_v46  ;;  %v1223_v48 = vmax.f32 %v1095_v18, 0.0  ;;  %v908_v54 = vld [vmem:[%s7658_s29 + $0x2f0] sm:$0xff]  ;;  %v2178_v0 = vrot.slane %v6481_v45, %v6238_v60  ;;  %v933_v45 = vld [vmem:[%s7658_s29 + $0x3b8] sm:$0xff] }
 0x21b   : > { %v6516_v41 = vpop.xlane.xlu0 %1473  ;;  %v1552_v43 = vpop.xlane.xlu1 %1551  ;;  %v1149_v24 = vadd.f32 %v6460_v7, %v931_v23  ;;  %v1410_v11 = vmul.f32 %v6350_v50, %v1275_v62 }
 0x21c   : > { %v2159_v31 = vrot.slane %v1552_v43, %v6201_v28  ;;  %v1358_v5 = vmul.f32 %v6350_v50, %v1223_v48 }
 0x21e   : > { %v2164_v58 = vsel %vm1819_vm1, %v2163_v29, %v2159_v31  ;;  %1633 = vadd.xlane.f32.xlu1 %v1400_v42  ;;  %1649 = vadd.xlane.f32.xlu0 %v1408_v1  ;;  %v1276_v29 = vmax.f32 %v1148_v22, 0.0  ;;  %v1150_v22 = vadd.f32 %v6460_v7, %v932_v56 }
 0x21f   : > { %v6533_v49 = vpop.xlane.xlu0 %1475  ;;  %v1496_v51 = vpop.xlane.xlu1 %1495 }
 0x220   : > { %v2020_v9 = vrot.slane %v1496_v51, %v6238_v60  ;;  %v1253_v51 = vmax.f32 %v1125_v8, 0.0 }
 0x222   : > { %v2021_v4 = vsel %vm1840_vm4, %v2020_v9, %v2016_v20  ;;  %1635 = vadd.xlane.f32.xlu1 %v1401_v6  ;;  %1651 = vadd.xlane.f32.xlu0 %v1409_v21  ;;  %v1277_v9 = vmax.f32 %v1149_v24, 0.0  ;;  %v1126_v6 = vadd.f32 %v6077_v44, %v908_v54  ;;  %v1411_v21 = vmul.f32 %v6350_v50, %v1276_v29 }
 0x223   : > { %v2026_v43 = vsel %vm1847_vm5, %v2025_v33, %v2021_v4  ;;  %v6554_v42 = vpop.xlane.xlu0 %1477  ;;  %v1556_v1 = vpop.xlane.xlu1 %1555  ;;  %v1142_v33 = vadd.f32 %v6090_v52, %v924_v59  ;;  %v1151_v44 = vadd.f32 %v6460_v7, %v933_v45  ;;  %v1388_v48 = vmul.f32 %v6350_v50, %v1253_v51  ;;  %v925_v51 = vld [vmem:[%s7658_s29 + $0x378] sm:$0xff] }
 0x224   : > { %v2168_v46 = vrot.slane %v1556_v1, %v6221_v47  ;;  %v6561_v31 = vsel %vm1854_vm6, %v2030_v39, %v2026_v43  ;;  %v934_v39 = vld [vmem:[%s7658_s29 + $0x3c0] sm:$0xff]  ;;  %v1254_v43 = vmax.f32 %v1126_v6, 0.0  ;;  %v1278_v24 = vmax.f32 %v1150_v22, 0.0 }
 0x225   : > { %v926_v1 = vld [vmem:[%s7658_s29 + $0x380] sm:$0xff]  ;;  %v1270_v29 = vmax.f32 %v1142_v33, 0.0  ;;  %v1152_v54 = vadd.f32 %v6460_v7, %v934_v39  ;;  %v1143_v33 = vadd.f32 %v6090_v52, %v925_v51 }
 0x226   : > { %v2169_v57 = vsel %vm7648_vm2, %v2168_v46, %v2164_v58  ;;  %1637 = vadd.xlane.f32.xlu1 %v1402_v37  ;;  %1653 = vadd.xlane.f32.xlu0 %v1410_v11  ;;  %v935_v46 = vld [vmem:[%s7658_s29 + $0x3c8] sm:$0xff]  ;;  %v1961_v11 = vrot.slane %v6501_v14, %v6247_v63  ;;  %v1971_v14 = vrot.slane %v6533_v49, %v6271_v15 }
 0x227   : > { %v2174_v62 = vsel %vm1833_vm3, %v2173_v27, %v2169_v57  ;;  %v1480_v18 = vpop.xlane.xlu0 %1479  ;;  %v1468_v55 = vpop.xlane.xlu1 %1467  ;;  %v1966_v27 = vrot.slane %v6516_v41, %v6261_v16  ;;  %v1144_v57 = vadd.f32 %v6460_v7, %v926_v1  ;;  %v1389_v41 = vmul.f32 %v6350_v50, %v1254_v43 }
 0x228   : > { %v1951_v58 = vrot.slane %v1468_v55, %v6281_v35  ;;  %v2179_v23 = vsel %vm1840_vm4, %v2178_v0, %v2174_v62  ;;  %v1279_v0 = vmax.f32 %v1151_v44, 0.0  ;;  %v1405_v22 = vmul.f32 %v6350_v50, %v1270_v29 }
 0x229   : > { %v1280_v39 = vmax.f32 %v1152_v54, 0.0  ;;  %v1271_v51 = vmax.f32 %v1143_v33, 0.0 }
 0x22a   : > { %v1952_v20 = vsel %vm1854_vm6, %v1951_v58, %v6514_v40  ;;  %1549 = vadd.xlane.f32.xlu1 %v1358_v5  ;;  %1655 = vadd.xlane.f32.xlu0 %v1411_v21  ;;  %v1412_v40 = vmul.f32 %v6350_v50, %v1277_v9  ;;  %v1153_v5 = vadd.f32 %v6460_v7, %v935_v46  ;;  %v937_v46 = vld [vmem:[%s7658_s29 + $0x3d8] sm:$0xff] }
 0x22b   : > { %v1482_v4 = vpop.xlane.xlu0 %1481  ;;  %v1470_v8 = vpop.xlane.xlu1 %1469  ;;  %v1976_v9 = vrot.slane %v6554_v42, %v6314_v2  ;;  %v1413_v58 = vmul.f32 %v6350_v50, %v1278_v24  ;;  %v1981_v21 = vrot.slane %v1480_v18, %v6327_v25  ;;  %v936_v24 = vld [vmem:[%s7658_s29 + $0x3d0] sm:$0xff] }
 0x22c   : > { %v1956_v37 = vrot.slane %v1470_v8, %v6299_v53 }
 0x22e   : > { %v1957_v56 = vsel %vm1861_vm7, %v1956_v37, %v1952_v20  ;;  %1609 = vadd.xlane.f32.xlu1 %v1388_v48  ;;  %1657 = vadd.xlane.f32.xlu0 %v1412_v40  ;;  %v1986_v20 = vrot.slane %v1482_v4, %v6333_v36  ;;  %v1414_v37 = vmul.f32 %v6350_v50, %v1279_v0  ;;  %v1272_v48 = vmax.f32 %v1144_v57, 0.0 }
 0x22f   : > { %v1962_v59 = vsel %vm1868_vm8, %v1961_v11, %v1957_v56  ;;  %v1484_v62 = vpop.xlane.xlu0 %1483  ;;  %v1502_v55 = vpop.xlane.xlu1 %1501  ;;  %v1415_v0 = vmul.f32 %v6350_v50, %v1280_v39  ;;  %v1281_v57 = vmax.f32 %v1153_v5, 0.0 }
 0x230   : > { %v1967_v6 = vsel %vm1875_vm9, %v1966_v27, %v1962_v59  ;;  %v2035_v45 = vrot.slane %v1502_v55, %v6299_v53  ;;  %v1991_v18 = vrot.slane %v1484_v62, %v6367_v61  ;;  %v1407_v59 = vmul.f32 %v6350_v50, %v1272_v48  ;;  %v938_v55 = vld [vmem:[%s7658_s29 + $0x3e0] sm:$0xff] }
 0x231   : > { %v1972_v49 = vsel %vm1882_vm10, %v1971_v14, %v1967_v6  ;;  %v1154_v62 = vadd.f32 %v6460_v7, %v936_v24  ;;  %v1416_v6 = vmul.f32 %v6350_v50, %v1281_v57 }
 0x232   : > { %v1977_v44 = vsel %vm1889_vm11, %v1976_v9, %v1972_v49  ;;  %v2036_v42 = vsel %vm1861_vm7, %v2035_v45, %v6561_v31  ;;  %1611 = vadd.xlane.f32.xlu1 %v1389_v41  ;;  %1659 = vadd.xlane.f32.xlu0 %v1413_v58  ;;  %v1156_v58 = vadd.f32 %v6460_v7, %v938_v55 }
 0x233   : > { %v1982_v8 = vsel %vm1896_vm12, %v1981_v21, %v1977_v44  ;;  %v1486_v43 = vpop.xlane.xlu0 %1485  ;;  %v1562_v1 = vpop.xlane.xlu1 %1561  ;;  %v1406_v49 = vmul.f32 %v6350_v50, %v1271_v51  ;;  %v941_v44 = vld [vmem:[%s7658_s29 + $0x3f8] sm:$0xff] }
 0x234   : > { %v1987_v52 = vsel %vm1903_vm13, %v1986_v20, %v1982_v8  ;;  %v1996_v4 = vrot.slane %v1486_v43, %v6388_v34  ;;  %v2183_v40 = vrot.slane %v1562_v1, %v6241_v32  ;;  %v940_v20 = vld [vmem:[%s7658_s29 + $0x3f0] sm:$0xff]  ;;  %v1284_v43 = vmax.f32 %v1156_v58, 0.0 }
 0x235   : > { %v1992_v31 = vsel %vm1910_vm14, %v1991_v18, %v1987_v52  ;;  %v1158_v1 = vadd.f32 %v6460_v7, %v940_v20 }
 0x236   : > { %v1997_v11 = vsel %vm1917_vm15, %v1996_v4, %v1992_v31  ;;  %v2184_v29 = vsel %vm1847_vm5, %v2183_v40, %v2179_v23  ;;  %1643 = vadd.xlane.f32.xlu1 %v1405_v22  ;;  %1661 = vadd.xlane.f32.xlu0 %v1414_v37  ;;  %v1155_v23 = vadd.f32 %v6460_v7, %v937_v46  ;;  %v1282_v22 = vmax.f32 %v1154_v62, 0.0 }
 0x237   : > { %v6648_v54 = vsel %vm7646_vm0, %v1997_v11, %v6415_v30  ;;  %v6650_v27 = vpop.xlane.xlu0 %1579  ;;  %v1504_v56 = vpop.xlane.xlu1 %1503  ;;  %v939_v30 = vld [vmem:[%s7658_s29 + $0x3e8] sm:$0xff]  ;;  %v1159_v4 = vadd.f32 %v6460_v7, %v941_v44  ;;  %v1286_v46 = vmax.f32 %v1158_v1, 0.0  ;;  %vm7647_vm0 = vcmask 1042434  }
 0x238   : > { %v2040_v14 = vrot.slane %v1504_v56, %v6247_v63  ;;  %v1157_v45 = vadd.f32 %v6460_v7, %v939_v30  ;;  %v1283_v33 = vmax.f32 %v1155_v23, 0.0  ;;  %v1417_v48 = vmul.f32 %v6350_v50, %v1282_v22 }
 0x239   : > { %v1419_v56 = vmul.f32 %v6350_v50, %v1284_v43 }
 0x23a   : > { %v2041_v41 = vsel %vm1868_vm8, %v2040_v14, %v2036_v42  ;;  %1663 = vadd.xlane.f32.xlu0 %v1415_v0  ;;  %1647 = vadd.xlane.f32.xlu1 %v1407_v59  ;;  %v1285_v18 = vmax.f32 %v1157_v45, 0.0  ;;  %v1418_v52 = vmul.f32 %v6350_v50, %v1283_v33  ;;  %v1287_v0 = vmax.f32 %v1159_v4, 0.0 }
 0x23b   : > { %v6664_v5 = vpop.xlane.xlu0 %1581  ;;  %v1564_v9 = vpop.xlane.xlu1 %1563  ;;  %v1421_v59 = vmul.f32 %v6350_v50, %v1286_v46 }
 0x23c   : > { %v2188_v21 = vrot.slane %v1564_v9, %v6281_v35  ;;  %v1422_v62 = vmul.f32 %v6350_v50, %v1287_v0 }
 0x23e   : > { %v2189_v42 = vsel %vm1854_vm6, %v2188_v21, %v2184_v29  ;;  %1665 = vadd.xlane.f32.xlu0 %v1416_v6  ;;  %1645 = vadd.xlane.f32.xlu1 %v1406_v49  ;;  %v1420_v29 = vmul.f32 %v6350_v50, %v1285_v18 }
 0x23f   : > { %v6678_v39 = vpop.xlane.xlu0 %1521  ;;  %v1506_v8 = vpop.xlane.xlu1 %1505 }
 0x240   : > { %v2045_v37 = vrot.slane %v1506_v8, %v6261_v16 }
 0x242   : > { %v2046_v40 = vsel %vm1875_vm9, %v2045_v37, %v2041_v41  ;;  %1667 = vadd.xlane.f32.xlu0 %v1417_v48  ;;  %1669 = vadd.xlane.f32.xlu1 %v1418_v52 }
 0x243   : > { %v6686_v31 = vpop.xlane.xlu0 %1523  ;;  %v1566_v24 = vpop.xlane.xlu1 %1565 }
 0x244   : > { %v2193_v11 = vrot.slane %v1566_v24, %v6299_v53 }
 0x246   : > { %v2194_v57 = vsel %vm1861_vm7, %v2193_v11, %v2189_v42  ;;  %1673 = vadd.xlane.f32.xlu0 %v1420_v29  ;;  %1671 = vadd.xlane.f32.xlu1 %v1419_v56 }
 0x247   : > { %v6692_v7 = vpop.xlane.xlu0 %1525  ;;  %v1508_v51 = vpop.xlane.xlu1 %1507 }
 0x248   : > { %v2050_v14 = vrot.slane %v1508_v51, %v6271_v15 }
 0x24a   : > { %v2051_v23 = vsel %vm1882_vm10, %v2050_v14, %v2046_v40  ;;  %1675 = vadd.xlane.f32.xlu0 %v1421_v59  ;;  %1677 = vadd.xlane.f32.xlu1 %v1422_v62 }
 0x24b   : > { %v1568_v30 = vpop.xlane.xlu1 %1567  ;;  %v6698_v55 = vpop.xlane.xlu0 %1583 }
 0x24c   : > { %v2198_v41 = vrot.slane %v1568_v30, %v6247_v63 }
 0x24e   : > { %v2199_v9 = vsel %vm1868_vm8, %v2198_v41, %v2194_v57 }
 0x24f   : > { %v1510_v6 = vpop.xlane.xlu1 %1509  ;;  %v6702_v45 = vpop.xlane.xlu0 %1615 }
 0x250   : > { %v2055_v58 = vrot.slane %v1510_v6, %v6314_v2 }
 0x252   : > { %v2056_v21 = vsel %vm1889_vm11, %v2055_v58, %v2051_v23 }
 0x253   : > { %v1570_v49 = vpop.xlane.xlu1 %1569  ;;  %v6706_v50 = vpop.xlane.xlu0 %1619 }
 0x254   : > { %v2203_v22 = vrot.slane %v1570_v49, %v6261_v16 }
 0x256   : > { %v2204_v33 = vsel %vm1875_vm9, %v2203_v22, %v2199_v9 }
 0x257   : > { %v1512_v20 = vpop.xlane.xlu1 %1511  ;;  %v6710_v44 = vpop.xlane.xlu0 %1531 }
 0x258   : > { %v2060_v42 = vrot.slane %v1512_v20, %v6327_v25  ;;  %v2233_v20 = vrot.slane %v6664_v5, %v6388_v34  ;;  %v2094_v5 = vrot.slane %v6692_v7, %v6258_v13 }
 0x25a   : > { %v2061_v8 = vsel %vm1896_vm12, %v2060_v42, %v2056_v21 }
 0x25b   : > { %v1572_v18 = vpop.xlane.xlu1 %1571  ;;  %v6714_v43 = vpop.xlane.xlu0 %1591 }
 0x25c   : > { %v2208_v1 = vrot.slane %v1572_v18, %v6271_v15 }
 0x25e   : > { %v2209_v37 = vsel %vm1882_vm10, %v2208_v1, %v2204_v33  ;;  %v2228_v33 = vrot.slane %v6650_v27, %v6367_v61  ;;  %v2089_v27 = vrot.slane %v6686_v31, %v6221_v47 }
 0x25f   : > { %v1514_v48 = vpop.xlane.xlu1 %1513  ;;  %v6718_v52 = vpop.xlane.xlu0 %1533 }
 0x260   : > { %v2065_v4 = vrot.slane %v1514_v48, %v6333_v36 }
 0x262   : > { %v2066_v40 = vsel %vm1903_vm13, %v2065_v4, %v2061_v8 }
 0x263   : > { %v1574_v24 = vpop.xlane.xlu1 %1573  ;;  %v6722_v46 = vpop.xlane.xlu0 %1593 }
 0x264   : > { %v2213_v11 = vrot.slane %v1574_v24, %v6314_v2 }
 0x266   : > { %v2214_v29 = vsel %vm1889_vm11, %v2213_v11, %v2209_v37 }
 0x267   : > { %v1516_v56 = vpop.xlane.xlu1 %1515  ;;  %v6726_v0 = vpop.xlane.xlu0 %1535 }
 0x268   : > { %v2070_v57 = vrot.slane %v1516_v56, %v6367_v61 }
 0x26a   : > { %v2071_v51 = vsel %vm1910_vm14, %v2070_v57, %v2066_v40 }
 0x26b   : > { %v1576_v14 = vpop.xlane.xlu1 %1575  ;;  %v6730_v59 = vpop.xlane.xlu0 %1595 }
 0x26c   : > { %v2218_v62 = vrot.slane %v1576_v14, %v6327_v25 }
 0x26e   : > { %v2219_v23 = vsel %vm1896_vm12, %v2218_v62, %v2214_v29 }
 0x26f   : > { %v1518_v30 = vpop.xlane.xlu1 %1517  ;;  %v6734_v41 = vpop.xlane.xlu0 %1537 }
 0x270   : > { %v2075_v9 = vrot.slane %v1518_v30, %v6388_v34 }
 0x272   : > { %v2076_v6 = vsel %vm1917_vm15, %v2075_v9, %v2071_v51 }
 0x273   : > { %v6740_v58 = vsel %vm7647_vm0, %v2076_v6, %v6648_v54  ;;  %v1578_v21 = vpop.xlane.xlu1 %1577  ;;  %v6742_v49 = vpop.xlane.xlu0 %1597  ;;  %v2084_v54 = vrot.slane %v6678_v39, %v6207_v38  ;;  %v2238_v39 = vrot.slane %v6698_v55, %v6201_v28  ;;  %vm7651_vm0 = vcmask 1043459  }
 0x274   : > { %v2223_v22 = vrot.slane %v1578_v21, %v6333_v36  ;;  %v2317_v21 = vrot.slane %v6702_v45, %v6201_v28  ;;  %v2114_v45 = vrot.slane %v6718_v52, %v6299_v53 }
 0x276   : > { %v2224_v42 = vsel %vm1903_vm13, %v2223_v22, %v2219_v23 }
 0x277   : > { %v2229_v8 = vsel %vm1910_vm14, %v2228_v33, %v2224_v42  ;;  %v1520_v18 = vpop.xlane.xlu1 %1519  ;;  %v1540_v1 = vpop.xlane.xlu0 %1539  ;;  %v2326_v33 = vrot.slane %v6706_v50, %v6221_v47  ;;  %v2119_v50 = vrot.slane %v6726_v0, %v6247_v63  ;;  %v2262_v0 = vrot.slane %v6722_v46, %v6241_v32 }
 0x278   : > { %v6754_v37 = vsel %vm1917_vm15, %v2233_v20, %v2229_v8  ;;  %v2080_v48 = vrot.slane %v1520_v18, %v6201_v28  ;;  %v2129_v52 = vrot.slane %v1540_v1, %v6271_v15  ;;  %v2272_v46 = vrot.slane %v6742_v49, %v6299_v53 }
 0x27a   : > { %v2085_v4 = vsel %vm1819_vm1, %v2084_v54, %v2080_v48  ;;  %v2109_v48 = vrot.slane %v6710_v44, %v6281_v35  ;;  %v2257_v44 = vrot.slane %v6714_v43, %v6238_v60 }
 0x27b   : > { %v2090_v40 = vsel %vm7648_vm2, %v2089_v27, %v2085_v4  ;;  %v1586_v24 = vpop.xlane.xlu1 %1585  ;;  %v1600_v11 = vpop.xlane.xlu0 %1599 }
 0x27c   : > { %v2242_v29 = vrot.slane %v1586_v24, %v6207_v38  ;;  %v2095_v56 = vsel %vm1833_vm3, %v2094_v5, %v2090_v40  ;;  %v2124_v24 = vrot.slane %v6734_v41, %v6261_v16 }
 0x27e   : > { %v2243_v57 = vsel %vm1819_vm1, %v2242_v29, %v2238_v39 }
 0x27f   : > { %v1528_v51 = vpop.xlane.xlu1 %1527  ;;  %v1542_v31 = vpop.xlane.xlu0 %1541 }
 0x280   : > { %v2099_v14 = vrot.slane %v1528_v51, %v6238_v60 }
 0x282   : > { %v2100_v7 = vsel %vm1840_vm4, %v2099_v14, %v2095_v56  ;;  %v2267_v14 = vrot.slane %v6730_v59, %v6281_v35 }
 0x283   : > { %v1588_v62 = vpop.xlane.xlu1 %1587  ;;  %v1602_v23 = vpop.xlane.xlu0 %1601 }
 0x284   : > { %v2247_v30 = vrot.slane %v1588_v62, %v6221_v47 }
 0x286   : > { %v2248_v9 = vsel %vm7648_vm2, %v2247_v30, %v2243_v57  ;;  %v2134_v57 = vrot.slane %v1542_v31, %v6314_v2 }
 0x287   : > { %v1618_v6 = vpop.xlane.xlu1 %1617  ;;  %v1544_v55 = vpop.xlane.xlu0 %1543 }
 0x288   : > { %v2321_v22 = vrot.slane %v1618_v6, %v6207_v38 }
 0x28a   : > { %v2322_v20 = vsel %vm1819_vm1, %v2321_v22, %v2317_v21  ;;  %v2277_v21 = vrot.slane %v1600_v11, %v6247_v63  ;;  %v2282_v22 = vrot.slane %v1602_v23, %v6261_v16 }
 0x28b   : > { %v1530_v42 = vpop.xlane.xlu1 %1529  ;;  %v1604_v8 = vpop.xlane.xlu0 %1603  ;;  %v6779_v18 = vsel %vm7648_vm2, %v2326_v33, %v2322_v20  ;;  %vm7649_vm2 = vcmask 1044484  }
 0x28c   : > { %v2104_v54 = vrot.slane %v1530_v42, %v6241_v32  ;;  %v2287_v49 = vrot.slane %v1604_v8, %v6271_v15 }
 0x28e   : > { %v2105_v27 = vsel %vm1847_vm5, %v2104_v54, %v2100_v7  ;;  %v2139_v7 = vrot.slane %v1544_v55, %v6327_v25 }
 0x28f   : > { %v2110_v5 = vsel %vm1854_vm6, %v2109_v48, %v2105_v27  ;;  %v1590_v4 = vpop.xlane.xlu1 %1589  ;;  %v1546_v40 = vpop.xlane.xlu0 %1545 }
 0x290   : > { %v2115_v39 = vsel %vm1861_vm7, %v2114_v45, %v2110_v5  ;;  %v2252_v29 = vrot.slane %v1590_v4, %v6258_v13  ;;  %v2144_v6 = vrot.slane %v1546_v40, %v6333_v36 }
 0x291   : > { %v2120_v56 = vsel %vm1868_vm8, %v2119_v50, %v2115_v39 }
 0x292   : > { %v2253_v51 = vsel %vm1833_vm3, %v2252_v29, %v2248_v9  ;;  %v2125_v41 = vsel %vm1875_vm9, %v2124_v24, %v2120_v56 }
 0x293   : > { %v2258_v43 = vsel %vm1840_vm4, %v2257_v44, %v2253_v51  ;;  %v2130_v1 = vsel %vm1882_vm10, %v2129_v52, %v2125_v41  ;;  %v1622_v62 = vpop.xlane.xlu1 %1621  ;;  %v1606_v30 = vpop.xlane.xlu0 %1605 }
 0x294   : > { %v2263_v31 = vsel %vm1847_vm5, %v2262_v0, %v2258_v43  ;;  %v2135_v9 = vsel %vm1889_vm11, %v2134_v57, %v2130_v1  ;;  %v2331_v43 = vrot.slane %v1622_v62, %v6258_v13 }
 0x295   : > { %v2268_v59 = vsel %vm1854_vm6, %v2267_v14, %v2263_v31  ;;  %v2140_v55 = vsel %vm1896_vm12, %v2139_v7, %v2135_v9 }
 0x296   : > { %v2145_v33 = vsel %vm1903_vm13, %v2144_v6, %v2140_v55  ;;  %v2273_v20 = vsel %vm1861_vm7, %v2272_v46, %v2268_v59 }
 0x297   : > { %v2278_v42 = vsel %vm1868_vm8, %v2277_v21, %v2273_v20  ;;  %v1624_v54 = vpop.xlane.xlu1 %1623  ;;  %v1548_v48 = vpop.xlane.xlu0 %1547  ;;  %v2332_v20 = vsel %vm1833_vm3, %v2331_v43, %v6779_v18 }
 0x298   : > { %v2283_v45 = vsel %vm1875_vm9, %v2282_v22, %v2278_v42  ;;  %v2149_v57 = vrot.slane %v1548_v48, %v6367_v61  ;;  %v2336_v46 = vrot.slane %v1624_v54, %v6238_v60  ;;  %v2292_v22 = vrot.slane %v1606_v30, %v6314_v2 }
 0x299   : > { %v2288_v11 = vsel %vm1882_vm10, %v2287_v49, %v2283_v45 }
 0x29a   : > { %v2150_v7 = vsel %vm1910_vm14, %v2149_v57, %v2145_v33  ;;  %v2293_v49 = vsel %vm1889_vm11, %v2292_v22, %v2288_v11  ;;  %v2337_v42 = vsel %vm1840_vm4, %v2336_v46, %v2332_v20 }
 0x29b   : > { %v1626_v27 = vpop.xlane.xlu1 %1625  ;;  %v1608_v50 = vpop.xlane.xlu0 %1607 }
 0x29c   : > { %v2341_v21 = vrot.slane %v1626_v27, %v6241_v32  ;;  %v2297_v59 = vrot.slane %v1608_v50, %v6327_v25 }
 0x29e   : > { %v2298_v30 = vsel %vm1896_vm12, %v2297_v59, %v2293_v49 }
 0x29f   : > { %v1628_v5 = vpop.xlane.xlu1 %1627  ;;  %v6823_v4 = vpop.xlane.xlu0 %1639 }
 0x2a0   : > { %v2346_v62 = vrot.slane %v1628_v5, %v6281_v35 }
 0x2a3   : > { %v1630_v23 = vpop.xlane.xlu1 %1629  ;;  %v6825_v40 = vpop.xlane.xlu0 %1641 }
 0x2a7   : > { %v1632_v24 = vpop.xlane.xlu1 %1631  ;;  %v1614_v39 = vpop.xlane.xlu0 %1613 }
 0x2a8   : > { %v2356_v54 = vrot.slane %v1632_v24, %v6247_v63  ;;  %v2312_v5 = vrot.slane %v1614_v39, %v6388_v34 }
 0x2ab   : > { %v1634_v29 = vpop.xlane.xlu1 %1633  ;;  %v6827_v8 = vpop.xlane.xlu0 %1649 }
 0x2ac   : > { %v2361_v27 = vrot.slane %v1634_v29, %v6261_v16 }
 0x2af   : > { %v1636_v44 = vpop.xlane.xlu1 %1635  ;;  %v6829_v52 = vpop.xlane.xlu0 %1651 }
 0x2b0   : > { %v2366_v11 = vrot.slane %v1636_v44, %v6271_v15  ;;  %v2405_v22 = vrot.slane %v6829_v52, %v6221_v47 }
 0x2b3   : > { %v1638_v56 = vpop.xlane.xlu1 %1637  ;;  %v6831_v0 = vpop.xlane.xlu0 %1653 }
 0x2b4   : > { %v2371_v57 = vrot.slane %v1638_v56, %v6314_v2 }
 0x2b7   : > { %v1550_v51 = vpop.xlane.xlu1 %1549  ;;  %v6834_v41 = vpop.xlane.xlu0 %1655 }
 0x2b8   : > { %v2154_v14 = vrot.slane %v1550_v51, %v6388_v34 }
 0x2ba   : > { %v2155_v1 = vsel %vm1917_vm15, %v2154_v14, %v2150_v7 }
 0x2bb   : > { %v2477_v31 = vsel %vm7651_vm0, %v2155_v1, %v6740_v58  ;;  %v1610_v9 = vpop.xlane.xlu1 %1609  ;;  %v1658_v6 = vpop.xlane.xlu0 %1657  ;;  %v2351_v58 = vrot.slane %v1630_v23, %v6299_v53  ;;  %vm2482_vm0 = vcmask 1046534  }
 0x2bc   : > { %v2479_v55 = vsel %vm7649_vm2, %v6754_v37, %v2477_v31  ;;  %v2302_v33 = vrot.slane %v1610_v9, %v6333_v36  ;;  %vm7650_vm2 = vcmask 1045509   ;;  %v2342_v37 = vsel %vm1847_vm5, %v2341_v21, %v2337_v42 }
 0x2bd   : > { %v2347_v18 = vsel %vm1854_vm6, %v2346_v62, %v2342_v37  ;;  %v2376_v31 = vrot.slane %v6823_v4, %v6327_v25  ;;  %v2400_v21 = vrot.slane %v6827_v8, %v6207_v38  ;;  %v2410_v4 = vrot.slane %v6831_v0, %v6258_v13 }
 0x2be   : > { %v2303_v23 = vsel %vm1903_vm13, %v2302_v33, %v2298_v30  ;;  %v2352_v24 = vsel %vm1861_vm7, %v2351_v58, %v2347_v18  ;;  %v2381_v33 = vrot.slane %v6825_v40, %v6333_v36  ;;  %v2415_v38 = vrot.slane %v6834_v41, %v6238_v60 }
 0x2bf   : > { %v1612_v48 = vpop.xlane.xlu1 %1611  ;;  %v1660_v45 = vpop.xlane.xlu0 %1659  ;;  %v2357_v14 = vsel %vm1868_vm8, %v2356_v54, %v2352_v24  ;;  %v2420_v47 = vrot.slane %v1658_v6, %v6241_v32 }
 0x2c0   : > { %v2307_v50 = vrot.slane %v1612_v48, %v6367_v61  ;;  %v2362_v1 = vsel %vm1875_vm9, %v2361_v27, %v2357_v14  ;;  %v2425_v13 = vrot.slane %v1660_v45, %v6281_v35 }
 0x2c1   : > { %v2367_v44 = vsel %vm1882_vm10, %v2366_v11, %v2362_v1  ;;  %v5346_v1 = vld [vmem:[%s7660_s22] sm:$0xff]  }
 0x2c2   : > { %v2308_v51 = vsel %vm1910_vm14, %v2307_v50, %v2303_v23  ;;  %v2372_v46 = vsel %vm1889_vm11, %v2371_v57, %v2367_v44  ;;  %5127 = vmatpush3.bf16.msra.mxu1 %v5346_v1  ;;  %v5381_v1 = vld [vmem:[%s7660_s22 + $0x188] sm:$0xff]  }
 0x2c3   : > { %v2313_v29 = vsel %vm1917_vm15, %v2312_v5, %v2308_v51  ;;  %v1644_v7 = vpop.xlane.xlu1 %1643  ;;  %v1662_v43 = vpop.xlane.xlu0 %1661  ;;  %v2377_v62 = vsel %vm1896_vm12, %v2376_v31, %v2372_v46  ;;  %5128 = vmatprep.subr.bf16.mxu1 %v5563_v3 }
 0x2c4   : > { %v2481_v39 = vsel %vm7650_vm2, %v2313_v29, %v2479_v55  ;;  %v2386_v55 = vrot.slane %v1644_v7, %v6367_v61  ;;  %vm7659_vm2 = vcmask 195712   ;;  %v2382_v52 = vsel %vm1903_vm13, %v2381_v33, %v2377_v62  ;;  %v5355_v62 = vld [vmem:[%s7660_s22 + $0xa0] sm:$0xff]   ;;  %v5357_v33 = vld [vmem:[%s7660_s22 + $0xa8] sm:$0xff]  }
 0x2c5   : > { %v2430_v60 = vrot.slane %v1662_v43, %v6299_v53 }
 0x2c6   : > { %v2387_v0 = vsel %vm1910_vm14, %v2386_v55, %v2382_v52  ;;  %v5356_v55 = vld [vmem:[%s7660_s22 + $0x28] sm:$0xff]  }
 0x2c7   : > { %v1664_v56 = vpop.xlane.xlu0 %1663  ;;  %v1648_v9 = vpop.xlane.xlu1 %1647 }
 0x2c8   : > { %v2396_v59 = vrot.slane %v1648_v9, %v6201_v28  ;;  %v2435_v32 = vrot.slane %v1664_v56, %v6247_v63  ;;  %v5351_v9 = vld [vmem:[%s7660_s22 + $0x90] sm:$0xff]  }
 0x2ca   : > { %v2401_v20 = vsel %vm1819_vm1, %v2400_v21, %v2396_v59  ;;  %vm2484_vm1 = vcmask 1047559   ;;  %v5352_v21 = vld [vmem:[%s7660_s22 + $0x18] sm:$0xff]  }
 0x2cb   : > { %v2406_v28 = vsel %vm7659_vm2, %v2405_v22, %v2401_v20  ;;  %v1666_v8 = vpop.xlane.xlu0 %1665  ;;  %v1646_v58 = vpop.xlane.xlu1 %1645  ;;  %vm1681_vm2 = vcmp.lt.s32.totalorder %v6183_v10, 16  ;;  %v5348_v10 = vld [vmem:[%s7660_s22 + $0x8] sm:$0xff]   ;;  %v5353_v59 = vld [vmem:[%s7660_s22 + $0x98] sm:$0xff]   ;;  %v5354_v22 = vld [vmem:[%s7660_s22 + $0x20] sm:$0xff]  }
 0x2cc   : > { %v2411_v49 = vsel %vm1833_vm3, %v2410_v4, %v2406_v28  ;;  %v2391_v40 = vrot.slane %v1646_v58, %v6388_v34  ;;  %v2440_v45 = vrot.slane %v1666_v8, %v6261_v16  ;;  %5129 = vmatpush3.bf16.msra.mxu1 %v5348_v10  ;;  %v5358_v4 = vld [vmem:[%s7660_s22 + $0x30] sm:$0xff]   ;;  %v5361_v28 = vld [vmem:[%s7660_s22 + $0xb8] sm:$0xff]   ;;  %v4600_v58 = vstv %s5672_s10 }
 0x2cd   : > { %v2416_v42 = vsel %vm1840_vm4, %v2415_v38, %v2411_v49  ;;  %5130 = vmatprep.subr.bf16.mxu1 %v5563_v3  ;;  %v5359_v20 = vld [vmem:[%s7660_s22 + $0xb0] sm:$0xff]   ;;  %v5360_v38 = vld [vmem:[%s7660_s22 + $0x38] sm:$0xff]   ;;  %vm6987_vm3 = vcmp.lt.s32.totalorder %v5739_v17, %v4600_v58  ;;  %vm7663_vm4 = vmmov 0   ;;  %v5396_v58 = vld [vmem:[%s7631_s9] sm:$0xff]  }
 0x2ce   : > { %v2421_v41 = vsel %vm1847_vm5, %v2420_v47, %v2416_v42  ;;  %v2392_v54 = vsel %vm1917_vm15, %v2391_v40, %v2387_v0  ;;  %v5383_v10 = vld [vmem:[%s7660_s22 + $0x190] sm:$0xff]   ;;  %vm7664_vm5 = vcmask 1041409  }
 0x2cf   : > { %v2426_v6 = vsel %vm1854_vm6, %v2425_v13, %v2421_v41  ;;  %v1668_v48 = vpop.xlane.xlu0 %1667  ;;  %v1670_v37 = vpop.xlane.xlu1 %1669  ;;  %v2483_v30 = vsel %vm2482_vm0, %v2392_v54, %v2481_v39  ;;  %v5350_v39 = vld [vmem:[%s7660_s22 + $0x10] sm:$0xff]   ;;  %vm7665_vm6 = vcmask 1042434  }
 0x2d0   : > { %v2431_v35 = vsel %vm1861_vm7, %v2430_v60, %v2426_v6  ;;  %v2445_v27 = vrot.slane %v1668_v48, %v6271_v15  ;;  %v2450_v18 = vrot.slane %v1670_v37, %v6314_v2  ;;  %5131 = vmatpush3.bf16.msra.mxu1 %v5350_v39  ;;  %v5363_v37 = vld [vmem:[%s7660_s22 + $0x100] sm:$0xff]   ;;  %v5385_v39 = vld [vmem:[%s7660_s22 + $0x198] sm:$0xff]   ;;  %vm7666_vm7 = vcmask 1043459  }
 0x2d1   : > { %v2436_v53 = vsel %vm1868_vm8, %v2435_v32, %v2431_v35  ;;  %5132 = vmatprep.subr.bf16.mxu1 %v5563_v3  ;;  %v5362_v32 = vld [vmem:[%s7660_s22 + $0x40] sm:$0xff]   ;;  %v5365_v35 = vld [vmem:[%s7660_s22 + $0x108] sm:$0xff]   ;;  %vm7667_vm8 = vcmask 1044484  }
 0x2d2   : > { %v2441_v50 = vsel %vm1875_vm9, %v2440_v45, %v2436_v53  ;;  %v5366_v45 = vld [vmem:[%s7660_s22 + $0x50] sm:$0xff]   ;;  %v5368_v53 = vld [vmem:[%s7660_s22 + $0x58] sm:$0xff]   ;;  %vm7668_vm9 = vcmask 1045509  }
 0x2d3   : > { %v2446_v63 = vsel %vm1882_vm10, %v2445_v27, %v2441_v50  ;;  %v1674_v5 = vpop.xlane.xlu0 %1673  ;;  %v1672_v11 = vpop.xlane.xlu1 %1671  ;;  %v5367_v27 = vld [vmem:[%s7660_s22 + $0x110] sm:$0xff]   ;;  %v5369_v50 = vld [vmem:[%s7660_s22 + $0x118] sm:$0xff]  }
 0x2d4   : > { %v2451_v23 = vsel %vm1889_vm11, %v2450_v18, %v2446_v63  ;;  %v2455_v24 = vrot.slane %v1672_v11, %v6327_v25  ;;  %v2460_v57 = vrot.slane %v1674_v5, %v6333_v36  ;;  %5133 = vmatpush3.bf16.msra.mxu1 %v5352_v21  ;;  %v5370_v18 = vld [vmem:[%s7660_s22 + $0x60] sm:$0xff]   ;;  %v5372_v5 = vld [vmem:[%s7660_s22 + $0x68] sm:$0xff]  }
 0x2d5   : > { %5134 = vmatprep.subr.bf16.mxu1 %v5563_v3  ;;  %v5371_v63 = vld [vmem:[%s7660_s22 + $0x120] sm:$0xff]   ;;  %v5373_v11 = vld [vmem:[%s7660_s22 + $0x128] sm:$0xff]  }
 0x2d6   : > { %v2456_v16 = vsel %vm1896_vm12, %v2455_v24, %v2451_v23  ;;  %v5374_v23 = vld [vmem:[%s7660_s22 + $0x70] sm:$0xff]  }
 0x2d7   : > { %v1676_v51 = vpop.xlane.xlu0 %1675  ;;  %v1678_v15 = vpop.xlane.xlu1 %1677  ;;  %v2461_v2 = vsel %vm1903_vm13, %v2460_v57, %v2456_v16  ;;  %v5375_v57 = vld [vmem:[%s7660_s22 + $0x130] sm:$0xff]  }
 0x2d8   : > { %v2465_v14 = vrot.slane %v1676_v51, %v6367_v61  ;;  %v2470_v29 = vrot.slane %v1678_v15, %v6388_v34  ;;  %v5347_v61 = vld [vmem:[%s7660_s22 + $0x80] sm:$0xff]   ;;  %v5349_v34 = vld [vmem:[%s7660_s22 + $0x88] sm:$0xff]   ;;  %5135 = vmatpush3.bf16.msra.mxu1 %v5354_v22  ;;  %v5376_v51 = vld [vmem:[%s7660_s22 + $0x78] sm:$0xff]  }
 0x2d9   : > { %5167 = vmatpush3.bf16.msra.mxu0 %v5347_v61  ;;  %5136 = vmatprep.subr.bf16.mxu1 %v5563_v3  ;;  %v5382_v61 = vld [vmem:[%s7660_s22 + $0xd0] sm:$0xff]  }
 0x2da   : > { %v2466_v7 = vsel %vm1910_vm14, %v2465_v14, %v2461_v2  ;;  %5168 = vmatprep.subr.bf16.mxu0 %v5563_v3  ;;  %v5377_v14 = vld [vmem:[%s7660_s22 + $0x138] sm:$0xff]   ;;  %v5378_v2 = vld [vmem:[%s7660_s22 + $0xc0] sm:$0xff]  }
 0x2db   : > { %v2471_v43 = vsel %vm1917_vm15, %v2470_v29, %v2466_v7 }
 0x2dc   : > { %v2485_v25 = vsel %vm2484_vm1, %v2471_v43, %v2483_v30  ;;  %5137 = vmatpush3.bf16.msra.mxu1 %v5356_v55  ;;  %v5379_v43 = vld [vmem:[%s7660_s22 + $0x180] sm:$0xff]  }
 0x2dd   : > { %v2487_v36 = vsel %vm1681_vm2, %v2485_v25, -inf  ;;  %5169 = vmatpush3.bf16.msra.mxu0 %v5349_v34  ;;  %5138 = vmatprep.subr.bf16.mxu1 %v5563_v3  ;;  %v5384_v34 = vld [vmem:[%s7660_s22 + $0xd8] sm:$0xff]  }
 0x2de   : > { %2488 = vmax.xlane.f32.xlu0 %v2487_v36  ;;  %5170 = vmatprep.subr.bf16.mxu0 %v5563_v3 }
 0x2e0   : > { %5139 = vmatpush3.bf16.msra.mxu1 %v5358_v4 }
 0x2e1   : > { %5171 = vmatpush3.bf16.msra.mxu0 %v5351_v9  ;;  %5140 = vmatprep.subr.bf16.mxu1 %v5563_v3  ;;  %v5390_v9 = vld [vmem:[%s7660_s22 + $0xf0] sm:$0xff]  }
 0x2e2   : > { %5172 = vmatprep.subr.bf16.mxu0 %v5563_v3 }
 0x2e4   : > { %5141 = vmatpush3.bf16.msra.mxu1 %v5360_v38 }
 0x2e5   : > { %5173 = vmatpush3.bf16.msra.mxu0 %v5353_v59  ;;  %5146 = vmatprep.subr.bf16.mxu1 %v5563_v3  ;;  %v5391_v59 = vld [vmem:[%s7660_s22 + $0x1b0] sm:$0xff]  }
 0x2e6   : > { %5174 = vmatprep.subr.bf16.mxu0 %v5563_v3 }
 0x2e9   : > { %5175 = vmatpush3.bf16.msra.mxu0 %v5355_v62  ;;  %v5392_v62 = vld [vmem:[%s7660_s22 + $0xf8] sm:$0xff]  }
 0x2ea   : > { %5176 = vmatprep.subr.bf16.mxu0 %v5563_v3 }
 0x2ed   : > { %5177 = vmatpush3.bf16.msra.mxu0 %v5357_v33  ;;  %v5393_v33 = vld [vmem:[%s7660_s22 + $0x1b8] sm:$0xff]  }
 0x2ee   : > { %5178 = vmatprep.subr.bf16.mxu0 %v5563_v3 }
 0x2f1   : > { %5179 = vmatpush3.bf16.msra.mxu0 %v5359_v20  ;;  %v5394_v20 = vld [vmem:[%s7660_s22 + $0x140] sm:$0xff]  }
 0x2f2   : > { %5180 = vmatprep.subr.bf16.mxu0 %v5563_v3 }
 0x2f5   : > { %5181 = vmatpush3.bf16.msra.mxu0 %v5361_v28 }
 0x2f6   : > { %5206 = vmatprep.subr.bf16.mxu0 %v5563_v3 }
 0x36b   : > { %v2489_v44 = vpop.xlane.xlu0 %2488 }
 0x36c   : > { %v2490_v46 = vsub.f32 %v2487_v36, %v2489_v44  ;;  %v5380_v36 = vld [vmem:[%s7660_s22 + $0xc8] sm:$0xff]   ;;  %v5386_v44 = vld [vmem:[%s7660_s22 + $0xe0] sm:$0xff]  }
 0x36e   : > { %v2491_v31 = vmul.f32 1.442695, %v2490_v46  ;;  %v5387_v46 = vld [vmem:[%s7660_s22 + $0x1a0] sm:$0xff]  }
 0x370   : > { %5522 = vpow2.f32 %v2491_v31  ;;  %v5388_v31 = vld [vmem:[%s7660_s22 + $0xe8] sm:$0xff]  }
 0x37a   : > { %v5523_v56 = vpop.eup %5522 }
 0x37b   : > { %2493 = vadd.xlane.f32.xlu1 %v5523_v56 }
 0x408   : > { %v2494_v8 = vpop.xlane.xlu1 %2493 }
 0x409   : > { %5524 = vrcp.f32 %v2494_v8  ;;  %v5395_v8 = vld [vmem:[%s7660_s22 + $0x148] sm:$0xff]  }
 0x413   : > { %v5525_v47 = vpop.eup %5524 }
 0x414   : > { %v2496_v49 = vmul.f32 %v5525_v47, %v5523_v56  ;;  %v5389_v56 = vld [vmem:[%s7660_s22 + $0x1a8] sm:$0xff]   ;;  %v5397_v47 = vld [vmem:[%s7660_s22 + $0x150] sm:$0xff]  }
 0x416   : > { %v2497_v40 = vpack.c.bf16 %v2496_v49, %v2496_v49  ;;  %v4610_v13 = vsel %vm6987_vm3, %v2496_v49, 0.0  ;;  %v5398_v49 = vld [vmem:[%s7660_s22 + $0x158] sm:$0xff]  }
 0x417   : > { %4611 = vst [vmem:[%s5687_s30] sm:$0xff] %v4610_v13  ;;  %v5400_v13 = vld [vmem:[%s7660_s22 + $0x160] sm:$0xff]  }
 0x418   : > { %v2505_v0 = vrot.slane %v2497_v40, %v5745_v19  ;;  %v5399_v40 = vld [vmem:[%s7631_s9 + $0x8] sm:$0xff]  }
 0x41a   : > { %v2506_v42 = vcombine.high %v2505_v0, %v2505_v0  ;;  %v2513_v60 = vrot.slane %v2505_v0, %v5745_v19  ;;  %v5401_v0 = vld [vmem:[%s7660_s22 + $0x168] sm:$0xff]  }
 0x41c   : > { %v4715_v41 = vpack.i.b16 %v2513_v60, %v2513_v60  ;;  %v6997_v54 = vrot.slane %v2506_v42, %v5745_v19  ;;  %v5364_v19 = vld [vmem:[%s7660_s22 + $0x48] sm:$0xff]   ;;  %v2524_v24 = vunpack.i.h.s16 %v2513_v60  ;;  %v7061_v16 = vcombine.high %v2513_v60, %v2513_v60  ;;  %v5402_v42 = vld [vmem:[%s7631_s9 + $0x10] sm:$0xff]  }
 0x41d   : > { %v5403_v60 = vld [vmem:[%s7660_s22 + $0x170] sm:$0xff]  }
 0x41e   : > { %v2535_v6 = vrot.slane %v4715_v41, %v5754_v26  ;;  %v4732_v48 = vpack.i.b16 %v6997_v54, %v6997_v54  ;;  %v2625_v15 = vpack.i.b16 %v2524_v24, %v2524_v24  ;;  %v4749_v29 = vpack.i.b16 %v7061_v16, %v7061_v16  ;;  %v5417_v24 = vld [vmem:[%s7631_s9 + $0x38] sm:$0xff]  }
 0x41f   : > { %v2526_v21 = vunpack.i.h.s16 %v6997_v54  ;;  %v7138_v22 = vcombine.high %v6997_v54, %v6997_v54  ;;  %v2528_v41 = vunpack.i.h.s16 %v7061_v16  ;;  %v5404_v54 = vld [vmem:[%s7660_s22 + $0x178] sm:$0xff]   ;;  %v5418_v16 = vld [vmem:[%s7634_s12 + $0x40] sm:$0xff]  }
 0x420   : > { %5143 = vmatmul.mubr.bf16.vlgmr.msra.gmra.mrb[0].mxu1 %v2535_v6  ;;  %v2723_v30 = vrot.slane %v4732_v48, %v5754_v26  ;;  %v2629_v7 = vrot.slane %v2625_v15, %v5754_v26  ;;  %v2911_v25 = vrot.slane %v4749_v29, %v5754_v26  ;;  %v5405_v6 = vld [vmem:[%s7631_s9 + $0x18] sm:$0xff]   ;;  %v5406_v48 = vld [vmem:[%s7660_s22 + $0x1c0] sm:$0xff]   ;;  %v5422_v29 = vld [vmem:[%s7634_s12 + $0x48] sm:$0xff]  }
 0x421   : > { %5147 = vmatpush3.bf16.msra.mxu1 %v5362_v32  ;;  %5162 = vmatprep.mubr.msk.bf16.mxu1 %vm7663_vm4, %v5563_v3  ;;  %v2813_v55 = vpack.i.b16 %v2526_v21, %v2526_v21  ;;  %v4766_v4 = vpack.i.b16 %v7138_v22, %v7138_v22  ;;  %v3001_v32 = vpack.i.b16 %v2528_v41, %v2528_v41  ;;  %v5420_v15 = vld [vmem:[%s7634_s12] sm:$0xff]  }
 0x422   : > { %5183 = vmatmul.mubr.bf16.vlgmr.msra.gmra.mrb[4].mxu0 %v2723_v30  ;;  %5148 = vmatprep.subr.bf16.mxu1 %v5563_v3  ;;  %v5407_v30 = vld [vmem:[%s7660_s22 + $0x1c8] sm:$0xff]  }
 0x423   : > { %5207 = vmatpush3.bf16.msra.mxu0 %v5363_v37  ;;  %5222 = vmatprep.mubr.msk.bf16.mxu0 %vm7663_vm4, %v5563_v3  ;;  %v2817_v38 = vrot.slane %v2813_v55, %v5754_v26  ;;  %v3099_v28 = vrot.slane %v4766_v4, %v5754_v26  ;;  %v3005_v37 = vrot.slane %v3001_v32, %v5754_v26  ;;  %v5436_v55 = vld [vmem:[%s7634_s12 + $0x20] sm:$0xff]  }
 0x424   : > { %5208 = vmatprep.subr.bf16.mxu0 %v5563_v3 }
 0x425   : > { %5149 = vmatpush3.bf16.msra.mxu1 %v5364_v19  ;;  %v5408_v19 = vld [vmem:[%s7631_s9 + $0x20] sm:$0xff]  }
 0x426   : > { %5150 = vmatprep.subr.bf16.mxu1 %v5563_v3 }
 0x427   : > { %5209 = vmatpush3.bf16.msra.mxu0 %v5365_v35  ;;  %v5409_v35 = vld [vmem:[%s7660_s22 + $0x1d0] sm:$0xff]  }
 0x428   : > { %5210 = vmatprep.subr.bf16.mxu0 %v5563_v3 }
 0x429   : > { %5151 = vmatpush3.bf16.msra.mxu1 %v5366_v45  ;;  %v5410_v45 = vld [vmem:[%s7660_s22 + $0x1d8] sm:$0xff]  }
 0x42a   : > { %5152 = vmatprep.subr.bf16.mxu1 %v5563_v3 }
 0x42b   : > { %5211 = vmatpush3.bf16.msra.mxu0 %v5367_v27  ;;  %v5411_v27 = vld [vmem:[%s7631_s9 + $0x28] sm:$0xff]  }
 0x42c   : > { %5212 = vmatprep.subr.bf16.mxu0 %v5563_v3 }
 0x42d   : > { %5153 = vmatpush3.bf16.msra.mxu1 %v5368_v53  ;;  %v5412_v53 = vld [vmem:[%s7660_s22 + $0x1e0] sm:$0xff]  }
 0x42e   : > { %5154 = vmatprep.subr.bf16.mxu1 %v5563_v3 }
 0x42f   : > { %5213 = vmatpush3.bf16.msra.mxu0 %v5369_v50  ;;  %v5413_v50 = vld [vmem:[%s7660_s22 + $0x1e8] sm:$0xff]  }
 0x430   : > { %5214 = vmatprep.subr.bf16.mxu0 %v5563_v3 }
 0x431   : > { %5155 = vmatpush3.bf16.msra.mxu1 %v5370_v18  ;;  %v5414_v18 = vld [vmem:[%s7631_s9 + $0x30] sm:$0xff]  }
 0x432   : > { %5156 = vmatprep.subr.bf16.mxu1 %v5563_v3 }
 0x433   : > { %5215 = vmatpush3.bf16.msra.mxu0 %v5371_v63  ;;  %v5415_v63 = vld [vmem:[%s7660_s22 + $0x1f0] sm:$0xff]  }
 0x434   : > { %5216 = vmatprep.subr.bf16.mxu0 %v5563_v3 }
 0x435   : > { %5157 = vmatpush3.bf16.msra.mxu1 %v5372_v5  ;;  %v2530_v5 = vunpack.i.h.s16 %v7138_v22 }
 0x436   : > { %5158 = vmatprep.subr.bf16.mxu1 %v5563_v3 }
 0x437   : > { %5217 = vmatpush3.bf16.msra.mxu0 %v5373_v11  ;;  %v5416_v11 = vld [vmem:[%s7660_s22 + $0x1f8] sm:$0xff]  }
 0x438   : > { %5218 = vmatprep.subr.bf16.mxu0 %v5563_v3 }
 0x439   : > { %5159 = vmatpush3.bf16.msra.mxu1 %v5374_v23  ;;  %v3189_v23 = vpack.i.b16 %v2530_v5, %v2530_v5 }
 0x43a   : > { %5160 = vmatprep.subr.bf16.mxu1 %v5563_v3 }
 0x43b   : > { %5219 = vmatpush3.bf16.msra.mxu0 %v5375_v57  ;;  %v3193_v57 = vrot.slane %v3189_v23, %v5754_v26 }
 0x43c   : > { %5220 = vmatprep.subr.bf16.mxu0 %v5563_v3 }
 0x43d   : > { %5161 = vmatpush3.bf16.msra.mxu1 %v5376_v51  ;;  %v5419_v51 = vld [vmem:[%s7634_s12 + $0xc0] sm:$0xff]  }
 0x43e   : > { %5186 = vmatprep.subr.bf16.mxu1 %v5563_v3 }
 0x43f   : > { %5221 = vmatpush3.bf16.msra.mxu0 %v5377_v14  ;;  %v5421_v14 = vld [vmem:[%s7634_s12 + $0x80] sm:$0xff]  }
 0x440   : > { %5163 = vmatmul.mubr.bf16.vlgmr.msra.gmra.mrb[4].mxu1 %v2629_v7  ;;  %5246 = vmatprep.subr.bf16.mxu0 %v5563_v3  ;;  %v5424_v7 = vld [vmem:[%s7634_s12 + $0x8] sm:$0xff]  }
 0x441   : > { %5187 = vmatpush3.bf16.msra.mxu1 %v5378_v2  ;;  %5202 = vmatprep.mubr.msk.bf16.mxu1 %vm7663_vm4, %v5563_v3  ;;  %v5423_v2 = vld [vmem:[%s7634_s12 + $0xc8] sm:$0xff]  }
 0x442   : > { %5223 = vmatmul.mubr.bf16.vlgmr.msra.gmra.mrb[8].mxu0 %v2911_v25  ;;  %5188 = vmatprep.subr.bf16.mxu1 %v5563_v3  ;;  %v5426_v25 = vld [vmem:[%s7634_s12 + $0x50] sm:$0xff]  }
 0x443   : > { %5247 = vmatpush3.bf16.msra.mxu0 %v5379_v43  ;;  %5262 = vmatprep.mubr.msk.bf16.mxu0 %vm7663_vm4, %v5563_v3  ;;  %v5425_v43 = vld [vmem:[%s7634_s12 + $0x88] sm:$0xff]  }
 0x444   : > { %5248 = vmatprep.subr.bf16.mxu0 %v5563_v3 }
 0x445   : > { %5189 = vmatpush3.bf16.msra.mxu1 %v5380_v36  ;;  %v5427_v36 = vld [vmem:[%s7634_s12 + $0xd0] sm:$0xff]  }
 0x446   : > { %5190 = vmatprep.subr.bf16.mxu1 %v5563_v3 }
 0x447   : > { %5249 = vmatpush3.bf16.msra.mxu0 %v5381_v1  ;;  %v5428_v1 = vld [vmem:[%s7634_s12 + $0x10] sm:$0xff]  }
 0x448   : > { %5250 = vmatprep.subr.bf16.mxu0 %v5563_v3 }
 0x449   : > { %5191 = vmatpush3.bf16.msra.mxu1 %v5382_v61  ;;  %v5429_v61 = vld [vmem:[%s7634_s12 + $0x90] sm:$0xff]  }
 0x44a   : > { %5192 = vmatprep.subr.bf16.mxu1 %v5563_v3 }
 0x44b   : > { %5251 = vmatpush3.bf16.msra.mxu0 %v5383_v10  ;;  %v5430_v10 = vld [vmem:[%s7634_s12 + $0x58] sm:$0xff]  }
 0x44c   : > { %5252 = vmatprep.subr.bf16.mxu0 %v5563_v3 }
 0x44d   : > { %5193 = vmatpush3.bf16.msra.mxu1 %v5384_v34  ;;  %v5431_v34 = vld [vmem:[%s7634_s12 + $0xd8] sm:$0xff]  }
 0x44e   : > { %5194 = vmatprep.subr.bf16.mxu1 %v5563_v3 }
 0x44f   : > { %5253 = vmatpush3.bf16.msra.mxu0 %v5385_v39  ;;  %v5432_v39 = vld [vmem:[%s7634_s12 + $0x18] sm:$0xff]  }
 0x450   : > { %5254 = vmatprep.subr.bf16.mxu0 %v5563_v3 }
 0x451   : > { %5195 = vmatpush3.bf16.msra.mxu1 %v5386_v44  ;;  %v5433_v44 = vld [vmem:[%s7634_s12 + $0x98] sm:$0xff]  }
 0x452   : > { %5196 = vmatprep.subr.bf16.mxu1 %v5563_v3 }
 0x453   : > { %5255 = vmatpush3.bf16.msra.mxu0 %v5387_v46  ;;  %v5434_v46 = vld [vmem:[%s7634_s12 + $0x60] sm:$0xff]  }
 0x454   : > { %5256 = vmatprep.subr.bf16.mxu0 %v5563_v3 }
 0x455   : > { %5197 = vmatpush3.bf16.msra.mxu1 %v5388_v31  ;;  %v5435_v31 = vld [vmem:[%s7634_s12 + $0xe0] sm:$0xff]  }
 0x456   : > { %5198 = vmatprep.subr.bf16.mxu1 %v5563_v3 }
 0x457   : > { %5257 = vmatpush3.bf16.msra.mxu0 %v5389_v56 }
 0x458   : > { %5258 = vmatprep.subr.bf16.mxu0 %v5563_v3 }
 0x459   : > { %5199 = vmatpush3.bf16.msra.mxu1 %v5390_v9 }
 0x45a   : > { %5200 = vmatprep.subr.bf16.mxu1 %v5563_v3 }
 0x45b   : > { %5259 = vmatpush3.bf16.msra.mxu0 %v5391_v59 }
 0x45c   : > { %5260 = vmatprep.subr.bf16.mxu0 %v5563_v3 }
 0x45d   : > { %5201 = vmatpush3.bf16.msra.mxu1 %v5392_v62 }
 0x45e   : > { %5226 = vmatprep.subr.bf16.mxu1 %v5563_v3 }
 0x45f   : > { %5261 = vmatpush3.bf16.msra.mxu0 %v5393_v33  ;;  %v5437_v33 = vld [vmem:[%s7634_s12 + $0xa0] sm:$0xff]  }
 0x460   : > { %5203 = vmatmul.mubr.bf16.vlgmr.msra.gmra.mrb[8].mxu1 %v2817_v38  ;;  %5286 = vmatprep.subr.bf16.mxu0 %v5563_v3  ;;  %v5438_v38 = vld [vmem:[%s7634_s12 + $0x68] sm:$0xff]  }
 0x461   : > { %5227 = vmatpush3.bf16.msra.mxu1 %v5394_v20  ;;  %5242 = vmatprep.mubr.msk.bf16.mxu1 %vm7663_vm4, %v5563_v3 }
 0x462   : > { %5263 = vmatmul.mubr.bf16.vlgmr.msra.gmra.mrb[12].mxu0 %v3099_v28  ;;  %5228 = vmatprep.subr.bf16.mxu1 %v5563_v3  ;;  %v5439_v28 = vld [vmem:[%s7634_s12 + $0xe8] sm:$0xff]  }
 0x463   : > { %5302 = vmatprep.mubr.msk.bf16.mxu0 %vm7663_vm4, %v5563_v3 }
 0x465   : > { %5229 = vmatpush3.bf16.msra.mxu1 %v5395_v8  ;;  %v5440_v8 = vld [vmem:[%s7634_s12 + $0x28] sm:$0xff]  }
 0x466   : > { %5230 = vmatprep.subr.bf16.mxu1 %v5563_v3 }
 0x468   : > { %5287 = vmatpush3.bf16.xpose.msra.mxu0 %v5396_v58  ;;  %v5441_v58 = vld [vmem:[%s7634_s12 + $0xa8] sm:$0xff]  }
 0x469   : > { %5231 = vmatpush3.bf16.msra.mxu1 %v5397_v47  ;;  %5288 = vmatprep.subr.bf16.mxu0 %v5563_v3  ;;  %v5442_v47 = vld [vmem:[%s7634_s12 + $0x70] sm:$0xff]  }
 0x46a   : > { %5232 = vmatprep.subr.bf16.mxu1 %v5563_v3 }
 0x46d   : > { %5233 = vmatpush3.bf16.msra.mxu1 %v5398_v49  ;;  %v5443_v49 = vld [vmem:[%s7634_s12 + $0xf0] sm:$0xff]  }
 0x46e   : > { %5234 = vmatprep.subr.bf16.mxu1 %v5563_v3 }
 0x470   : > { %5289 = vmatpush3.bf16.xpose.msra.mxu0 %v5399_v40 }
 0x471   : > { %5235 = vmatpush3.bf16.msra.mxu1 %v5400_v13  ;;  %5290 = vmatprep.subr.bf16.mxu0 %v5563_v3 }
 0x472   : > { %5236 = vmatprep.subr.bf16.mxu1 %v5563_v3 }
 0x475   : > { %5237 = vmatpush3.bf16.msra.mxu1 %v5401_v0 }
 0x476   : > { %5238 = vmatprep.subr.bf16.mxu1 %v5563_v3 }
 0x478   : > { %5291 = vmatpush3.bf16.xpose.msra.mxu0 %v5402_v42 }
 0x479   : > { %5239 = vmatpush3.bf16.msra.mxu1 %v5403_v60  ;;  %5292 = vmatprep.subr.bf16.mxu0 %v5563_v3 }
 0x47a   : > { %5240 = vmatprep.subr.bf16.mxu1 %v5563_v3 }
 0x47d   : > { %5241 = vmatpush3.bf16.msra.mxu1 %v5404_v54 }
 0x47e   : > { %5266 = vmatprep.subr.bf16.mxu1 %v5563_v3 }
 0x480   : > { %5243 = vmatmul.mubr.bf16.vlgmr.msra.gmra.mrb[12].mxu1 %v3005_v37  ;;  %5293 = vmatpush3.bf16.xpose.msra.mxu0 %v5405_v6 }
 0x481   : > { %5267 = vmatpush3.bf16.msra.mxu1 %v5406_v48  ;;  %5294 = vmatprep.subr.bf16.mxu0 %v5563_v3 }
 0x482   : > { %5268 = vmatprep.subr.bf16.mxu1 %v5563_v3  ;;  %5282 = vmatprep.mubr.msk.bf16.mxu1 %vm7663_vm4, %v5563_v3 }
 0x485   : > { %5269 = vmatpush3.bf16.msra.mxu1 %v5407_v30  ;;  %v5444_v30 = vld [vmem:[%s7634_s12 + $0x30] sm:$0xff]  }
 0x486   : > { %5270 = vmatprep.subr.bf16.mxu1 %v5563_v3 }
 0x488   : > { %5295 = vmatpush3.bf16.xpose.msra.mxu0 %v5408_v19  ;;  %v5445_v19 = vld [vmem:[%s7634_s12 + $0xb0] sm:$0xff]  }
 0x489   : > { %5271 = vmatpush3.bf16.msra.mxu1 %v5409_v35  ;;  %5296 = vmatprep.subr.bf16.mxu0 %v5563_v3 }
 0x48a   : > { %5272 = vmatprep.subr.bf16.mxu1 %v5563_v3 }
 0x48d   : > { %5273 = vmatpush3.bf16.msra.mxu1 %v5410_v45  ;;  %v5446_v45 = vld [vmem:[%s7634_s12 + $0x78] sm:$0xff]  }
 0x48e   : > { %5274 = vmatprep.subr.bf16.mxu1 %v5563_v3 }
 0x490   : > { %5297 = vmatpush3.bf16.xpose.msra.mxu0 %v5411_v27  ;;  %v5447_v27 = vld [vmem:[%s7634_s12 + $0xf8] sm:$0xff]  }
 0x491   : > { %5275 = vmatpush3.bf16.msra.mxu1 %v5412_v53  ;;  %5298 = vmatprep.subr.bf16.mxu0 %v5563_v3  ;;  %v5448_v53 = vld [vmem:[%s7634_s12 + $0x38] sm:$0xff]  }
 0x492   : > { %5276 = vmatprep.subr.bf16.mxu1 %v5563_v3 }
 0x495   : > { %5277 = vmatpush3.bf16.msra.mxu1 %v5413_v50  ;;  %v5449_v50 = vld [vmem:[%s7634_s12 + $0xb8] sm:$0xff]  }
 0x496   : > { %5278 = vmatprep.subr.bf16.mxu1 %v5563_v3 }
 0x498   : > { %5299 = vmatpush3.bf16.xpose.msra.mxu0 %v5414_v18  ;;  %v5450_v18 = vld [vmem:[%s7633_s11 + $0x40] sm:$0xff]  }
 0x499   : > { %5279 = vmatpush3.bf16.msra.mxu1 %v5415_v63  ;;  %5300 = vmatprep.subr.bf16.mxu0 %v5563_v3  ;;  %v5451_v63 = vld [vmem:[%s7633_s11 + $0xc0] sm:$0xff]  }
 0x49a   : > { %5280 = vmatprep.subr.bf16.mxu1 %v5563_v3 }
 0x49d   : > { %5281 = vmatpush3.bf16.msra.mxu1 %v5416_v11 }
 0x49e   : > { %4989 = vmatprep.subr.bf16.mxu1 %v5418_v16 }
 0x4a0   : > { %5283 = vmatmul.mubr.bf16.vlgmr.msra.gmra.mrb[16].mxu1 %v3193_v57  ;;  %5301 = vmatpush3.bf16.xpose.msra.mxu0 %v5417_v24 }
 0x4a1   : > { %5007 = vmatprep.subr.bf16.mxu0 %v5419_v51 }
 0x4a6   : > { %4990 = vmatpush3.bf16.xpose.msra.mxu1 %v5420_v15 }
 0x4a7   : > { %5303 = vmatmul.mubr.bf16.vlgmr.msra.gmra.mrb[16].mxu0 %v5733_v12  ;;  %4991 = vmatprep.subr.bf16.mxu1 %v5422_v29 }
 0x4a8   : > { %5008 = vmatpush3.bf16.xpose.msra.mxu0 %v5421_v14 }
 0x4a9   : > { %5009 = vmatprep.subr.bf16.mxu0 %v5423_v2 }
 0x4ae   : > { %4992 = vmatpush3.bf16.xpose.msra.mxu1 %v5424_v7 }
 0x4af   : > { %4993 = vmatprep.subr.bf16.mxu1 %v5426_v25 }
 0x4b0   : > { %5010 = vmatpush3.bf16.xpose.msra.mxu0 %v5425_v43 }
 0x4b1   : > { %5011 = vmatprep.subr.bf16.mxu0 %v5427_v36 }
 0x4b6   : > { %4994 = vmatpush3.bf16.xpose.msra.mxu1 %v5428_v1 }
 0x4b7   : > { %4995 = vmatprep.subr.bf16.mxu1 %v5430_v10 }
 0x4b8   : > { %5012 = vmatpush3.bf16.xpose.msra.mxu0 %v5429_v61 }
 0x4b9   : > { %5013 = vmatprep.subr.bf16.mxu0 %v5431_v34 }
 0x4be   : > { %4996 = vmatpush3.bf16.xpose.msra.mxu1 %v5432_v39 }
 0x4bf   : > { %4997 = vmatprep.subr.bf16.mxu1 %v5434_v46 }
 0x4c0   : > { %5014 = vmatpush3.bf16.xpose.msra.mxu0 %v5433_v44 }
 0x4c1   : > { %5015 = vmatprep.subr.bf16.mxu0 %v5435_v31 }
 0x4c6   : > { %4998 = vmatpush3.bf16.xpose.msra.mxu1 %v5436_v55 }
 0x4c7   : > { %4999 = vmatprep.subr.bf16.mxu1 %v5438_v38 }
 0x4c8   : > { %5016 = vmatpush3.bf16.xpose.msra.mxu0 %v5437_v33 }
 0x4c9   : > { %5017 = vmatprep.subr.bf16.mxu0 %v5439_v28 }
 0x4ce   : > { %5000 = vmatpush3.bf16.xpose.msra.mxu1 %v5440_v8 }
 0x4cf   : > { %5001 = vmatprep.subr.bf16.mxu1 %v5442_v47 }
 0x4d0   : > { %5018 = vmatpush3.bf16.xpose.msra.mxu0 %v5441_v58 }
 0x4d1   : > { %5019 = vmatprep.subr.bf16.mxu0 %v5443_v49  ;;  %v5452_v49 = vld [vmem:[%s7633_s11] sm:$0xff]  }
 0x4d6   : > { %5002 = vmatpush3.bf16.xpose.msra.mxu1 %v5444_v30  ;;  %v5463_v30 = vld [vmem:[%s7633_s11 + $0xd8] sm:$0xff]  }
 0x4d7   : > { %5003 = vmatprep.subr.bf16.mxu1 %v5446_v45  ;;  %v5466_v45 = vld [vmem:[%s7633_s11 + $0x60] sm:$0xff]  }
 0x4d8   : > { %5020 = vmatpush3.bf16.xpose.msra.mxu0 %v5445_v19  ;;  %v5464_v19 = vld [vmem:[%s7633_s11 + $0x18] sm:$0xff]  }
 0x4d9   : > { %5021 = vmatprep.subr.bf16.mxu0 %v5447_v27  ;;  %v5467_v27 = vld [vmem:[%s7633_s11 + $0xe0] sm:$0xff]  }
 0x4de   : > { %5004 = vmatpush3.bf16.xpose.msra.mxu1 %v5448_v53  ;;  %v5468_v53 = vld [vmem:[%s7633_s11 + $0x20] sm:$0xff]  }
 0x4df   : > { %5025 = vmatprep.subr.bf16.mxu1 %v5450_v18  ;;  %v5470_v18 = vld [vmem:[%s7633_s11 + $0x68] sm:$0xff]  }
 0x4e0   : > { %5022 = vmatpush3.bf16.xpose.msra.mxu0 %v5449_v50  ;;  %v5469_v50 = vld [vmem:[%s7633_s11 + $0xa0] sm:$0xff]  }
 0x4e1   : > { %5043 = vmatprep.subr.bf16.mxu0 %v5451_v63  ;;  %v5471_v63 = vld [vmem:[%s7633_s11 + $0xe8] sm:$0xff]  }
 0x4f3   : > { %v2619_v56 = vpop.f32.mrb[0].mxu1 }
 0x4f4   : > { %v5144_v9 = vpop.f32.mrb[1].mxu1 }
 0x4f5   : > { %v2622_v21 = vpop.f32.mrb[2].mxu1  ;;  %v2807_v59 = vpop.f32.mrb[4].mxu0 }
 0x4f6   : > { %v5145_v22 = vpop.f32.mrb[3].mxu1  ;;  %v5184_v62 = vpop.f32.mrb[5].mxu0  ;;  %v3408_v42 = vrot.slane %v2807_v59, 6  ;;  %v4783_v59 = vld [vmem:[%s7669_s26] ss:$0 sm:$0xff] }
 0x4f7   : > { %v2810_v4 = vpop.f32.mrb[6].mxu0 }
 0x4f8   : > { %v5185_v20 = vpop.f32.mrb[7].mxu0 }
 0x513   : > { %v2713_v40 = vpop.f32.mrb[4].mxu1 }
 0x514   : > { %v3406_v13 = vrot.slane %v2713_v40, 7  ;;  %v5164_v0 = vpop.f32.mrb[5].mxu1  ;;  %v5453_v40 = vld [vmem:[%s7633_s11 + $0x80] sm:$0xff]  }
 0x515   : > { %v2716_v60 = vpop.f32.mrb[6].mxu1  ;;  %v2995_v41 = vpop.f32.mrb[8].mxu0  ;;  %v5455_v0 = vld [vmem:[%s7633_s11 + $0xc8] sm:$0xff]  }
 0x516   : > { %v3407_v54 = vsel %vm7664_vm5, %v3406_v13, %v2619_v56  ;;  %v5165_v32 = vpop.f32.mrb[7].mxu1  ;;  %v5224_v6 = vpop.f32.mrb[9].mxu0  ;;  %v3412_v24 = vrot.slane %v2995_v41, 4  ;;  %v5454_v13 = vld [vmem:[%s7633_s11 + $0x48] sm:$0xff]  }
 0x517   : > { %v2998_v48 = vpop.f32.mrb[10].mxu0  ;;  %v3409_v37 = vsel %vm7665_vm6, %v3408_v42, %v3407_v54  ;;  %v7384_v42 = vld [vmem:[%s5677_s24] sm:$0xf]  ;;  %v5456_v60 = vld [vmem:[%s7633_s11 + $0x8] sm:$0xff]   ;;  %v5458_v54 = vld [vmem:[%s7633_s11 + $0x50] sm:$0xff]  }
 0x518   : > { %v5225_v35 = vpop.f32.mrb[11].mxu0  ;;  %v5457_v41 = vld [vmem:[%s7633_s11 + $0x88] sm:$0xff]   ;;  %v5459_v32 = vld [vmem:[%s7633_s11 + $0xd0] sm:$0xff]  }
 0x519   : > { %v5460_v6 = vld [vmem:[%s7633_s11 + $0x10] sm:$0xff]   ;;  %v5465_v35 = vld [vmem:[%s7633_s11 + $0x98] sm:$0xff]  }
 0x51a   : > { %v5461_v48 = vld [vmem:[%s7633_s11 + $0x90] sm:$0xff]  }
 0x533   : > { %v2901_v5 = vpop.f32.mrb[8].mxu1 }
 0x534   : > { %v3410_v11 = vrot.slane %v2901_v5, 5  ;;  %v5204_v23 = vpop.f32.mrb[9].mxu1  ;;  %v5472_v5 = vld [vmem:[%s7633_s11 + $0x28] sm:$0xff]  }
 0x535   : > { %v2904_v57 = vpop.f32.mrb[10].mxu1  ;;  %v3183_v16 = vpop.f32.mrb[12].mxu0  ;;  %v5474_v23 = vld [vmem:[%s7633_s11 + $0x70] sm:$0xff]  }
 0x536   : > { %v3411_v51 = vsel %vm7666_vm7, %v3410_v11, %v3409_v37  ;;  %v5205_v15 = vpop.f32.mrb[11].mxu1  ;;  %v5264_v14 = vpop.f32.mrb[13].mxu0  ;;  %v3416_v1 = vrot.slane %v3183_v16, 2  ;;  %v5462_v37 = vld [vmem:[%s7633_s11 + $0x58] sm:$0xff]   ;;  %v5473_v11 = vld [vmem:[%s7633_s11 + $0xa8] sm:$0xff]   ;;  %v5476_v57 = vld [vmem:[%s7633_s11 + $0x30] sm:$0xff]  }
 0x537   : > { %v3186_v29 = vpop.f32.mrb[14].mxu0  ;;  %v3413_v2 = vsel %vm7667_vm8, %v3412_v24, %v3411_v51  ;;  %v5475_v24 = vld [vmem:[%s7633_s11 + $0xf0] sm:$0xff]   ;;  %v5478_v51 = vld [vmem:[%s7633_s11 + $0x78] sm:$0xff]  }
 0x538   : > { %v5265_v7 = vpop.f32.mrb[15].mxu0  ;;  %v5477_v16 = vld [vmem:[%s7633_s11 + $0xb0] sm:$0xff]   ;;  %v5479_v15 = vld [vmem:[%s7633_s11 + $0xf8] sm:$0xff]  }
 0x539   : > { %v5480_v14 = vld [vmem:[%s7633_s11 + $0x38] sm:$0xff]   ;;  %v5483_v7 = vld [vmem:[%s7635_s13 + $0xc0] sm:$0xff]  }
 0x53a   : > { %v5481_v29 = vld [vmem:[%s7633_s11 + $0xb8] sm:$0xff]  }
 0x553   : > { %v3089_v43 = vpop.f32.mrb[12].mxu1 }
 0x554   : > { %v3414_v25 = vrot.slane %v3089_v43, 3  ;;  %v5244_v36 = vpop.f32.mrb[13].mxu1  ;;  %v5484_v43 = vld [vmem:[%s7635_s13] sm:$0xff]  }
 0x555   : > { %v3092_v61 = vpop.f32.mrb[14].mxu1  ;;  %v5486_v36 = vld [vmem:[%s7635_s13 + $0x48] sm:$0xff]  }
 0x556   : > { %v3415_v10 = vsel %vm7668_vm9, %v3414_v25, %v3413_v2  ;;  %v5245_v34 = vpop.f32.mrb[15].mxu1  ;;  %v5482_v2 = vld [vmem:[%s7635_s13 + $0x40] sm:$0xff]   ;;  %v5488_v61 = vld [vmem:[%s7635_s13 + $0x8] sm:$0xff]  }
 0x557   : > { %v3417_v39 = vsel %vm2482_vm0, %v3416_v1, %v3415_v10  ;;  %v5485_v25 = vld [vmem:[%s7635_s13 + $0x80] sm:$0xff]   ;;  %v5487_v1 = vld [vmem:[%s7635_s13 + $0xc8] sm:$0xff]   ;;  %v5490_v34 = vld [vmem:[%s7635_s13 + $0x50] sm:$0xff]  }
 0x558   : > { %v5489_v10 = vld [vmem:[%s7635_s13 + $0x88] sm:$0xff]  }
 0x573   : > { %v3277_v44 = vpop.f32.mrb[16].mxu1 }
 0x574   : > { %v3418_v46 = vrot.slane %v3277_v44, 1  ;;  %v5284_v31 = vpop.f32.mrb[17].mxu1  ;;  %v5492_v44 = vld [vmem:[%s7635_s13 + $0x10] sm:$0xff]  }
 0x575   : > { %v3280_v56 = vpop.f32.mrb[18].mxu1  ;;  %v5494_v31 = vld [vmem:[%s7635_s13 + $0x58] sm:$0xff]  }
 0x576   : > { %v3419_v9 = vsel %vm2484_vm1, %v3418_v46, %v3417_v39  ;;  %v5285_v21 = vpop.f32.mrb[19].mxu1  ;;  %v5491_v39 = vld [vmem:[%s7635_s13 + $0xd0] sm:$0xff]   ;;  %v5495_v56 = vld [vmem:[%s7635_s13 + $0xd8] sm:$0xff]  }
 0x577   : > { %v5493_v46 = vld [vmem:[%s7635_s13 + $0x90] sm:$0xff]   ;;  %v5497_v21 = vld [vmem:[%s7635_s13 + $0x98] sm:$0xff]  }
 0x57a   : > { %v3388_v22 = vpop.f32.mrb[16].mxu0 }
 0x57b   : > { %v3389_v62 = vadd.f32 %v4783_v59, %v3388_v22  ;;  %v5304_v55 = vpop.f32.mrb[17].mxu0  ;;  %v5498_v59 = vld [vmem:[%s7635_s13 + $0x60] sm:$0xff]  }
 0x57c   : > { %v3391_v33 = vpop.f32.mrb[18].mxu0  ;;  %v5499_v22 = vld [vmem:[%s7635_s13 + $0xe0] sm:$0xff]  }
 0x57d   : > { %v3394_v4 = vmul.f32 0.5, %v3389_v62  ;;  %v5305_v20 = vpop.f32.mrb[19].mxu0  ;;  %v5500_v62 = vld [vmem:[%s7635_s13 + $0x20] sm:$0xff]   ;;  %v5502_v33 = vld [vmem:[%s7635_s13 + $0x68] sm:$0xff]  }
 0x57e   : > { %v5501_v55 = vld [vmem:[%s7635_s13 + $0xa0] sm:$0xff]   ;;  %v5504_v20 = vld [vmem:[%s7635_s13 + $0x28] sm:$0xff]  }
 0x57f   : > { %5526 = vtanh.f32 %v3394_v4  ;;  %v5503_v4 = vld [vmem:[%s7635_s13 + $0xe8] sm:$0xff]  }
 0x589   : > { %v5527_v38 = vpop.eup %5526 }
 0x58a   : > { %v3396_v28 = vadd.f32 1.0, %v5527_v38  ;;  %v5505_v38 = vld [vmem:[%s7635_s13 + $0xa8] sm:$0xff]  }
 0x58c   : > { %v3397_v8 = vmul.f32 0.5, %v3396_v28  ;;  %v5506_v28 = vld [vmem:[%s7635_s13 + $0x70] sm:$0xff]  }
 0x58e   : > { %v3421_v58 = vmul.f32 %v3419_v9, %v3397_v8  ;;  %v5496_v9 = vld [vmem:[%s7635_s13 + $0x18] sm:$0xff]   ;;  %v5507_v8 = vld [vmem:[%s7635_s13 + $0xf0] sm:$0xff]  }
 0x590   : > { %v3422_v47 = vpack.c.bf16 %v3421_v58, %v3421_v58  ;;  %v5508_v58 = vld [vmem:[%s7635_s13 + $0x30] sm:$0xff]  }
 0x592   : > { %5005 = vmatprep.mubr.bf16.mxu1 %v3422_v47  ;;  %5023 = vmatprep.mubr.bf16.mxu0 %v3422_v47 }
 0x593   : > { %5006 = vmatmul.mubr.bf16.vlgmr.msra.gmra.mrb[20].mxu1 %v3422_v47  ;;  %5024 = vmatmul.mubr.bf16.vlgmr.msra.gmra.mrb[20].mxu0 %v3422_v47  ;;  %v5509_v47 = vld [vmem:[%s7635_s13 + $0xb0] sm:$0xff]  }
 0x594   : > { %5026 = vmatpush3.bf16.xpose.msra.mxu1 %v5452_v49  ;;  %5044 = vmatpush3.bf16.xpose.msra.mxu0 %v5453_v40  ;;  %v5510_v49 = vld [vmem:[%s7635_s13 + $0x78] sm:$0xff]  }
 0x595   : > { %5027 = vmatprep.subr.bf16.mxu1 %v5454_v13  ;;  %5045 = vmatprep.subr.bf16.mxu0 %v5455_v0  ;;  %v5511_v40 = vld [vmem:[%s7635_s13 + $0xf8] sm:$0xff]  }
 0x596   : > { %5041 = vmatprep.mubr.bf16.mxu1 %v7384_v42  ;;  %5059 = vmatprep.mubr.bf16.mxu0 %v7384_v42  ;;  %v5512_v13 = vld [vmem:[%s7635_s13 + $0x38] sm:$0xff]  }
 0x597   : > { %v5513_v0 = vld [vmem:[%s7635_s13 + $0xb8] sm:$0xff]  }
 0x59c   : > { %5028 = vmatpush3.bf16.xpose.msra.mxu1 %v5456_v60  ;;  %5046 = vmatpush3.bf16.xpose.msra.mxu0 %v5457_v41  ;;  %v5515_v60 = vld [vmem:[%s7637_s15 + $0x8] sm:$0xff]  }
 0x59d   : > { %5029 = vmatprep.subr.bf16.mxu1 %v5458_v54  ;;  %5047 = vmatprep.subr.bf16.mxu0 %v5459_v32 }
 0x5a4   : > { %5030 = vmatpush3.bf16.xpose.msra.mxu1 %v5460_v6  ;;  %5048 = vmatpush3.bf16.xpose.msra.mxu0 %v5461_v48 }
 0x5a5   : > { %5031 = vmatprep.subr.bf16.mxu1 %v5462_v37  ;;  %5049 = vmatprep.subr.bf16.mxu0 %v5463_v30 }
 0x5ac   : > { %5032 = vmatpush3.bf16.xpose.msra.mxu1 %v5464_v19  ;;  %5050 = vmatpush3.bf16.xpose.msra.mxu0 %v5465_v35  ;;  %v5517_v35 = vld [vmem:[%s7637_s15 + $0x18] sm:$0xff]  }
 0x5ad   : > { %5033 = vmatprep.subr.bf16.mxu1 %v5466_v45  ;;  %5051 = vmatprep.subr.bf16.mxu0 %v5467_v27  ;;  %v5518_v45 = vld [vmem:[%s7637_s15 + $0x20] sm:$0xff]   ;;  %v5519_v27 = vld [vmem:[%s7637_s15 + $0x28] sm:$0xff]  }
 0x5b4   : > { %5034 = vmatpush3.bf16.xpose.msra.mxu1 %v5468_v53  ;;  %5052 = vmatpush3.bf16.xpose.msra.mxu0 %v5469_v50  ;;  %v5520_v53 = vld [vmem:[%s7637_s15 + $0x30] sm:$0xff]  }
 0x5b5   : > { %5035 = vmatprep.subr.bf16.mxu1 %v5470_v18  ;;  %5053 = vmatprep.subr.bf16.mxu0 %v5471_v63 }
 0x5bc   : > { %5036 = vmatpush3.bf16.xpose.msra.mxu1 %v5472_v5  ;;  %5054 = vmatpush3.bf16.xpose.msra.mxu0 %v5473_v11 }
 0x5bd   : > { %5037 = vmatprep.subr.bf16.mxu1 %v5474_v23  ;;  %5055 = vmatprep.subr.bf16.mxu0 %v5475_v24 }
 0x5c4   : > { %5038 = vmatpush3.bf16.xpose.msra.mxu1 %v5476_v57  ;;  %5056 = vmatpush3.bf16.xpose.msra.mxu0 %v5477_v16 }
 0x5c5   : > { %5039 = vmatprep.subr.bf16.mxu1 %v5478_v51  ;;  %5057 = vmatprep.subr.bf16.mxu0 %v5479_v15 }
 0x5cc   : > { %5040 = vmatpush3.bf16.xpose.msra.mxu1 %v5480_v14  ;;  %5058 = vmatpush3.bf16.xpose.msra.mxu0 %v5481_v29  ;;  %v5521_v29 = vld [vmem:[%s7637_s15 + $0x38] sm:$0xff]  }
 0x5cd   : > { %5061 = vmatprep.subr.bf16.mxu1 %v5482_v2  ;;  %5079 = vmatprep.subr.bf16.mxu0 %v5483_v7  ;;  %v4442_v2 = vld [vmem:[%s7636_s14] sm:$0xf]  ;;  %v4450_v7 = vsub.s32 1, %v5739_v17 }
 0x5d3   : > { %5042 = vmatmul.mubr.bf16.vlgmr.msra.gmra.mrb[24].mxu1 %v7384_v42  ;;  %5060 = vmatmul.mubr.bf16.vlgmr.msra.gmra.mrb[24].mxu0 %v7384_v42  ;;  %v5514_v42 = vld [vmem:[%s7637_s15] sm:$0xff]  }
 0x5d4   : > { %5062 = vmatpush3.bf16.xpose.msra.mxu1 %v5484_v43  ;;  %5080 = vmatpush3.bf16.xpose.msra.mxu0 %v5485_v25  ;;  %v4447_v43 = vrot.slane %v4442_v2, %v5754_v26 }
 0x5d5   : > { %5063 = vmatprep.subr.bf16.mxu1 %v5486_v36  ;;  %5081 = vmatprep.subr.bf16.mxu0 %v5487_v1  ;;  %v4451_v1 = vrot.slane %v4442_v2, %v4450_v7 }
 0x5d6   : > { %5077 = vmatprep.mubr.bf16.mxu1 %v5733_v12  ;;  %5095 = vmatprep.mubr.bf16.mxu0 %v5733_v12 }
 0x5dc   : > { %5064 = vmatpush3.bf16.xpose.msra.mxu1 %v5488_v61  ;;  %5082 = vmatpush3.bf16.xpose.msra.mxu0 %v5489_v10 }
 0x5dd   : > { %5065 = vmatprep.subr.bf16.mxu1 %v5490_v34  ;;  %5083 = vmatprep.subr.bf16.mxu0 %v5491_v39 }
 0x5e4   : > { %5066 = vmatpush3.bf16.xpose.msra.mxu1 %v5492_v44  ;;  %5084 = vmatpush3.bf16.xpose.msra.mxu0 %v5493_v46 }
 0x5e5   : > { %5067 = vmatprep.subr.bf16.mxu1 %v5494_v31  ;;  %5085 = vmatprep.subr.bf16.mxu0 %v5495_v56 }
 0x5ec   : > { %5068 = vmatpush3.bf16.xpose.msra.mxu1 %v5496_v9  ;;  %5086 = vmatpush3.bf16.xpose.msra.mxu0 %v5497_v21 }
 0x5ed   : > { %5069 = vmatprep.subr.bf16.mxu1 %v5498_v59  ;;  %5087 = vmatprep.subr.bf16.mxu0 %v5499_v22  ;;  %v4458_v59 = vsub.s32 3, %v5739_v17 }
 0x5f4   : > { %5070 = vmatpush3.bf16.xpose.msra.mxu1 %v5500_v62  ;;  %5088 = vmatpush3.bf16.xpose.msra.mxu0 %v5501_v55 }
 0x5f5   : > { %5071 = vmatprep.subr.bf16.mxu1 %v5502_v33  ;;  %5089 = vmatprep.subr.bf16.mxu0 %v5503_v4 }
 0x5fc   : > { %5072 = vmatpush3.bf16.xpose.msra.mxu1 %v5504_v20  ;;  %5090 = vmatpush3.bf16.xpose.msra.mxu0 %v5505_v38  ;;  %v4459_v20 = vrot.slane %v4442_v2, %v4458_v59 }
 0x5fd   : > { %5073 = vmatprep.subr.bf16.mxu1 %v5506_v28  ;;  %5091 = vmatprep.subr.bf16.mxu0 %v5507_v8 }
 0x604   : > { %5074 = vmatpush3.bf16.xpose.msra.mxu1 %v5508_v58  ;;  %5092 = vmatpush3.bf16.xpose.msra.mxu0 %v5509_v47 }
 0x605   : > { %5075 = vmatprep.subr.bf16.mxu1 %v5510_v49  ;;  %5093 = vmatprep.subr.bf16.mxu0 %v5511_v40 }
 0x60c   : > { %5076 = vmatpush3.bf16.xpose.msra.mxu1 %v5512_v13  ;;  %5094 = vmatpush3.bf16.xpose.msra.mxu0 %v5513_v0  ;;  %v573_v13 = vld [vmem:[#allocation3] sm:$0xff] }
 0x60d   : > { %5306 = vmatprep.subr.bf16.mxu1 %v5563_v3 }
 0x613   : > { %5078 = vmatmul.mubr.bf16.vlgmr.msra.gmra.mrb[28].mxu1 %v5733_v12  ;;  %5096 = vmatmul.mubr.bf16.vlgmr.msra.gmra.mrb[28].mxu0 %v5733_v12  ;;  %v5516_v12 = vld [vmem:[%s7637_s15 + $0x10] sm:$0xff]  }
 0x614   : > { %5322 = vmatprep.mubr.msk.bf16.mxu1 %vm7663_vm4, %v5563_v3  ;;  %5307 = vmatpush3.bf16.xpose.msra.mxu1 %v5514_v42 }
 0x615   : > { %5308 = vmatprep.subr.bf16.mxu1 %v5563_v3 }
 0x61c   : > { %5309 = vmatpush3.bf16.xpose.msra.mxu1 %v5515_v60 }
 0x61d   : > { %5310 = vmatprep.subr.bf16.mxu1 %v5563_v3 }
 0x624   : > { %5311 = vmatpush3.bf16.xpose.msra.mxu1 %v5516_v12 }
 0x625   : > { %5312 = vmatprep.subr.bf16.mxu1 %v5563_v3 }
 0x62c   : > { %5313 = vmatpush3.bf16.xpose.msra.mxu1 %v5517_v35 }
 0x62d   : > { %5314 = vmatprep.subr.bf16.mxu1 %v5563_v3 }
 0x634   : > { %5315 = vmatpush3.bf16.xpose.msra.mxu1 %v5518_v45  ;;  %v4888_v45 = vld [vmem:[%s7638_s16] ss:$0 sm:$0xff] }
 0x635   : > { %5316 = vmatprep.subr.bf16.mxu1 %v5563_v3 }
 0x63c   : > { %5317 = vmatpush3.bf16.xpose.msra.mxu1 %v5519_v27 }
 0x63d   : > { %5318 = vmatprep.subr.bf16.mxu1 %v5563_v3 }
 0x644   : > { %5319 = vmatpush3.bf16.xpose.msra.mxu1 %v5520_v53 }
 0x645   : > { %5320 = vmatprep.subr.bf16.mxu1 %v5563_v3  ;;  %v4454_v3 = vsub.s32 2, %v5739_v17 }
 0x647   : > { %v4455_v21 = vrot.slane %v4442_v2, %v4454_v3 }
 0x64c   : > { %5321 = vmatpush3.bf16.xpose.msra.mxu1 %v5521_v29 }
 0x666   : > { %v3778_v41 = vpop.f32.mrb[20].mxu1  ;;  %v3819_v54 = vpop.f32.mrb[20].mxu0 }
 0x667   : > { %v3780_v32 = vpop.f32.mrb[21].mxu1  ;;  %v3821_v6 = vpop.f32.mrb[21].mxu0 }
 0x668   : > { %v3782_v48 = vpop.f32.mrb[22].mxu1  ;;  %v3823_v37 = vpop.f32.mrb[22].mxu0 }
 0x669   : > { %v3783_v30 = vpop.f32.mrb[23].mxu1  ;;  %v3824_v19 = vpop.f32.mrb[23].mxu0 }
 0x66a   : > { %v5539_v19 = vld [vmem:[#allocation2] sm:$0xff] }
 0x6a6   : > { %v4052_v50 = vpop.f32.mrb[24].mxu1  ;;  %v4093_v18 = vpop.f32.mrb[24].mxu0 }
 0x6a7   : > { %v4053_v63 = vadd.f32 %v4052_v50, %v3778_v41  ;;  %v4094_v5 = vadd.f32 %v4093_v18, %v3819_v54  ;;  %v4054_v11 = vpop.f32.mrb[25].mxu1  ;;  %v4095_v23 = vpop.f32.mrb[25].mxu0 }
 0x6a8   : > { %v4055_v24 = vadd.f32 %v4054_v11, %v3780_v32  ;;  %v4096_v57 = vadd.f32 %v4095_v23, %v3821_v6  ;;  %v4056_v16 = vpop.f32.mrb[26].mxu1  ;;  %v4097_v51 = vpop.f32.mrb[26].mxu0 }
 0x6a9   : > { %v4057_v15 = vpop.f32.mrb[27].mxu1  ;;  %v4098_v14 = vpop.f32.mrb[27].mxu0 }
 0x6e6   : > { %v4390_v25 = vpop.f32.mrb[28].mxu1  ;;  %v4431_v36 = vpop.f32.mrb[28].mxu0 }
 0x6e7   : > { %v4438_v61 = vadd.f32 %v4390_v25, %v4053_v63  ;;  %v4440_v10 = vadd.f32 %v4431_v36, %v4094_v5  ;;  %v4392_v34 = vpop.f32.mrb[29].mxu1  ;;  %v4433_v39 = vpop.f32.mrb[29].mxu0 }
 0x6e8   : > { %v4439_v44 = vadd.f32 %v4392_v34, %v4055_v24  ;;  %v4441_v46 = vadd.f32 %v4433_v39, %v4096_v57  ;;  %v4394_v31 = vpop.f32.mrb[30].mxu1  ;;  %v4435_v56 = vpop.f32.mrb[30].mxu0 }
 0x6e9   : > { %v4464_v9 = vadd.f32 %v4447_v43, %v4438_v61  ;;  %v4395_v22 = vpop.f32.mrb[31].mxu1  ;;  %v4436_v62 = vpop.f32.mrb[31].mxu0  ;;  %v4466_v4 = vadd.f32 %v4455_v21, %v4440_v10 }
 0x6ea   : > { %v4465_v26 = vadd.f32 %v4451_v1, %v4439_v44  ;;  %v4467_v38 = vadd.f32 %v4459_v20, %v4441_v46 }
 0x6eb   : > { %v4468_v55 = vmul.f32 0.5, %v4464_v9 }
 0x6ec   : > { %v4472_v33 = vmul.f32 0.5, %v4465_v26  ;;  %v4477_v28 = vmul.f32 0.5, %v4467_v38 }
 0x6ed   : > { %5528 = vtanh.f32 %v4468_v55 }
 0x6ee   : > { %5530 = vtanh.f32 %v4472_v33 }
 0x6ef   : > { %5532 = vtanh.f32 %v4466_v4 }
 0x6f0   : > { %5534 = vtanh.f32 %v4477_v28 }
 0x6f7   : > { %v5529_v8 = vpop.eup %5528 }
 0x6f8   : > { %v5531_v58 = vpop.eup %5530  ;;  %v4470_v47 = vadd.f32 1.0, %v5529_v8 }
 0x6f9   : > { %v4474_v49 = vadd.f32 1.0, %v5531_v58  ;;  %v5533_v17 = vpop.eup %5532 }
 0x6fa   : > { %v4471_v40 = vmul.f32 0.5, %v4470_v47  ;;  %v5535_v54 = vpop.eup %5534 }
 0x6fb   : > { %v4475_v0 = vmul.f32 0.5, %v4474_v49  ;;  %v4479_v32 = vadd.f32 1.0, %v5535_v54 }
 0x6fc   : > { %v4482_v42 = vmul.f32 %v5533_v17, %v4471_v40 }
 0x6fd   : > { %v4481_v60 = vmul.f32 %v4475_v0, %v573_v13  ;;  %v4480_v6 = vmul.f32 0.5, %v4479_v32 }
 0x6ff   : > { %v4483_v12 = vadd.f32 %v4482_v42, %v4481_v60 }
 0x701   : > { %5536 = vtanh.f32 %v4483_v12  ;;  %v4606_v41 = vsel %vm6987_vm3, %v4483_v12, %v573_v13 }
 0x702   : > { %4607 = vst [vmem:[#allocation3] sm:$0xff] %v4606_v41 }
 0x70b   : > { %v5537_v48 = vpop.eup %5536 }
 0x70c   : > { %v4485_v37 = vmul.f32 %v5537_v48, %v4480_v6 }
 0x70e   : > { %v4486_v30 = vpack.c.bf16 %v4485_v37, %v4485_v37  ;;  %v4604_v35 = vsel %vm6987_vm3, %v4485_v37, %v5539_v19 }
 0x70f   : > { %4605 = vst [vmem:[#allocation2] sm:$0xff] %v4604_v35 }
 0x710   : > { %5323 = vmatmul.mubr.bf16.vlgmr.msra.gmra.mrb[32].mxu1 %v4486_v30 }
 0x7e3   : > { %v4592_v27 = vpop.f32.mrb[32].mxu1 }
 0x7e4   : > { %v4593_v53 = vadd.f32 %v4888_v45, %v4592_v27  ;;  %v5324_v50 = vpop.f32.mrb[33].mxu1 }
 0x7e5   : > { %v4595_v18 = vpop.f32.mrb[34].mxu1 }
 0x7e6   : > { %v4608_v63 = vsel %vm6987_vm3, %v4593_v53, 0.0  ;;  %v5325_v5 = vpop.f32.mrb[35].mxu1 }
 0x7e7   : > { %4609 = vst [vmem:[%s5682_s27] sm:$0xff] %v4608_v63 }
 0x7e8 PF: > { %s7670_s24 = sld [smem:[#allocation7_spill]] }
 0x7ee   : > { %s35_s19 = sadd.s32 1, %s7670_s24  }
 0x7ef   : > { %p32_p10 = scmp.ge.s32.totalorder %s35_s19, 9  }
 0x7f1   :  { %34 = sbr.rel (!%p32_p10) target bundleno = 23 (0x17), region = 130 }

</bundles_post_ra>
